<compile_context>
chip_gen: v6e
topology: v6e:2x2x1
jax: 0.10.0
libtpu: 0.0.40
codegen_flags: <defaults>
</compile_context>

<pallas_src>
import functools

import jax
import jax.numpy as jnp
from jax import lax
from jax.experimental import pallas as pl
from jax.experimental.pallas import tpu as pltpu

NEG_SLOPE = 0.01  # nn.LeakyReLU() default negative_slope

# (Cin, Cout, K, S, P) per conv layer, as in SubMPD.__init__
LAYER_CFG = [
    (1, 32, 5, 3, 2),
    (32, 64, 5, 3, 2),
    (64, 128, 5, 3, 2),
    (128, 512, 5, 3, 2),
    (512, 1024, 5, 3, 2),
    (1024, 1, 3, 1, 1),
]


def _leaky(x):
    return jnp.where(x >= 0, x, NEG_SLOPE * x)


# ------------------------------ Static schedule ------------------------------

def _build_plan(H0):
    """Per-layer static schedule (plain Python ints, all known at trace time)."""
    plan = []
    H_in = H0
    for li, (cin, cout, K, S, P) in enumerate(LAYER_CFG):
        H_pad = H_in + 2 * P
        H_out = (H_pad - K) // S + 1
        assert H_out >= 1
        if H_out == 1:
            mode = "fold"                          # conv axis collapsed: plain matmuls
            tap_lo, tap_hi = P, min(K, P + H_in)   # only taps that hit real rows
            Hb = 0
        elif li == 0:
            assert cin == 1
            mode = "vpu"                           # Cin == 1: VPU broadcast MACs
            tap_lo, tap_hi = 0, K
            Hb = max(H_out + (K - 1) // S, (H_in + P - 1) // S + 1)
        else:
            mode = "strided"                       # per-tap batched MXU matmuls
            tap_lo, tap_hi = 0, K
            Hb = max(H_out + (K - 1) // S, (H_in + P - 1) // S + 1)
        r_max = (H_out - 1) * S + K - 1            # highest padded row any tap reads
        zero_rows = list(range(0, P)) + list(range(P + H_in, r_max + 1))
        plan.append(dict(idx=li, cin=cin, cout=cout, K=K, S=S, P=P,
                         H_in=H_in, H_pad=H_pad, H_out=H_out, Hb=Hb, mode=mode,
                         tap_lo=tap_lo, tap_hi=tap_hi, zero_rows=zero_rows,
                         scratch_slot=None))
        H_in = H_out
    # Supported layer-to-layer hand-offs for this module's shapes.
    assert plan[0]["mode"] == "vpu"
    for prev, cur in zip(plan, plan[1:]):
        if cur["mode"] == "strided":
            assert prev["mode"] in ("vpu", "strided")
        if cur["mode"] == "fold" and cur["H_in"] == 1:
            assert prev["mode"] == "fold"
    return plan


# ------------------------------ Fused Pallas kernel ------------------------------

def _fused_kernel(plan, N, *refs):
    """Whole SubMPD conv stack in one grid-less invocation.

    refs = [x_ps] + [w_l]*6 + [b_l]*6 + [y_l]*6 (outputs) + scratch.
      x_ps : (S0, Hb0*N, 1) f32   zero-padded, phase-split input sequences
      w_l  : (n_live_taps, Cin, Cout)  f32 for layer 1 (VPU), bf16 otherwise
      b_l  : (1, Cout) f32
      y_l  : (H_out*N, Cout) f32 pre-activation, row = out_pos*N + sequence
      scratch: (S, Hb*N, Cin) bf16 phase-split padded input of each strided layer
    """
    n_layers = len(plan)
    x_ref = refs[0]
    w_refs = refs[1:1 + n_layers]
    b_refs = refs[1 + n_layers:1 + 2 * n_layers]
    y_refs = refs[1 + 2 * n_layers:1 + 3 * n_layers]
    scratch_refs = refs[1 + 3 * n_layers:]

    act = None  # previous layer's activation value (bf16), row = out_pos*N + sequence

    for l, layer in enumerate(plan):
        K, S, P = layer["K"], layer["S"], layer["P"]
        H_out, Cout = layer["H_out"], layer["cout"]
        mode = layer["mode"]
        w_ref = w_refs[l]
        bias = b_refs[l][...]                                 # (1, Cout) f32
        M = H_out * N

        if mode == "vpu":
            # Layer 1 (Cin == 1): K broadcast MACs over all (out_pos, seq) rows at once.
            acc = jnp.zeros((M, Cout), jnp.float32)
            for kh in range(K):
                a, b = divmod(kh, S)
                tap = x_ref[b, pl.ds(a * N, M), :]            # (M, 1) f32, contiguous
                acc = acc + tap * w_ref[kh]                   # (M,1)*(1,Cout) on the VPU
        elif mode == "strided":
            # One (M, Cin) x (Cin, Cout) MXU matmul per tap; all sequences batched into M.
            src = scratch_refs[layer["scratch_slot"]]
            acc = jnp.zeros((M, Cout), jnp.float32)
            for kh in range(K):
                a, b = divmod(kh, S)
                lhs = src[b, pl.ds(a * N, M), :]              # (M, Cin) bf16, contiguous
                acc = acc + jnp.dot(lhs, w_ref[kh],
                                    preferred_element_type=jnp.float32)
        else:  # "fold": H_out == 1, only live taps were shipped
            # TODO(synk): layer 4's three K=128 taps could be im2col-merged into one K=384
            # matmul, but that needs an (out_pos, seq) transpose of the previous activation;
            # kept as separate dots to stay transpose-free inside the kernel.
            acc = jnp.zeros((N, Cout), jnp.float32)
            for t in range(layer["tap_hi"] - layer["tap_lo"]):
                h = layer["tap_lo"] - P + t                   # real input row index
                lhs = act[h * N:(h + 1) * N, :]               # (N, Cin) bf16
                acc = acc + jnp.dot(lhs, w_ref[t],
                                    preferred_element_type=jnp.float32)

        y = acc + bias
        y_refs[l][...] = y
        act = _leaky(y).astype(jnp.bfloat16)

        # Stage the activation into the next strided layer's phase-split padded scratch:
        #   scr[b, q*N + n, :] = act_padded[padded_row = q*S + b, sequence n, :]
        nxt = plan[l + 1] if l + 1 < n_layers else None
        if nxt is not None and nxt["mode"] == "strided":
            dst = scratch_refs[nxt["scratch_slot"]]
            Pn, Sn = nxt["P"], nxt["S"]
            zrow = jnp.zeros((N, nxt["cin"]), jnp.bfloat16)
            for r in nxt["zero_rows"]:                        # only pad rows that get read
                q, b = divmod(r, Sn)
                dst[b, pl.ds(q * N, N), :] = zrow
            for m in range(H_out):                            # real activation rows
                q, b = divmod(m + Pn, Sn)
                dst[b, pl.ds(q * N, N), :] = act[m * N:(m + 1) * N, :]


# ------------------------------ Wrapper (boundary glue) ------------------------------

def sub_mpd_forward(x, params, period):
    """Pallas-backed SubMPD.forward.  x: (B, T) float32.  Returns the 12 preds (NCHW)."""
    B, T = x.shape
    # NOTE: matches the module literally -- it pads a full `period` when T % period == 0.
    pad_amt = period - (T % period)
    xp = jnp.pad(x, ((0, 0), (0, pad_amt)), mode="reflect")
    Tp = T + pad_amt
    H0, W = Tp // period, period
    N = B * W

    plan = _build_plan(H0)
    S0, P0, Hb0 = plan[0]["S"], plan[0]["P"], plan[0]["Hb"]

    # (B, Tp) -> (N = B*period, H0): one sequence per (batch, phase-of-period) column.
    x_seq = jnp.transpose(xp.reshape(B, H0, W), (0, 2, 1)).reshape(N, H0)
    # Zero-pad the conv axis and phase-split it once, outside the kernel:
    #   x_ps[b, q*N + n, 0] = x_padded[n, q*S0 + b]
    x_pad = jnp.pad(x_seq, ((0, 0), (P0, Hb0 * S0 - P0 - H0)))
    x_ps = jnp.transpose(x_pad.reshape(N, Hb0, S0), (2, 1, 0)).reshape(S0, Hb0 * N, 1)
    x_ps = x_ps.astype(jnp.float32)

    # Only live taps; bf16 weights for the MXU layers, f32 for the VPU layer; f32 biases.
    w_in, b_in = [], []
    for layer, (_, w_kic, bvec, _, _) in zip(plan, params):
        w_use = w_kic[layer["tap_lo"]:layer["tap_hi"]]
        w_dt = jnp.float32 if layer["mode"] == "vpu" else jnp.bfloat16
        w_in.append(w_use.astype(w_dt))
        b_in.append(bvec.reshape(1, -1).astype(jnp.float32))

    # bf16 phase-split padded VMEM scratch for each strided layer's input.
    scratch_shapes = []
    for layer in plan:
        if layer["mode"] == "strided":
            layer["scratch_slot"] = len(scratch_shapes)
            scratch_shapes.append(
                pltpu.VMEM((layer["S"], layer["Hb"] * N, layer["cin"]), jnp.bfloat16))

    # Only the 6 pre-activation maps leave the kernel; LeakyReLU is re-applied in XLA.
    # TODO(synk): the Cout=32/64 outputs are not lane-dense (masked stores); repacking to
    # (H_out, N*Cout) would need an in-kernel relayout, skipped at these tiny sizes.
    out_shapes = [jax.ShapeDtypeStruct((layer["H_out"] * N, layer["cout"]), jnp.float32)
                  for layer in plan]

    # TODO(synk): on v7x a 2-core "parallel" grid sharding Cout of the 512->1024 / 1024->1
    # layers could halve the big-weight streaming; at these sizes the whole stack is a
    # single ~2 MiB VMEM block, so the kernel stays grid-less.
    ys = pl.pallas_call(
        functools.partial(_fused_kernel, plan, N),
        out_shape=out_shapes,
        scratch_shapes=scratch_shapes,
        compiler_params=pltpu.CompilerParams(vmem_limit_bytes=16 * 1024 * 1024),
    )(x_ps, *w_in, *b_in)

    # Boundary glue back to the module's NCHW pred layout (y and LeakyReLU(y) per layer).
    preds = []
    for layer, y in zip(plan, ys):
        a = _leaky(y)
        for z in (y, a):
            z4 = jnp.transpose(
                z.reshape(layer["H_out"], B, W, layer["cout"]), (1, 3, 0, 2))
            preds.append(z4)
    return preds


# --------------------------- Parameters (synthetic, weight_norm) -------------------------

def make_params(key):
    """Deterministic weight_norm-parameterized conv weights: w = g * v / ||v|| (dim=0)."""
    params = []
    for (cin, cout, k, s, p) in LAYER_CFG:
        key, kv, kg, kb = jax.random.split(key, 4)
        fan_in = cin * k
        v = jax.random.normal(kv, (cout, cin, k, 1), jnp.float32) / jnp.sqrt(fan_in)
        g = jax.random.uniform(kg, (cout,), jnp.float32, minval=0.5, maxval=1.5)
        b = jax.random.uniform(kb, (cout,), jnp.float32, minval=-0.1, maxval=0.1)
        vnorm = jnp.sqrt(jnp.sum(v * v, axis=(1, 2, 3), keepdims=True))
        w_oihw = g.reshape(-1, 1, 1, 1) * v / vnorm           # weight_norm(dim=0)
        w_kic = jnp.transpose(w_oihw[..., 0], (2, 1, 0))      # (K, Cin, Cout)
        params.append((w_oihw, w_kic, b, s, p))
    return params


# ------------------------------ Pure-JAX reference ------------------------------

def sub_mpd_reference(x, params, period):
    """lax.conv reference with the same bf16 weight/activation rounding as the kernel."""
    B, T = x.shape
    pad_amt = period - (T % period)
    xp = jnp.pad(x, ((0, 0), (0, pad_amt)), mode="reflect")
    Tp = T + pad_amt
    cur = xp.reshape(B, 1, Tp // period, period)
    preds = []
    for li, (w_oihw, _, b, s, p) in enumerate(params):
        if li == 0:
            lhs, rhs = cur, w_oihw                            # layer 1 runs in f32
        else:
            lhs = cur.astype(jnp.bfloat16).astype(jnp.float32)
            rhs = w_oihw.astype(jnp.bfloat16).astype(jnp.float32)
        y = lax.conv_general_dilated(
            lhs, rhs,
            window_strides=(s, 1),
            padding=((p, p), (0, 0)),
            dimension_numbers=("NCHW", "OIHW", "NCHW"),
            precision=lax.Precision.HIGHEST,
        ) + b.reshape(1, -1, 1, 1)
        a = jnp.where(y >= 0, y, NEG_SLOPE * y)
        preds.append(y)
        preds.append(a)
        cur = a
    return preds


# ---------------------------------- Main ------------------------------------

if __name__ == "__main__":
    key = jax.random.PRNGKey(0)
    k_x, k_p = jax.random.split(key)

    period = 3
    B, T = 2, 240
    x = jax.random.normal(k_x, (B, T), jnp.float32)
    params = make_params(k_p)

    preds = sub_mpd_forward(x, params, period)
    preds = [jax.block_until_ready(p) for p in preds]

    ref = sub_mpd_reference(x, params, period)
    for i, (p, r) in enumerate(zip(preds, ref)):
        assert p.shape == r.shape, (i, p.shape, r.shape)
        assert jnp.allclose(p, r, rtol=1e-3, atol=1e-3), f"mismatch at pred {i}"

    print("KERNEL_OK")
</pallas_src>

<mosaic_0001>
module attributes {stable_mosaic.version = 11 : i64} {
  func.func @_fused_kernel(%arg0: memref<3x168x1xf32, #tpu.memory_space<vmem>>, %arg1: memref<5x1x32xf32, #tpu.memory_space<vmem>>, %arg2: memref<5x32x64xbf16, #tpu.memory_space<vmem>>, %arg3: memref<5x64x128xbf16, #tpu.memory_space<vmem>>, %arg4: memref<3x128x512xbf16, #tpu.memory_space<vmem>>, %arg5: memref<1x512x1024xbf16, #tpu.memory_space<vmem>>, %arg6: memref<1x1024x1xbf16, #tpu.memory_space<vmem>>, %arg7: memref<1x32xf32, #tpu.memory_space<vmem>>, %arg8: memref<1x64xf32, #tpu.memory_space<vmem>>, %arg9: memref<1x128xf32, #tpu.memory_space<vmem>>, %arg10: memref<1x512xf32, #tpu.memory_space<vmem>>, %arg11: memref<1x1024xf32, #tpu.memory_space<vmem>>, %arg12: memref<1x1xf32, #tpu.memory_space<vmem>>, %arg13: memref<162x32xf32, #tpu.memory_space<vmem>>, %arg14: memref<54x64xf32, #tpu.memory_space<vmem>>, %arg15: memref<18x128xf32, #tpu.memory_space<vmem>>, %arg16: memref<6x512xf32, #tpu.memory_space<vmem>>, %arg17: memref<6x1024xf32, #tpu.memory_space<vmem>>, %arg18: memref<6x1xf32, #tpu.memory_space<vmem>>, %arg19: memref<3x60x32xbf16, #tpu.memory_space<vmem>>, %arg20: memref<3x24x64xbf16, #tpu.memory_space<vmem>>) attributes {dimension_semantics = [], scalar_prefetch = 0 : i64, scratch_operands = 2 : i64, tpu.core_type = #tpu.core_type<tc>} {
    %c0 = arith.constant 0 : index
    %c0_0 = arith.constant 0 : index
    %0 = vector.load %arg7[%c0, %c0_0] : memref<1x32xf32, #tpu.memory_space<vmem>>, vector<1x32xf32>
    %cst = arith.constant 0.000000e+00 : f32
    %1 = vector.broadcast %cst : f32 to vector<162x32xf32>
    %c0_1 = arith.constant 0 : index
    %c0_2 = arith.constant 0 : index
    %c0_3 = arith.constant 0 : index
    %2 = vector.load %arg0[%c0_1, %c0_2, %c0_3] : memref<3x168x1xf32, #tpu.memory_space<vmem>>, vector<1x162x1xf32>
    %3 = vector.shape_cast %2 : vector<1x162x1xf32> to vector<162x1xf32>
    %c0_4 = arith.constant 0 : index
    %c0_5 = arith.constant 0 : index
    %c0_6 = arith.constant 0 : index
    %4 = vector.load %arg1[%c0_4, %c0_5, %c0_6] : memref<5x1x32xf32, #tpu.memory_space<vmem>>, vector<1x1x32xf32>
    %5 = vector.shape_cast %4 : vector<1x1x32xf32> to vector<1x32xf32>
    %6 = vector.broadcast %3 : vector<162x1xf32> to vector<162x32xf32>
    %7 = vector.broadcast %5 : vector<1x32xf32> to vector<162x32xf32>
    %8 = arith.mulf %6, %7 : vector<162x32xf32>
    %9 = arith.addf %1, %8 : vector<162x32xf32>
    %c1 = arith.constant 1 : index
    %c0_7 = arith.constant 0 : index
    %c0_8 = arith.constant 0 : index
    %10 = vector.load %arg0[%c1, %c0_7, %c0_8] : memref<3x168x1xf32, #tpu.memory_space<vmem>>, vector<1x162x1xf32>
    %11 = vector.shape_cast %10 : vector<1x162x1xf32> to vector<162x1xf32>
    %c1_9 = arith.constant 1 : index
    %c0_10 = arith.constant 0 : index
    %c0_11 = arith.constant 0 : index
    %12 = vector.load %arg1[%c1_9, %c0_10, %c0_11] : memref<5x1x32xf32, #tpu.memory_space<vmem>>, vector<1x1x32xf32>
    %13 = vector.shape_cast %12 : vector<1x1x32xf32> to vector<1x32xf32>
    %14 = vector.broadcast %11 : vector<162x1xf32> to vector<162x32xf32>
    %15 = vector.broadcast %13 : vector<1x32xf32> to vector<162x32xf32>
    %16 = arith.mulf %14, %15 : vector<162x32xf32>
    %17 = arith.addf %9, %16 : vector<162x32xf32>
    %c2 = arith.constant 2 : index
    %c0_12 = arith.constant 0 : index
    %c0_13 = arith.constant 0 : index
    %18 = vector.load %arg0[%c2, %c0_12, %c0_13] : memref<3x168x1xf32, #tpu.memory_space<vmem>>, vector<1x162x1xf32>
    %19 = vector.shape_cast %18 : vector<1x162x1xf32> to vector<162x1xf32>
    %c2_14 = arith.constant 2 : index
    %c0_15 = arith.constant 0 : index
    %c0_16 = arith.constant 0 : index
    %20 = vector.load %arg1[%c2_14, %c0_15, %c0_16] : memref<5x1x32xf32, #tpu.memory_space<vmem>>, vector<1x1x32xf32>
    %21 = vector.shape_cast %20 : vector<1x1x32xf32> to vector<1x32xf32>
    %22 = vector.broadcast %19 : vector<162x1xf32> to vector<162x32xf32>
    %23 = vector.broadcast %21 : vector<1x32xf32> to vector<162x32xf32>
    %24 = arith.mulf %22, %23 : vector<162x32xf32>
    %25 = arith.addf %17, %24 : vector<162x32xf32>
    %c0_17 = arith.constant 0 : index
    %c6 = arith.constant 6 : index
    %c0_18 = arith.constant 0 : index
    %26 = vector.load %arg0[%c0_17, %c6, %c0_18] : memref<3x168x1xf32, #tpu.memory_space<vmem>>, vector<1x162x1xf32>
    %27 = vector.shape_cast %26 : vector<1x162x1xf32> to vector<162x1xf32>
    %c3 = arith.constant 3 : index
    %c0_19 = arith.constant 0 : index
    %c0_20 = arith.constant 0 : index
    %28 = vector.load %arg1[%c3, %c0_19, %c0_20] : memref<5x1x32xf32, #tpu.memory_space<vmem>>, vector<1x1x32xf32>
    %29 = vector.shape_cast %28 : vector<1x1x32xf32> to vector<1x32xf32>
    %30 = vector.broadcast %27 : vector<162x1xf32> to vector<162x32xf32>
    %31 = vector.broadcast %29 : vector<1x32xf32> to vector<162x32xf32>
    %32 = arith.mulf %30, %31 : vector<162x32xf32>
    %33 = arith.addf %25, %32 : vector<162x32xf32>
    %c1_21 = arith.constant 1 : index
    %c6_22 = arith.constant 6 : index
    %c0_23 = arith.constant 0 : index
    %34 = vector.load %arg0[%c1_21, %c6_22, %c0_23] : memref<3x168x1xf32, #tpu.memory_space<vmem>>, vector<1x162x1xf32>
    %35 = vector.shape_cast %34 : vector<1x162x1xf32> to vector<162x1xf32>
    %c4 = arith.constant 4 : index
    %c0_24 = arith.constant 0 : index
    %c0_25 = arith.constant 0 : index
    %36 = vector.load %arg1[%c4, %c0_24, %c0_25] : memref<5x1x32xf32, #tpu.memory_space<vmem>>, vector<1x1x32xf32>
    %37 = vector.shape_cast %36 : vector<1x1x32xf32> to vector<1x32xf32>
    %38 = vector.broadcast %35 : vector<162x1xf32> to vector<162x32xf32>
    %39 = vector.broadcast %37 : vector<1x32xf32> to vector<162x32xf32>
    %40 = arith.mulf %38, %39 : vector<162x32xf32>
    %41 = arith.addf %33, %40 : vector<162x32xf32>
    %42 = vector.broadcast %0 : vector<1x32xf32> to vector<162x32xf32>
    %43 = arith.addf %41, %42 : vector<162x32xf32>
    %c0_26 = arith.constant 0 : index
    %c0_27 = arith.constant 0 : index
    %44 = vector.load %arg13[%c0_26, %c0_27] : memref<162x32xf32, #tpu.memory_space<vmem>>, vector<162x32xf32>
    tpu.vector_store %arg13[%c0_26, %c0_27], %43 {strides = array<i32>} : memref<162x32xf32, #tpu.memory_space<vmem>>, vector<162x32xf32>,
    %cst_28 = arith.constant 0.000000e+00 : f32
    %45 = vector.broadcast %cst_28 : f32 to vector<162x32xf32>
    %46 = arith.cmpf oge, %43, %45 : vector<162x32xf32>
    %cst_29 = arith.constant 0.00999999977 : f32
    %47 = vector.broadcast %cst_29 : f32 to vector<162x32xf32>
    %48 = arith.mulf %47, %43 : vector<162x32xf32>
    %49 = arith.select %46, %43, %48 : vector<162x32xi1>, vector<162x32xf32>
    %50 = arith.truncf %49 : vector<162x32xf32> to vector<162x32xbf16>
    %cst_30 = arith.constant 0.000000e+00 : bf16
    %51 = vector.broadcast %cst_30 : bf16 to vector<6x32xbf16>
    %c0_31 = arith.constant 0 : index
    %c0_32 = arith.constant 0 : index
    %c0_33 = arith.constant 0 : index
    %52 = vector.load %arg19[%c0_31, %c0_32, %c0_33] : memref<3x60x32xbf16, #tpu.memory_space<vmem>>, vector<1x6x32xbf16>
    %53 = vector.shape_cast %52 : vector<1x6x32xbf16> to vector<6x32xbf16>
    %54 = vector.shape_cast %51 : vector<6x32xbf16> to vector<1x6x32xbf16>
    tpu.vector_store %arg19[%c0_31, %c0_32, %c0_33], %54 {strides = array<i32>} : memref<3x60x32xbf16, #tpu.memory_space<vmem>>, vector<1x6x32xbf16>,
    %c1_34 = arith.constant 1 : index
    %c0_35 = arith.constant 0 : index
    %c0_36 = arith.constant 0 : index
    %55 = vector.load %arg19[%c1_34, %c0_35, %c0_36] : memref<3x60x32xbf16, #tpu.memory_space<vmem>>, vector<1x6x32xbf16>
    %56 = vector.shape_cast %55 : vector<1x6x32xbf16> to vector<6x32xbf16>
    %57 = vector.shape_cast %51 : vector<6x32xbf16> to vector<1x6x32xbf16>
    tpu.vector_store %arg19[%c1_34, %c0_35, %c0_36], %57 {strides = array<i32>} : memref<3x60x32xbf16, #tpu.memory_space<vmem>>, vector<1x6x32xbf16>,
    %58 = vector.extract_strided_slice %50 {offsets = [0, 0], sizes = [6, 32], strides = [1, 1]} : vector<162x32xbf16> to vector<6x32xbf16>
    %c2_37 = arith.constant 2 : index
    %c0_38 = arith.constant 0 : index
    %c0_39 = arith.constant 0 : index
    %59 = vector.load %arg19[%c2_37, %c0_38, %c0_39] : memref<3x60x32xbf16, #tpu.memory_space<vmem>>, vector<1x6x32xbf16>
    %60 = vector.shape_cast %59 : vector<1x6x32xbf16> to vector<6x32xbf16>
    %61 = vector.shape_cast %58 : vector<6x32xbf16> to vector<1x6x32xbf16>
    tpu.vector_store %arg19[%c2_37, %c0_38, %c0_39], %61 {strides = array<i32>} : memref<3x60x32xbf16, #tpu.memory_space<vmem>>, vector<1x6x32xbf16>,
    %62 = vector.extract_strided_slice %50 {offsets = [6, 0], sizes = [6, 32], strides = [1, 1]} : vector<162x32xbf16> to vector<6x32xbf16>
    %c0_40 = arith.constant 0 : index
    %c6_41 = arith.constant 6 : index
    %c0_42 = arith.constant 0 : index
    %63 = vector.load %arg19[%c0_40, %c6_41, %c0_42] : memref<3x60x32xbf16, #tpu.memory_space<vmem>>, vector<1x6x32xbf16>
    %64 = vector.shape_cast %63 : vector<1x6x32xbf16> to vector<6x32xbf16>
    %65 = vector.shape_cast %62 : vector<6x32xbf16> to vector<1x6x32xbf16>
    tpu.vector_store %arg19[%c0_40, %c6_41, %c0_42], %65 {strides = array<i32>} : memref<3x60x32xbf16, #tpu.memory_space<vmem>>, vector<1x6x32xbf16>,
    %66 = vector.extract_strided_slice %50 {offsets = [12, 0], sizes = [6, 32], strides = [1, 1]} : vector<162x32xbf16> to vector<6x32xbf16>
    %c1_43 = arith.constant 1 : index
    %c6_44 = arith.constant 6 : index
    %c0_45 = arith.constant 0 : index
    %67 = vector.load %arg19[%c1_43, %c6_44, %c0_45] : memref<3x60x32xbf16, #tpu.memory_space<vmem>>, vector<1x6x32xbf16>
    %68 = vector.shape_cast %67 : vector<1x6x32xbf16> to vector<6x32xbf16>
    %69 = vector.shape_cast %66 : vector<6x32xbf16> to vector<1x6x32xbf16>
    tpu.vector_store %arg19[%c1_43, %c6_44, %c0_45], %69 {strides = array<i32>} : memref<3x60x32xbf16, #tpu.memory_space<vmem>>, vector<1x6x32xbf16>,
    %70 = vector.extract_strided_slice %50 {offsets = [18, 0], sizes = [6, 32], strides = [1, 1]} : vector<162x32xbf16> to vector<6x32xbf16>
    %c2_46 = arith.constant 2 : index
    %c6_47 = arith.constant 6 : index
    %c0_48 = arith.constant 0 : index
    %71 = vector.load %arg19[%c2_46, %c6_47, %c0_48] : memref<3x60x32xbf16, #tpu.memory_space<vmem>>, vector<1x6x32xbf16>
    %72 = vector.shape_cast %71 : vector<1x6x32xbf16> to vector<6x32xbf16>
    %73 = vector.shape_cast %70 : vector<6x32xbf16> to vector<1x6x32xbf16>
    tpu.vector_store %arg19[%c2_46, %c6_47, %c0_48], %73 {strides = array<i32>} : memref<3x60x32xbf16, #tpu.memory_space<vmem>>, vector<1x6x32xbf16>,
    %74 = vector.extract_strided_slice %50 {offsets = [24, 0], sizes = [6, 32], strides = [1, 1]} : vector<162x32xbf16> to vector<6x32xbf16>
    %c0_49 = arith.constant 0 : index
    %c12 = arith.constant 12 : index
    %c0_50 = arith.constant 0 : index
    %75 = vector.load %arg19[%c0_49, %c12, %c0_50] : memref<3x60x32xbf16, #tpu.memory_space<vmem>>, vector<1x6x32xbf16>
    %76 = vector.shape_cast %75 : vector<1x6x32xbf16> to vector<6x32xbf16>
    %77 = vector.shape_cast %74 : vector<6x32xbf16> to vector<1x6x32xbf16>
    tpu.vector_store %arg19[%c0_49, %c12, %c0_50], %77 {strides = array<i32>} : memref<3x60x32xbf16, #tpu.memory_space<vmem>>, vector<1x6x32xbf16>,
    %78 = vector.extract_strided_slice %50 {offsets = [30, 0], sizes = [6, 32], strides = [1, 1]} : vector<162x32xbf16> to vector<6x32xbf16>
    %c1_51 = arith.constant 1 : index
    %c12_52 = arith.constant 12 : index
    %c0_53 = arith.constant 0 : index
    %79 = vector.load %arg19[%c1_51, %c12_52, %c0_53] : memref<3x60x32xbf16, #tpu.memory_space<vmem>>, vector<1x6x32xbf16>
    %80 = vector.shape_cast %79 : vector<1x6x32xbf16> to vector<6x32xbf16>
    %81 = vector.shape_cast %78 : vector<6x32xbf16> to vector<1x6x32xbf16>
    tpu.vector_store %arg19[%c1_51, %c12_52, %c0_53], %81 {strides = array<i32>} : memref<3x60x32xbf16, #tpu.memory_space<vmem>>, vector<1x6x32xbf16>,
    %82 = vector.extract_strided_slice %50 {offsets = [36, 0], sizes = [6, 32], strides = [1, 1]} : vector<162x32xbf16> to vector<6x32xbf16>
    %c2_54 = arith.constant 2 : index
    %c12_55 = arith.constant 12 : index
    %c0_56 = arith.constant 0 : index
    %83 = vector.load %arg19[%c2_54, %c12_55, %c0_56] : memref<3x60x32xbf16, #tpu.memory_space<vmem>>, vector<1x6x32xbf16>
    %84 = vector.shape_cast %83 : vector<1x6x32xbf16> to vector<6x32xbf16>
    %85 = vector.shape_cast %82 : vector<6x32xbf16> to vector<1x6x32xbf16>
    tpu.vector_store %arg19[%c2_54, %c12_55, %c0_56], %85 {strides = array<i32>} : memref<3x60x32xbf16, #tpu.memory_space<vmem>>, vector<1x6x32xbf16>,
    %86 = vector.extract_strided_slice %50 {offsets = [42, 0], sizes = [6, 32], strides = [1, 1]} : vector<162x32xbf16> to vector<6x32xbf16>
    %c0_57 = arith.constant 0 : index
    %c18 = arith.constant 18 : index
    %c0_58 = arith.constant 0 : index
    %87 = vector.load %arg19[%c0_57, %c18, %c0_58] : memref<3x60x32xbf16, #tpu.memory_space<vmem>>, vector<1x6x32xbf16>
    %88 = vector.shape_cast %87 : vector<1x6x32xbf16> to vector<6x32xbf16>
    %89 = vector.shape_cast %86 : vector<6x32xbf16> to vector<1x6x32xbf16>
    tpu.vector_store %arg19[%c0_57, %c18, %c0_58], %89 {strides = array<i32>} : memref<3x60x32xbf16, #tpu.memory_space<vmem>>, vector<1x6x32xbf16>,
    %90 = vector.extract_strided_slice %50 {offsets = [48, 0], sizes = [6, 32], strides = [1, 1]} : vector<162x32xbf16> to vector<6x32xbf16>
    %c1_59 = arith.constant 1 : index
    %c18_60 = arith.constant 18 : index
    %c0_61 = arith.constant 0 : index
    %91 = vector.load %arg19[%c1_59, %c18_60, %c0_61] : memref<3x60x32xbf16, #tpu.memory_space<vmem>>, vector<1x6x32xbf16>
    %92 = vector.shape_cast %91 : vector<1x6x32xbf16> to vector<6x32xbf16>
    %93 = vector.shape_cast %90 : vector<6x32xbf16> to vector<1x6x32xbf16>
    tpu.vector_store %arg19[%c1_59, %c18_60, %c0_61], %93 {strides = array<i32>} : memref<3x60x32xbf16, #tpu.memory_space<vmem>>, vector<1x6x32xbf16>,
    %94 = vector.extract_strided_slice %50 {offsets = [54, 0], sizes = [6, 32], strides = [1, 1]} : vector<162x32xbf16> to vector<6x32xbf16>
    %c2_62 = arith.constant 2 : index
    %c18_63 = arith.constant 18 : index
    %c0_64 = arith.constant 0 : index
    %95 = vector.load %arg19[%c2_62, %c18_63, %c0_64] : memref<3x60x32xbf16, #tpu.memory_space<vmem>>, vector<1x6x32xbf16>
    %96 = vector.shape_cast %95 : vector<1x6x32xbf16> to vector<6x32xbf16>
    %97 = vector.shape_cast %94 : vector<6x32xbf16> to vector<1x6x32xbf16>
    tpu.vector_store %arg19[%c2_62, %c18_63, %c0_64], %97 {strides = array<i32>} : memref<3x60x32xbf16, #tpu.memory_space<vmem>>, vector<1x6x32xbf16>,
    %98 = vector.extract_strided_slice %50 {offsets = [60, 0], sizes = [6, 32], strides = [1, 1]} : vector<162x32xbf16> to vector<6x32xbf16>
    %c0_65 = arith.constant 0 : index
    %c24 = arith.constant 24 : index
    %c0_66 = arith.constant 0 : index
    %99 = vector.load %arg19[%c0_65, %c24, %c0_66] : memref<3x60x32xbf16, #tpu.memory_space<vmem>>, vector<1x6x32xbf16>
    %100 = vector.shape_cast %99 : vector<1x6x32xbf16> to vector<6x32xbf16>
    %101 = vector.shape_cast %98 : vector<6x32xbf16> to vector<1x6x32xbf16>
    tpu.vector_store %arg19[%c0_65, %c24, %c0_66], %101 {strides = array<i32>} : memref<3x60x32xbf16, #tpu.memory_space<vmem>>, vector<1x6x32xbf16>,
    %102 = vector.extract_strided_slice %50 {offsets = [66, 0], sizes = [6, 32], strides = [1, 1]} : vector<162x32xbf16> to vector<6x32xbf16>
    %c1_67 = arith.constant 1 : index
    %c24_68 = arith.constant 24 : index
    %c0_69 = arith.constant 0 : index
    %103 = vector.load %arg19[%c1_67, %c24_68, %c0_69] : memref<3x60x32xbf16, #tpu.memory_space<vmem>>, vector<1x6x32xbf16>
    %104 = vector.shape_cast %103 : vector<1x6x32xbf16> to vector<6x32xbf16>
    %105 = vector.shape_cast %102 : vector<6x32xbf16> to vector<1x6x32xbf16>
    tpu.vector_store %arg19[%c1_67, %c24_68, %c0_69], %105 {strides = array<i32>} : memref<3x60x32xbf16, #tpu.memory_space<vmem>>, vector<1x6x32xbf16>,
    %106 = vector.extract_strided_slice %50 {offsets = [72, 0], sizes = [6, 32], strides = [1, 1]} : vector<162x32xbf16> to vector<6x32xbf16>
    %c2_70 = arith.constant 2 : index
    %c24_71 = arith.constant 24 : index
    %c0_72 = arith.constant 0 : index
    %107 = vector.load %arg19[%c2_70, %c24_71, %c0_72] : memref<3x60x32xbf16, #tpu.memory_space<vmem>>, vector<1x6x32xbf16>
    %108 = vector.shape_cast %107 : vector<1x6x32xbf16> to vector<6x32xbf16>
    %109 = vector.shape_cast %106 : vector<6x32xbf16> to vector<1x6x32xbf16>
    tpu.vector_store %arg19[%c2_70, %c24_71, %c0_72], %109 {strides = array<i32>} : memref<3x60x32xbf16, #tpu.memory_space<vmem>>, vector<1x6x32xbf16>,
    %110 = vector.extract_strided_slice %50 {offsets = [78, 0], sizes = [6, 32], strides = [1, 1]} : vector<162x32xbf16> to vector<6x32xbf16>
    %c0_73 = arith.constant 0 : index
    %c30 = arith.constant 30 : index
    %c0_74 = arith.constant 0 : index
    %111 = vector.load %arg19[%c0_73, %c30, %c0_74] : memref<3x60x32xbf16, #tpu.memory_space<vmem>>, vector<1x6x32xbf16>
    %112 = vector.shape_cast %111 : vector<1x6x32xbf16> to vector<6x32xbf16>
    %113 = vector.shape_cast %110 : vector<6x32xbf16> to vector<1x6x32xbf16>
    tpu.vector_store %arg19[%c0_73, %c30, %c0_74], %113 {strides = array<i32>} : memref<3x60x32xbf16, #tpu.memory_space<vmem>>, vector<1x6x32xbf16>,
    %114 = vector.extract_strided_slice %50 {offsets = [84, 0], sizes = [6, 32], strides = [1, 1]} : vector<162x32xbf16> to vector<6x32xbf16>
    %c1_75 = arith.constant 1 : index
    %c30_76 = arith.constant 30 : index
    %c0_77 = arith.constant 0 : index
    %115 = vector.load %arg19[%c1_75, %c30_76, %c0_77] : memref<3x60x32xbf16, #tpu.memory_space<vmem>>, vector<1x6x32xbf16>
    %116 = vector.shape_cast %115 : vector<1x6x32xbf16> to vector<6x32xbf16>
    %117 = vector.shape_cast %114 : vector<6x32xbf16> to vector<1x6x32xbf16>
    tpu.vector_store %arg19[%c1_75, %c30_76, %c0_77], %117 {strides = array<i32>} : memref<3x60x32xbf16, #tpu.memory_space<vmem>>, vector<1x6x32xbf16>,
    %118 = vector.extract_strided_slice %50 {offsets = [90, 0], sizes = [6, 32], strides = [1, 1]} : vector<162x32xbf16> to vector<6x32xbf16>
    %c2_78 = arith.constant 2 : index
    %c30_79 = arith.constant 30 : index
    %c0_80 = arith.constant 0 : index
    %119 = vector.load %arg19[%c2_78, %c30_79, %c0_80] : memref<3x60x32xbf16, #tpu.memory_space<vmem>>, vector<1x6x32xbf16>
    %120 = vector.shape_cast %119 : vector<1x6x32xbf16> to vector<6x32xbf16>
    %121 = vector.shape_cast %118 : vector<6x32xbf16> to vector<1x6x32xbf16>
    tpu.vector_store %arg19[%c2_78, %c30_79, %c0_80], %121 {strides = array<i32>} : memref<3x60x32xbf16, #tpu.memory_space<vmem>>, vector<1x6x32xbf16>,
    %122 = vector.extract_strided_slice %50 {offsets = [96, 0], sizes = [6, 32], strides = [1, 1]} : vector<162x32xbf16> to vector<6x32xbf16>
    %c0_81 = arith.constant 0 : index
    %c36 = arith.constant 36 : index
    %c0_82 = arith.constant 0 : index
    %123 = vector.load %arg19[%c0_81, %c36, %c0_82] : memref<3x60x32xbf16, #tpu.memory_space<vmem>>, vector<1x6x32xbf16>
    %124 = vector.shape_cast %123 : vector<1x6x32xbf16> to vector<6x32xbf16>
    %125 = vector.shape_cast %122 : vector<6x32xbf16> to vector<1x6x32xbf16>
    tpu.vector_store %arg19[%c0_81, %c36, %c0_82], %125 {strides = array<i32>} : memref<3x60x32xbf16, #tpu.memory_space<vmem>>, vector<1x6x32xbf16>,
    %126 = vector.extract_strided_slice %50 {offsets = [102, 0], sizes = [6, 32], strides = [1, 1]} : vector<162x32xbf16> to vector<6x32xbf16>
    %c1_83 = arith.constant 1 : index
    %c36_84 = arith.constant 36 : index
    %c0_85 = arith.constant 0 : index
    %127 = vector.load %arg19[%c1_83, %c36_84, %c0_85] : memref<3x60x32xbf16, #tpu.memory_space<vmem>>, vector<1x6x32xbf16>
    %128 = vector.shape_cast %127 : vector<1x6x32xbf16> to vector<6x32xbf16>
    %129 = vector.shape_cast %126 : vector<6x32xbf16> to vector<1x6x32xbf16>
    tpu.vector_store %arg19[%c1_83, %c36_84, %c0_85], %129 {strides = array<i32>} : memref<3x60x32xbf16, #tpu.memory_space<vmem>>, vector<1x6x32xbf16>,
    %130 = vector.extract_strided_slice %50 {offsets = [108, 0], sizes = [6, 32], strides = [1, 1]} : vector<162x32xbf16> to vector<6x32xbf16>
    %c2_86 = arith.constant 2 : index
    %c36_87 = arith.constant 36 : index
    %c0_88 = arith.constant 0 : index
    %131 = vector.load %arg19[%c2_86, %c36_87, %c0_88] : memref<3x60x32xbf16, #tpu.memory_space<vmem>>, vector<1x6x32xbf16>
    %132 = vector.shape_cast %131 : vector<1x6x32xbf16> to vector<6x32xbf16>
    %133 = vector.shape_cast %130 : vector<6x32xbf16> to vector<1x6x32xbf16>
    tpu.vector_store %arg19[%c2_86, %c36_87, %c0_88], %133 {strides = array<i32>} : memref<3x60x32xbf16, #tpu.memory_space<vmem>>, vector<1x6x32xbf16>,
    %134 = vector.extract_strided_slice %50 {offsets = [114, 0], sizes = [6, 32], strides = [1, 1]} : vector<162x32xbf16> to vector<6x32xbf16>
    %c0_89 = arith.constant 0 : index
    %c42 = arith.constant 42 : index
    %c0_90 = arith.constant 0 : index
    %135 = vector.load %arg19[%c0_89, %c42, %c0_90] : memref<3x60x32xbf16, #tpu.memory_space<vmem>>, vector<1x6x32xbf16>
    %136 = vector.shape_cast %135 : vector<1x6x32xbf16> to vector<6x32xbf16>
    %137 = vector.shape_cast %134 : vector<6x32xbf16> to vector<1x6x32xbf16>
    tpu.vector_store %arg19[%c0_89, %c42, %c0_90], %137 {strides = array<i32>} : memref<3x60x32xbf16, #tpu.memory_space<vmem>>, vector<1x6x32xbf16>,
    %138 = vector.extract_strided_slice %50 {offsets = [120, 0], sizes = [6, 32], strides = [1, 1]} : vector<162x32xbf16> to vector<6x32xbf16>
    %c1_91 = arith.constant 1 : index
    %c42_92 = arith.constant 42 : index
    %c0_93 = arith.constant 0 : index
    %139 = vector.load %arg19[%c1_91, %c42_92, %c0_93] : memref<3x60x32xbf16, #tpu.memory_space<vmem>>, vector<1x6x32xbf16>
    %140 = vector.shape_cast %139 : vector<1x6x32xbf16> to vector<6x32xbf16>
    %141 = vector.shape_cast %138 : vector<6x32xbf16> to vector<1x6x32xbf16>
    tpu.vector_store %arg19[%c1_91, %c42_92, %c0_93], %141 {strides = array<i32>} : memref<3x60x32xbf16, #tpu.memory_space<vmem>>, vector<1x6x32xbf16>,
    %142 = vector.extract_strided_slice %50 {offsets = [126, 0], sizes = [6, 32], strides = [1, 1]} : vector<162x32xbf16> to vector<6x32xbf16>
    %c2_94 = arith.constant 2 : index
    %c42_95 = arith.constant 42 : index
    %c0_96 = arith.constant 0 : index
    %143 = vector.load %arg19[%c2_94, %c42_95, %c0_96] : memref<3x60x32xbf16, #tpu.memory_space<vmem>>, vector<1x6x32xbf16>
    %144 = vector.shape_cast %143 : vector<1x6x32xbf16> to vector<6x32xbf16>
    %145 = vector.shape_cast %142 : vector<6x32xbf16> to vector<1x6x32xbf16>
    tpu.vector_store %arg19[%c2_94, %c42_95, %c0_96], %145 {strides = array<i32>} : memref<3x60x32xbf16, #tpu.memory_space<vmem>>, vector<1x6x32xbf16>,
    %146 = vector.extract_strided_slice %50 {offsets = [132, 0], sizes = [6, 32], strides = [1, 1]} : vector<162x32xbf16> to vector<6x32xbf16>
    %c0_97 = arith.constant 0 : index
    %c48 = arith.constant 48 : index
    %c0_98 = arith.constant 0 : index
    %147 = vector.load %arg19[%c0_97, %c48, %c0_98] : memref<3x60x32xbf16, #tpu.memory_space<vmem>>, vector<1x6x32xbf16>
    %148 = vector.shape_cast %147 : vector<1x6x32xbf16> to vector<6x32xbf16>
    %149 = vector.shape_cast %146 : vector<6x32xbf16> to vector<1x6x32xbf16>
    tpu.vector_store %arg19[%c0_97, %c48, %c0_98], %149 {strides = array<i32>} : memref<3x60x32xbf16, #tpu.memory_space<vmem>>, vector<1x6x32xbf16>,
    %150 = vector.extract_strided_slice %50 {offsets = [138, 0], sizes = [6, 32], strides = [1, 1]} : vector<162x32xbf16> to vector<6x32xbf16>
    %c1_99 = arith.constant 1 : index
    %c48_100 = arith.constant 48 : index
    %c0_101 = arith.constant 0 : index
    %151 = vector.load %arg19[%c1_99, %c48_100, %c0_101] : memref<3x60x32xbf16, #tpu.memory_space<vmem>>, vector<1x6x32xbf16>
    %152 = vector.shape_cast %151 : vector<1x6x32xbf16> to vector<6x32xbf16>
    %153 = vector.shape_cast %150 : vector<6x32xbf16> to vector<1x6x32xbf16>
    tpu.vector_store %arg19[%c1_99, %c48_100, %c0_101], %153 {strides = array<i32>} : memref<3x60x32xbf16, #tpu.memory_space<vmem>>, vector<1x6x32xbf16>,
    %154 = vector.extract_strided_slice %50 {offsets = [144, 0], sizes = [6, 32], strides = [1, 1]} : vector<162x32xbf16> to vector<6x32xbf16>
    %c2_102 = arith.constant 2 : index
    %c48_103 = arith.constant 48 : index
    %c0_104 = arith.constant 0 : index
    %155 = vector.load %arg19[%c2_102, %c48_103, %c0_104] : memref<3x60x32xbf16, #tpu.memory_space<vmem>>, vector<1x6x32xbf16>
    %156 = vector.shape_cast %155 : vector<1x6x32xbf16> to vector<6x32xbf16>
    %157 = vector.shape_cast %154 : vector<6x32xbf16> to vector<1x6x32xbf16>
    tpu.vector_store %arg19[%c2_102, %c48_103, %c0_104], %157 {strides = array<i32>} : memref<3x60x32xbf16, #tpu.memory_space<vmem>>, vector<1x6x32xbf16>,
    %158 = vector.extract_strided_slice %50 {offsets = [150, 0], sizes = [6, 32], strides = [1, 1]} : vector<162x32xbf16> to vector<6x32xbf16>
    %c0_105 = arith.constant 0 : index
    %c54 = arith.constant 54 : index
    %c0_106 = arith.constant 0 : index
    %159 = vector.load %arg19[%c0_105, %c54, %c0_106] : memref<3x60x32xbf16, #tpu.memory_space<vmem>>, vector<1x6x32xbf16>
    %160 = vector.shape_cast %159 : vector<1x6x32xbf16> to vector<6x32xbf16>
    %161 = vector.shape_cast %158 : vector<6x32xbf16> to vector<1x6x32xbf16>
    tpu.vector_store %arg19[%c0_105, %c54, %c0_106], %161 {strides = array<i32>} : memref<3x60x32xbf16, #tpu.memory_space<vmem>>, vector<1x6x32xbf16>,
    %162 = vector.extract_strided_slice %50 {offsets = [156, 0], sizes = [6, 32], strides = [1, 1]} : vector<162x32xbf16> to vector<6x32xbf16>
    %c1_107 = arith.constant 1 : index
    %c54_108 = arith.constant 54 : index
    %c0_109 = arith.constant 0 : index
    %163 = vector.load %arg19[%c1_107, %c54_108, %c0_109] : memref<3x60x32xbf16, #tpu.memory_space<vmem>>, vector<1x6x32xbf16>
    %164 = vector.shape_cast %163 : vector<1x6x32xbf16> to vector<6x32xbf16>
    %165 = vector.shape_cast %162 : vector<6x32xbf16> to vector<1x6x32xbf16>
    tpu.vector_store %arg19[%c1_107, %c54_108, %c0_109], %165 {strides = array<i32>} : memref<3x60x32xbf16, #tpu.memory_space<vmem>>, vector<1x6x32xbf16>,
    %c0_110 = arith.constant 0 : index
    %c0_111 = arith.constant 0 : index
    %166 = vector.load %arg8[%c0_110, %c0_111] : memref<1x64xf32, #tpu.memory_space<vmem>>, vector<1x64xf32>
    %cst_112 = arith.constant 0.000000e+00 : f32
    %167 = vector.broadcast %cst_112 : f32 to vector<54x64xf32>
    %c0_113 = arith.constant 0 : index
    %c0_114 = arith.constant 0 : index
    %c0_115 = arith.constant 0 : index
    %168 = vector.load %arg19[%c0_113, %c0_114, %c0_115] : memref<3x60x32xbf16, #tpu.memory_space<vmem>>, vector<1x54x32xbf16>
    %169 = vector.shape_cast %168 : vector<1x54x32xbf16> to vector<54x32xbf16>
    %c0_116 = arith.constant 0 : index
    %c0_117 = arith.constant 0 : index
    %c0_118 = arith.constant 0 : index
    %170 = vector.load %arg2[%c0_116, %c0_117, %c0_118] : memref<5x32x64xbf16, #tpu.memory_space<vmem>>, vector<1x32x64xbf16>
    %171 = vector.shape_cast %170 : vector<1x32x64xbf16> to vector<32x64xbf16>
    %cst_119 = arith.constant dense<0.000000e+00> : vector<54x64xf32>
    %172 = tpu.matmul %169, %171, %cst_119 {dimension_numbers = #tpu.dot_dimension_numbers<[1], [0], [0], [1], [0, 0, 1, 1], [], []>} : vector<54x32xbf16>, vector<32x64xbf16>, vector<54x64xf32> -> vector<54x64xf32>
    %173 = arith.addf %167, %172 : vector<54x64xf32>
    %c1_120 = arith.constant 1 : index
    %c0_121 = arith.constant 0 : index
    %c0_122 = arith.constant 0 : index
    %174 = vector.load %arg19[%c1_120, %c0_121, %c0_122] : memref<3x60x32xbf16, #tpu.memory_space<vmem>>, vector<1x54x32xbf16>
    %175 = vector.shape_cast %174 : vector<1x54x32xbf16> to vector<54x32xbf16>
    %c1_123 = arith.constant 1 : index
    %c0_124 = arith.constant 0 : index
    %c0_125 = arith.constant 0 : index
    %176 = vector.load %arg2[%c1_123, %c0_124, %c0_125] : memref<5x32x64xbf16, #tpu.memory_space<vmem>>, vector<1x32x64xbf16>
    %177 = vector.shape_cast %176 : vector<1x32x64xbf16> to vector<32x64xbf16>
    %cst_126 = arith.constant dense<0.000000e+00> : vector<54x64xf32>
    %178 = tpu.matmul %175, %177, %cst_126 {dimension_numbers = #tpu.dot_dimension_numbers<[1], [0], [0], [1], [0, 0, 1, 1], [], []>} : vector<54x32xbf16>, vector<32x64xbf16>, vector<54x64xf32> -> vector<54x64xf32>
    %179 = arith.addf %173, %178 : vector<54x64xf32>
    %c2_127 = arith.constant 2 : index
    %c0_128 = arith.constant 0 : index
    %c0_129 = arith.constant 0 : index
    %180 = vector.load %arg19[%c2_127, %c0_128, %c0_129] : memref<3x60x32xbf16, #tpu.memory_space<vmem>>, vector<1x54x32xbf16>
    %181 = vector.shape_cast %180 : vector<1x54x32xbf16> to vector<54x32xbf16>
    %c2_130 = arith.constant 2 : index
    %c0_131 = arith.constant 0 : index
    %c0_132 = arith.constant 0 : index
    %182 = vector.load %arg2[%c2_130, %c0_131, %c0_132] : memref<5x32x64xbf16, #tpu.memory_space<vmem>>, vector<1x32x64xbf16>
    %183 = vector.shape_cast %182 : vector<1x32x64xbf16> to vector<32x64xbf16>
    %cst_133 = arith.constant dense<0.000000e+00> : vector<54x64xf32>
    %184 = tpu.matmul %181, %183, %cst_133 {dimension_numbers = #tpu.dot_dimension_numbers<[1], [0], [0], [1], [0, 0, 1, 1], [], []>} : vector<54x32xbf16>, vector<32x64xbf16>, vector<54x64xf32> -> vector<54x64xf32>
    %185 = arith.addf %179, %184 : vector<54x64xf32>
    %c0_134 = arith.constant 0 : index
    %c6_135 = arith.constant 6 : index
    %c0_136 = arith.constant 0 : index
    %186 = vector.load %arg19[%c0_134, %c6_135, %c0_136] : memref<3x60x32xbf16, #tpu.memory_space<vmem>>, vector<1x54x32xbf16>
    %187 = vector.shape_cast %186 : vector<1x54x32xbf16> to vector<54x32xbf16>
    %c3_137 = arith.constant 3 : index
    %c0_138 = arith.constant 0 : index
    %c0_139 = arith.constant 0 : index
    %188 = vector.load %arg2[%c3_137, %c0_138, %c0_139] : memref<5x32x64xbf16, #tpu.memory_space<vmem>>, vector<1x32x64xbf16>
    %189 = vector.shape_cast %188 : vector<1x32x64xbf16> to vector<32x64xbf16>
    %cst_140 = arith.constant dense<0.000000e+00> : vector<54x64xf32>
    %190 = tpu.matmul %187, %189, %cst_140 {dimension_numbers = #tpu.dot_dimension_numbers<[1], [0], [0], [1], [0, 0, 1, 1], [], []>} : vector<54x32xbf16>, vector<32x64xbf16>, vector<54x64xf32> -> vector<54x64xf32>
    %191 = arith.addf %185, %190 : vector<54x64xf32>
    %c1_141 = arith.constant 1 : index
    %c6_142 = arith.constant 6 : index
    %c0_143 = arith.constant 0 : index
    %192 = vector.load %arg19[%c1_141, %c6_142, %c0_143] : memref<3x60x32xbf16, #tpu.memory_space<vmem>>, vector<1x54x32xbf16>
    %193 = vector.shape_cast %192 : vector<1x54x32xbf16> to vector<54x32xbf16>
    %c4_144 = arith.constant 4 : index
    %c0_145 = arith.constant 0 : index
    %c0_146 = arith.constant 0 : index
    %194 = vector.load %arg2[%c4_144, %c0_145, %c0_146] : memref<5x32x64xbf16, #tpu.memory_space<vmem>>, vector<1x32x64xbf16>
    %195 = vector.shape_cast %194 : vector<1x32x64xbf16> to vector<32x64xbf16>
    %cst_147 = arith.constant dense<0.000000e+00> : vector<54x64xf32>
    %196 = tpu.matmul %193, %195, %cst_147 {dimension_numbers = #tpu.dot_dimension_numbers<[1], [0], [0], [1], [0, 0, 1, 1], [], []>} : vector<54x32xbf16>, vector<32x64xbf16>, vector<54x64xf32> -> vector<54x64xf32>
    %197 = arith.addf %191, %196 : vector<54x64xf32>
    %198 = vector.broadcast %166 : vector<1x64xf32> to vector<54x64xf32>
    %199 = arith.addf %197, %198 : vector<54x64xf32>
    %c0_148 = arith.constant 0 : index
    %c0_149 = arith.constant 0 : index
    %200 = vector.load %arg14[%c0_148, %c0_149] : memref<54x64xf32, #tpu.memory_space<vmem>>, vector<54x64xf32>
    tpu.vector_store %arg14[%c0_148, %c0_149], %199 {strides = array<i32>} : memref<54x64xf32, #tpu.memory_space<vmem>>, vector<54x64xf32>,
    %cst_150 = arith.constant 0.000000e+00 : f32
    %201 = vector.broadcast %cst_150 : f32 to vector<54x64xf32>
    %202 = arith.cmpf oge, %199, %201 : vector<54x64xf32>
    %cst_151 = arith.constant 0.00999999977 : f32
    %203 = vector.broadcast %cst_151 : f32 to vector<54x64xf32>
    %204 = arith.mulf %203, %199 : vector<54x64xf32>
    %205 = arith.select %202, %199, %204 : vector<54x64xi1>, vector<54x64xf32>
    %206 = arith.truncf %205 : vector<54x64xf32> to vector<54x64xbf16>
    %cst_152 = arith.constant 0.000000e+00 : bf16
    %207 = vector.broadcast %cst_152 : bf16 to vector<6x64xbf16>
    %c0_153 = arith.constant 0 : index
    %c0_154 = arith.constant 0 : index
    %c0_155 = arith.constant 0 : index
    %208 = vector.load %arg20[%c0_153, %c0_154, %c0_155] : memref<3x24x64xbf16, #tpu.memory_space<vmem>>, vector<1x6x64xbf16>
    %209 = vector.shape_cast %208 : vector<1x6x64xbf16> to vector<6x64xbf16>
    %210 = vector.shape_cast %207 : vector<6x64xbf16> to vector<1x6x64xbf16>
    tpu.vector_store %arg20[%c0_153, %c0_154, %c0_155], %210 {strides = array<i32>} : memref<3x24x64xbf16, #tpu.memory_space<vmem>>, vector<1x6x64xbf16>,
    %c1_156 = arith.constant 1 : index
    %c0_157 = arith.constant 0 : index
    %c0_158 = arith.constant 0 : index
    %211 = vector.load %arg20[%c1_156, %c0_157, %c0_158] : memref<3x24x64xbf16, #tpu.memory_space<vmem>>, vector<1x6x64xbf16>
    %212 = vector.shape_cast %211 : vector<1x6x64xbf16> to vector<6x64xbf16>
    %213 = vector.shape_cast %207 : vector<6x64xbf16> to vector<1x6x64xbf16>
    tpu.vector_store %arg20[%c1_156, %c0_157, %c0_158], %213 {strides = array<i32>} : memref<3x24x64xbf16, #tpu.memory_space<vmem>>, vector<1x6x64xbf16>,
    %214 = vector.extract_strided_slice %206 {offsets = [0, 0], sizes = [6, 64], strides = [1, 1]} : vector<54x64xbf16> to vector<6x64xbf16>
    %c2_159 = arith.constant 2 : index
    %c0_160 = arith.constant 0 : index
    %c0_161 = arith.constant 0 : index
    %215 = vector.load %arg20[%c2_159, %c0_160, %c0_161] : memref<3x24x64xbf16, #tpu.memory_space<vmem>>, vector<1x6x64xbf16>
    %216 = vector.shape_cast %215 : vector<1x6x64xbf16> to vector<6x64xbf16>
    %217 = vector.shape_cast %214 : vector<6x64xbf16> to vector<1x6x64xbf16>
    tpu.vector_store %arg20[%c2_159, %c0_160, %c0_161], %217 {strides = array<i32>} : memref<3x24x64xbf16, #tpu.memory_space<vmem>>, vector<1x6x64xbf16>,
    %218 = vector.extract_strided_slice %206 {offsets = [6, 0], sizes = [6, 64], strides = [1, 1]} : vector<54x64xbf16> to vector<6x64xbf16>
    %c0_162 = arith.constant 0 : index
    %c6_163 = arith.constant 6 : index
    %c0_164 = arith.constant 0 : index
    %219 = vector.load %arg20[%c0_162, %c6_163, %c0_164] : memref<3x24x64xbf16, #tpu.memory_space<vmem>>, vector<1x6x64xbf16>
    %220 = vector.shape_cast %219 : vector<1x6x64xbf16> to vector<6x64xbf16>
    %221 = vector.shape_cast %218 : vector<6x64xbf16> to vector<1x6x64xbf16>
    tpu.vector_store %arg20[%c0_162, %c6_163, %c0_164], %221 {strides = array<i32>} : memref<3x24x64xbf16, #tpu.memory_space<vmem>>, vector<1x6x64xbf16>,
    %222 = vector.extract_strided_slice %206 {offsets = [12, 0], sizes = [6, 64], strides = [1, 1]} : vector<54x64xbf16> to vector<6x64xbf16>
    %c1_165 = arith.constant 1 : index
    %c6_166 = arith.constant 6 : index
    %c0_167 = arith.constant 0 : index
    %223 = vector.load %arg20[%c1_165, %c6_166, %c0_167] : memref<3x24x64xbf16, #tpu.memory_space<vmem>>, vector<1x6x64xbf16>
    %224 = vector.shape_cast %223 : vector<1x6x64xbf16> to vector<6x64xbf16>
    %225 = vector.shape_cast %222 : vector<6x64xbf16> to vector<1x6x64xbf16>
    tpu.vector_store %arg20[%c1_165, %c6_166, %c0_167], %225 {strides = array<i32>} : memref<3x24x64xbf16, #tpu.memory_space<vmem>>, vector<1x6x64xbf16>,
    %226 = vector.extract_strided_slice %206 {offsets = [18, 0], sizes = [6, 64], strides = [1, 1]} : vector<54x64xbf16> to vector<6x64xbf16>
    %c2_168 = arith.constant 2 : index
    %c6_169 = arith.constant 6 : index
    %c0_170 = arith.constant 0 : index
    %227 = vector.load %arg20[%c2_168, %c6_169, %c0_170] : memref<3x24x64xbf16, #tpu.memory_space<vmem>>, vector<1x6x64xbf16>
    %228 = vector.shape_cast %227 : vector<1x6x64xbf16> to vector<6x64xbf16>
    %229 = vector.shape_cast %226 : vector<6x64xbf16> to vector<1x6x64xbf16>
    tpu.vector_store %arg20[%c2_168, %c6_169, %c0_170], %229 {strides = array<i32>} : memref<3x24x64xbf16, #tpu.memory_space<vmem>>, vector<1x6x64xbf16>,
    %230 = vector.extract_strided_slice %206 {offsets = [24, 0], sizes = [6, 64], strides = [1, 1]} : vector<54x64xbf16> to vector<6x64xbf16>
    %c0_171 = arith.constant 0 : index
    %c12_172 = arith.constant 12 : index
    %c0_173 = arith.constant 0 : index
    %231 = vector.load %arg20[%c0_171, %c12_172, %c0_173] : memref<3x24x64xbf16, #tpu.memory_space<vmem>>, vector<1x6x64xbf16>
    %232 = vector.shape_cast %231 : vector<1x6x64xbf16> to vector<6x64xbf16>
    %233 = vector.shape_cast %230 : vector<6x64xbf16> to vector<1x6x64xbf16>
    tpu.vector_store %arg20[%c0_171, %c12_172, %c0_173], %233 {strides = array<i32>} : memref<3x24x64xbf16, #tpu.memory_space<vmem>>, vector<1x6x64xbf16>,
    %234 = vector.extract_strided_slice %206 {offsets = [30, 0], sizes = [6, 64], strides = [1, 1]} : vector<54x64xbf16> to vector<6x64xbf16>
    %c1_174 = arith.constant 1 : index
    %c12_175 = arith.constant 12 : index
    %c0_176 = arith.constant 0 : index
    %235 = vector.load %arg20[%c1_174, %c12_175, %c0_176] : memref<3x24x64xbf16, #tpu.memory_space<vmem>>, vector<1x6x64xbf16>
    %236 = vector.shape_cast %235 : vector<1x6x64xbf16> to vector<6x64xbf16>
    %237 = vector.shape_cast %234 : vector<6x64xbf16> to vector<1x6x64xbf16>
    tpu.vector_store %arg20[%c1_174, %c12_175, %c0_176], %237 {strides = array<i32>} : memref<3x24x64xbf16, #tpu.memory_space<vmem>>, vector<1x6x64xbf16>,
    %238 = vector.extract_strided_slice %206 {offsets = [36, 0], sizes = [6, 64], strides = [1, 1]} : vector<54x64xbf16> to vector<6x64xbf16>
    %c2_177 = arith.constant 2 : index
    %c12_178 = arith.constant 12 : index
    %c0_179 = arith.constant 0 : index
    %239 = vector.load %arg20[%c2_177, %c12_178, %c0_179] : memref<3x24x64xbf16, #tpu.memory_space<vmem>>, vector<1x6x64xbf16>
    %240 = vector.shape_cast %239 : vector<1x6x64xbf16> to vector<6x64xbf16>
    %241 = vector.shape_cast %238 : vector<6x64xbf16> to vector<1x6x64xbf16>
    tpu.vector_store %arg20[%c2_177, %c12_178, %c0_179], %241 {strides = array<i32>} : memref<3x24x64xbf16, #tpu.memory_space<vmem>>, vector<1x6x64xbf16>,
    %242 = vector.extract_strided_slice %206 {offsets = [42, 0], sizes = [6, 64], strides = [1, 1]} : vector<54x64xbf16> to vector<6x64xbf16>
    %c0_180 = arith.constant 0 : index
    %c18_181 = arith.constant 18 : index
    %c0_182 = arith.constant 0 : index
    %243 = vector.load %arg20[%c0_180, %c18_181, %c0_182] : memref<3x24x64xbf16, #tpu.memory_space<vmem>>, vector<1x6x64xbf16>
    %244 = vector.shape_cast %243 : vector<1x6x64xbf16> to vector<6x64xbf16>
    %245 = vector.shape_cast %242 : vector<6x64xbf16> to vector<1x6x64xbf16>
    tpu.vector_store %arg20[%c0_180, %c18_181, %c0_182], %245 {strides = array<i32>} : memref<3x24x64xbf16, #tpu.memory_space<vmem>>, vector<1x6x64xbf16>,
    %246 = vector.extract_strided_slice %206 {offsets = [48, 0], sizes = [6, 64], strides = [1, 1]} : vector<54x64xbf16> to vector<6x64xbf16>
    %c1_183 = arith.constant 1 : index
    %c18_184 = arith.constant 18 : index
    %c0_185 = arith.constant 0 : index
    %247 = vector.load %arg20[%c1_183, %c18_184, %c0_185] : memref<3x24x64xbf16, #tpu.memory_space<vmem>>, vector<1x6x64xbf16>
    %248 = vector.shape_cast %247 : vector<1x6x64xbf16> to vector<6x64xbf16>
    %249 = vector.shape_cast %246 : vector<6x64xbf16> to vector<1x6x64xbf16>
    tpu.vector_store %arg20[%c1_183, %c18_184, %c0_185], %249 {strides = array<i32>} : memref<3x24x64xbf16, #tpu.memory_space<vmem>>, vector<1x6x64xbf16>,
    %c0_186 = arith.constant 0 : index
    %c0_187 = arith.constant 0 : index
    %250 = vector.load %arg9[%c0_186, %c0_187] : memref<1x128xf32, #tpu.memory_space<vmem>>, vector<1x128xf32>
    %cst_188 = arith.constant 0.000000e+00 : f32
    %251 = vector.broadcast %cst_188 : f32 to vector<18x128xf32>
    %c0_189 = arith.constant 0 : index
    %c0_190 = arith.constant 0 : index
    %c0_191 = arith.constant 0 : index
    %252 = vector.load %arg20[%c0_189, %c0_190, %c0_191] : memref<3x24x64xbf16, #tpu.memory_space<vmem>>, vector<1x18x64xbf16>
    %253 = vector.shape_cast %252 : vector<1x18x64xbf16> to vector<18x64xbf16>
    %c0_192 = arith.constant 0 : index
    %c0_193 = arith.constant 0 : index
    %c0_194 = arith.constant 0 : index
    %254 = vector.load %arg3[%c0_192, %c0_193, %c0_194] : memref<5x64x128xbf16, #tpu.memory_space<vmem>>, vector<1x64x128xbf16>
    %255 = vector.shape_cast %254 : vector<1x64x128xbf16> to vector<64x128xbf16>
    %cst_195 = arith.constant dense<0.000000e+00> : vector<18x128xf32>
    %256 = tpu.matmul %253, %255, %cst_195 {dimension_numbers = #tpu.dot_dimension_numbers<[1], [0], [0], [1], [0, 0, 1, 1], [], []>} : vector<18x64xbf16>, vector<64x128xbf16>, vector<18x128xf32> -> vector<18x128xf32>
    %257 = arith.addf %251, %256 : vector<18x128xf32>
    %c1_196 = arith.constant 1 : index
    %c0_197 = arith.constant 0 : index
    %c0_198 = arith.constant 0 : index
    %258 = vector.load %arg20[%c1_196, %c0_197, %c0_198] : memref<3x24x64xbf16, #tpu.memory_space<vmem>>, vector<1x18x64xbf16>
    %259 = vector.shape_cast %258 : vector<1x18x64xbf16> to vector<18x64xbf16>
    %c1_199 = arith.constant 1 : index
    %c0_200 = arith.constant 0 : index
    %c0_201 = arith.constant 0 : index
    %260 = vector.load %arg3[%c1_199, %c0_200, %c0_201] : memref<5x64x128xbf16, #tpu.memory_space<vmem>>, vector<1x64x128xbf16>
    %261 = vector.shape_cast %260 : vector<1x64x128xbf16> to vector<64x128xbf16>
    %cst_202 = arith.constant dense<0.000000e+00> : vector<18x128xf32>
    %262 = tpu.matmul %259, %261, %cst_202 {dimension_numbers = #tpu.dot_dimension_numbers<[1], [0], [0], [1], [0, 0, 1, 1], [], []>} : vector<18x64xbf16>, vector<64x128xbf16>, vector<18x128xf32> -> vector<18x128xf32>
    %263 = arith.addf %257, %262 : vector<18x128xf32>
    %c2_203 = arith.constant 2 : index
    %c0_204 = arith.constant 0 : index
    %c0_205 = arith.constant 0 : index
    %264 = vector.load %arg20[%c2_203, %c0_204, %c0_205] : memref<3x24x64xbf16, #tpu.memory_space<vmem>>, vector<1x18x64xbf16>
    %265 = vector.shape_cast %264 : vector<1x18x64xbf16> to vector<18x64xbf16>
    %c2_206 = arith.constant 2 : index
    %c0_207 = arith.constant 0 : index
    %c0_208 = arith.constant 0 : index
    %266 = vector.load %arg3[%c2_206, %c0_207, %c0_208] : memref<5x64x128xbf16, #tpu.memory_space<vmem>>, vector<1x64x128xbf16>
    %267 = vector.shape_cast %266 : vector<1x64x128xbf16> to vector<64x128xbf16>
    %cst_209 = arith.constant dense<0.000000e+00> : vector<18x128xf32>
    %268 = tpu.matmul %265, %267, %cst_209 {dimension_numbers = #tpu.dot_dimension_numbers<[1], [0], [0], [1], [0, 0, 1, 1], [], []>} : vector<18x64xbf16>, vector<64x128xbf16>, vector<18x128xf32> -> vector<18x128xf32>
    %269 = arith.addf %263, %268 : vector<18x128xf32>
    %c0_210 = arith.constant 0 : index
    %c6_211 = arith.constant 6 : index
    %c0_212 = arith.constant 0 : index
    %270 = vector.load %arg20[%c0_210, %c6_211, %c0_212] : memref<3x24x64xbf16, #tpu.memory_space<vmem>>, vector<1x18x64xbf16>
    %271 = vector.shape_cast %270 : vector<1x18x64xbf16> to vector<18x64xbf16>
    %c3_213 = arith.constant 3 : index
    %c0_214 = arith.constant 0 : index
    %c0_215 = arith.constant 0 : index
    %272 = vector.load %arg3[%c3_213, %c0_214, %c0_215] : memref<5x64x128xbf16, #tpu.memory_space<vmem>>, vector<1x64x128xbf16>
    %273 = vector.shape_cast %272 : vector<1x64x128xbf16> to vector<64x128xbf16>
    %cst_216 = arith.constant dense<0.000000e+00> : vector<18x128xf32>
    %274 = tpu.matmul %271, %273, %cst_216 {dimension_numbers = #tpu.dot_dimension_numbers<[1], [0], [0], [1], [0, 0, 1, 1], [], []>} : vector<18x64xbf16>, vector<64x128xbf16>, vector<18x128xf32> -> vector<18x128xf32>
    %275 = arith.addf %269, %274 : vector<18x128xf32>
    %c1_217 = arith.constant 1 : index
    %c6_218 = arith.constant 6 : index
    %c0_219 = arith.constant 0 : index
    %276 = vector.load %arg20[%c1_217, %c6_218, %c0_219] : memref<3x24x64xbf16, #tpu.memory_space<vmem>>, vector<1x18x64xbf16>
    %277 = vector.shape_cast %276 : vector<1x18x64xbf16> to vector<18x64xbf16>
    %c4_220 = arith.constant 4 : index
    %c0_221 = arith.constant 0 : index
    %c0_222 = arith.constant 0 : index
    %278 = vector.load %arg3[%c4_220, %c0_221, %c0_222] : memref<5x64x128xbf16, #tpu.memory_space<vmem>>, vector<1x64x128xbf16>
    %279 = vector.shape_cast %278 : vector<1x64x128xbf16> to vector<64x128xbf16>
    %cst_223 = arith.constant dense<0.000000e+00> : vector<18x128xf32>
    %280 = tpu.matmul %277, %279, %cst_223 {dimension_numbers = #tpu.dot_dimension_numbers<[1], [0], [0], [1], [0, 0, 1, 1], [], []>} : vector<18x64xbf16>, vector<64x128xbf16>, vector<18x128xf32> -> vector<18x128xf32>
    %281 = arith.addf %275, %280 : vector<18x128xf32>
    %282 = vector.broadcast %250 : vector<1x128xf32> to vector<18x128xf32>
    %283 = arith.addf %281, %282 : vector<18x128xf32>
    %c0_224 = arith.constant 0 : index
    %c0_225 = arith.constant 0 : index
    %284 = vector.load %arg15[%c0_224, %c0_225] : memref<18x128xf32, #tpu.memory_space<vmem>>, vector<18x128xf32>
    tpu.vector_store %arg15[%c0_224, %c0_225], %283 {strides = array<i32>} : memref<18x128xf32, #tpu.memory_space<vmem>>, vector<18x128xf32>,
    %cst_226 = arith.constant 0.000000e+00 : f32
    %285 = vector.broadcast %cst_226 : f32 to vector<18x128xf32>
    %286 = arith.cmpf oge, %283, %285 : vector<18x128xf32>
    %cst_227 = arith.constant 0.00999999977 : f32
    %287 = vector.broadcast %cst_227 : f32 to vector<18x128xf32>
    %288 = arith.mulf %287, %283 : vector<18x128xf32>
    %289 = arith.select %286, %283, %288 : vector<18x128xi1>, vector<18x128xf32>
    %290 = arith.truncf %289 : vector<18x128xf32> to vector<18x128xbf16>
    %c0_228 = arith.constant 0 : index
    %c0_229 = arith.constant 0 : index
    %291 = vector.load %arg10[%c0_228, %c0_229] : memref<1x512xf32, #tpu.memory_space<vmem>>, vector<1x512xf32>
    %cst_230 = arith.constant 0.000000e+00 : f32
    %292 = vector.broadcast %cst_230 : f32 to vector<6x512xf32>
    %293 = vector.extract_strided_slice %290 {offsets = [0, 0], sizes = [6, 128], strides = [1, 1]} : vector<18x128xbf16> to vector<6x128xbf16>
    %c0_231 = arith.constant 0 : index
    %c0_232 = arith.constant 0 : index
    %c0_233 = arith.constant 0 : index
    %294 = vector.load %arg4[%c0_231, %c0_232, %c0_233] : memref<3x128x512xbf16, #tpu.memory_space<vmem>>, vector<1x128x512xbf16>
    %295 = vector.shape_cast %294 : vector<1x128x512xbf16> to vector<128x512xbf16>
    %cst_234 = arith.constant dense<0.000000e+00> : vector<6x512xf32>
    %296 = tpu.matmul %293, %295, %cst_234 {dimension_numbers = #tpu.dot_dimension_numbers<[1], [0], [0], [1], [0, 0, 1, 1], [], []>} : vector<6x128xbf16>, vector<128x512xbf16>, vector<6x512xf32> -> vector<6x512xf32>
    %297 = arith.addf %292, %296 : vector<6x512xf32>
    %298 = vector.extract_strided_slice %290 {offsets = [6, 0], sizes = [6, 128], strides = [1, 1]} : vector<18x128xbf16> to vector<6x128xbf16>
    %c1_235 = arith.constant 1 : index
    %c0_236 = arith.constant 0 : index
    %c0_237 = arith.constant 0 : index
    %299 = vector.load %arg4[%c1_235, %c0_236, %c0_237] : memref<3x128x512xbf16, #tpu.memory_space<vmem>>, vector<1x128x512xbf16>
    %300 = vector.shape_cast %299 : vector<1x128x512xbf16> to vector<128x512xbf16>
    %cst_238 = arith.constant dense<0.000000e+00> : vector<6x512xf32>
    %301 = tpu.matmul %298, %300, %cst_238 {dimension_numbers = #tpu.dot_dimension_numbers<[1], [0], [0], [1], [0, 0, 1, 1], [], []>} : vector<6x128xbf16>, vector<128x512xbf16>, vector<6x512xf32> -> vector<6x512xf32>
    %302 = arith.addf %297, %301 : vector<6x512xf32>
    %303 = vector.extract_strided_slice %290 {offsets = [12, 0], sizes = [6, 128], strides = [1, 1]} : vector<18x128xbf16> to vector<6x128xbf16>
    %c2_239 = arith.constant 2 : index
    %c0_240 = arith.constant 0 : index
    %c0_241 = arith.constant 0 : index
    %304 = vector.load %arg4[%c2_239, %c0_240, %c0_241] : memref<3x128x512xbf16, #tpu.memory_space<vmem>>, vector<1x128x512xbf16>
    %305 = vector.shape_cast %304 : vector<1x128x512xbf16> to vector<128x512xbf16>
    %cst_242 = arith.constant dense<0.000000e+00> : vector<6x512xf32>
    %306 = tpu.matmul %303, %305, %cst_242 {dimension_numbers = #tpu.dot_dimension_numbers<[1], [0], [0], [1], [0, 0, 1, 1], [], []>} : vector<6x128xbf16>, vector<128x512xbf16>, vector<6x512xf32> -> vector<6x512xf32>
    %307 = arith.addf %302, %306 : vector<6x512xf32>
    %308 = vector.broadcast %291 : vector<1x512xf32> to vector<6x512xf32>
    %309 = arith.addf %307, %308 : vector<6x512xf32>
    %c0_243 = arith.constant 0 : index
    %c0_244 = arith.constant 0 : index
    %310 = vector.load %arg16[%c0_243, %c0_244] : memref<6x512xf32, #tpu.memory_space<vmem>>, vector<6x512xf32>
    tpu.vector_store %arg16[%c0_243, %c0_244], %309 {strides = array<i32>} : memref<6x512xf32, #tpu.memory_space<vmem>>, vector<6x512xf32>,
    %cst_245 = arith.constant 0.000000e+00 : f32
    %311 = vector.broadcast %cst_245 : f32 to vector<6x512xf32>
    %312 = arith.cmpf oge, %309, %311 : vector<6x512xf32>
    %cst_246 = arith.constant 0.00999999977 : f32
    %313 = vector.broadcast %cst_246 : f32 to vector<6x512xf32>
    %314 = arith.mulf %313, %309 : vector<6x512xf32>
    %315 = arith.select %312, %309, %314 : vector<6x512xi1>, vector<6x512xf32>
    %316 = arith.truncf %315 : vector<6x512xf32> to vector<6x512xbf16>
    %c0_247 = arith.constant 0 : index
    %c0_248 = arith.constant 0 : index
    %317 = vector.load %arg11[%c0_247, %c0_248] : memref<1x1024xf32, #tpu.memory_space<vmem>>, vector<1x1024xf32>
    %cst_249 = arith.constant 0.000000e+00 : f32
    %318 = vector.broadcast %cst_249 : f32 to vector<6x1024xf32>
    %c0_250 = arith.constant 0 : index
    %c0_251 = arith.constant 0 : index
    %c0_252 = arith.constant 0 : index
    %319 = vector.load %arg5[%c0_250, %c0_251, %c0_252] : memref<1x512x1024xbf16, #tpu.memory_space<vmem>>, vector<1x512x1024xbf16>
    %320 = vector.shape_cast %319 : vector<1x512x1024xbf16> to vector<512x1024xbf16>
    %cst_253 = arith.constant dense<0.000000e+00> : vector<6x1024xf32>
    %321 = tpu.matmul %316, %320, %cst_253 {dimension_numbers = #tpu.dot_dimension_numbers<[1], [0], [0], [1], [0, 0, 1, 1], [], []>} : vector<6x512xbf16>, vector<512x1024xbf16>, vector<6x1024xf32> -> vector<6x1024xf32>
    %322 = arith.addf %318, %321 : vector<6x1024xf32>
    %323 = vector.broadcast %317 : vector<1x1024xf32> to vector<6x1024xf32>
    %324 = arith.addf %322, %323 : vector<6x1024xf32>
    %c0_254 = arith.constant 0 : index
    %c0_255 = arith.constant 0 : index
    %325 = vector.load %arg17[%c0_254, %c0_255] : memref<6x1024xf32, #tpu.memory_space<vmem>>, vector<6x1024xf32>
    tpu.vector_store %arg17[%c0_254, %c0_255], %324 {strides = array<i32>} : memref<6x1024xf32, #tpu.memory_space<vmem>>, vector<6x1024xf32>,
    %cst_256 = arith.constant 0.000000e+00 : f32
    %326 = vector.broadcast %cst_256 : f32 to vector<6x1024xf32>
    %327 = arith.cmpf oge, %324, %326 : vector<6x1024xf32>
    %cst_257 = arith.constant 0.00999999977 : f32
    %328 = vector.broadcast %cst_257 : f32 to vector<6x1024xf32>
    %329 = arith.mulf %328, %324 : vector<6x1024xf32>
    %330 = arith.select %327, %324, %329 : vector<6x1024xi1>, vector<6x1024xf32>
    %331 = arith.truncf %330 : vector<6x1024xf32> to vector<6x1024xbf16>
    %c0_258 = arith.constant 0 : index
    %c0_259 = arith.constant 0 : index
    %332 = vector.load %arg12[%c0_258, %c0_259] : memref<1x1xf32, #tpu.memory_space<vmem>>, vector<1x1xf32>
    %cst_260 = arith.constant 0.000000e+00 : f32
    %333 = vector.broadcast %cst_260 : f32 to vector<6x1xf32>
    %c0_261 = arith.constant 0 : index
    %c0_262 = arith.constant 0 : index
    %c0_263 = arith.constant 0 : index
    %334 = vector.load %arg6[%c0_261, %c0_262, %c0_263] : memref<1x1024x1xbf16, #tpu.memory_space<vmem>>, vector<1x1024x1xbf16>
    %335 = vector.shape_cast %334 : vector<1x1024x1xbf16> to vector<1024x1xbf16>
    %cst_264 = arith.constant dense<0.000000e+00> : vector<6x1xf32>
    %336 = tpu.matmul %331, %335, %cst_264 {dimension_numbers = #tpu.dot_dimension_numbers<[1], [0], [0], [1], [0, 0, 1, 1], [], []>} : vector<6x1024xbf16>, vector<1024x1xbf16>, vector<6x1xf32> -> vector<6x1xf32>
    %337 = arith.addf %333, %336 : vector<6x1xf32>
    %338 = vector.broadcast %332 : vector<1x1xf32> to vector<6x1xf32>
    %339 = arith.addf %337, %338 : vector<6x1xf32>
    %c0_265 = arith.constant 0 : index
    %c0_266 = arith.constant 0 : index
    %340 = vector.load %arg18[%c0_265, %c0_266] : memref<6x1xf32, #tpu.memory_space<vmem>>, vector<6x1xf32>
    tpu.vector_store %arg18[%c0_265, %c0_266], %339 {strides = array<i32>} : memref<6x1xf32, #tpu.memory_space<vmem>>, vector<6x1xf32>,
    return
  }
}

</mosaic_0001>

<bundles_post_ra>
// kernel: tpu_custom_call.1
= control target key start
LH: loop header
LB: loop body
LE: loop exit
PB: predicated region body
PF: predicated region fallthrough
CT: control target
= control target key end

     0   :  { %s9244_s0 = inlined_call_operand.vmem [shape: f32[3,168,1], index: 0, kind: input, shape index: {}]   ;;  %s9245_s1 = inlined_call_operand.vmem [shape: f32[5,1,32], index: 1, kind: input, shape index: {}]   ;;  %s9246_s2 = inlined_call_operand.vmem [shape: bf16[5,32,64], index: 2, kind: input, shape index: {}]   ;;  %s9247_s3 = inlined_call_operand.vmem [shape: bf16[5,64,128], index: 3, kind: input, shape index: {}]   ;;  %s9248_s4 = inlined_call_operand.vmem [shape: bf16[3,128,512], index: 4, kind: input, shape index: {}]   ;;  %s9249_s5 = inlined_call_operand.hbm [shape: bf16[1,512,1024], index: 5, kind: input, shape index: {}]   ;;  %s9250_s6 = inlined_call_operand.vmem [shape: bf16[1,1024,1], index: 6, kind: input, shape index: {}]   ;;  %s9251_s7 = inlined_call_operand.vmem [shape: f32[1,32], index: 7, kind: input, shape index: {}]   ;;  %s9252_s8 = inlined_call_operand.vmem [shape: f32[1,64], index: 8, kind: input, shape index: {}]   ;;  %s9253_s9 = inlined_call_operand.vmem [shape: f32[1,128], index: 9, kind: input, shape index: {}]   ;;  %s9254_s10 = inlined_call_operand.vmem [shape: f32[1,512], index: 10, kind: input, shape index: {}]   ;;  %s9255_s11 = inlined_call_operand.vmem [shape: f32[1,1024], index: 11, kind: input, shape index: {}]   ;;  %s9256_s12 = inlined_call_operand.<no memory space> [shape: f32[1,1], index: 12, kind: input, shape index: {}]   ;;  %s9257_s13 = inlined_call_operand.vmem [shape: f32[162,32], index: 13, kind: output, shape index: {0}]   ;;  %s9258_s14 = inlined_call_operand.hbm [shape: f32[54,64], index: 14, kind: output, shape index: {1}]   ;;  %s9259_s15 = inlined_call_operand.hbm [shape: f32[18,128], index: 15, kind: output, shape index: {2}]   ;;  %s9260_s16 = inlined_call_operand.hbm [shape: f32[6,512], index: 16, kind: output, shape index: {3}]   ;;  %s9261_s17 = inlined_call_operand.hbm [shape: f32[6,1024], index: 17, kind: output, shape index: {4}]   ;;  %s9262_s18 = inlined_call_operand.vmem [shape: f32[6,1], index: 18, kind: output, shape index: {5}]  }
   0x1   :  { %9266 = sst [smem:[#allocation18_spill]] %s9244_s0  ;;  %v24_v0 = vstv %s9256_s12 }
   0x2   :  { %9267 = sst [smem:[#allocation19_spill]] %s9245_s1  ;;  %25 = vst [vmem:[#allocation4] sm:$0x1] %v24_v0 }
   0x3   :  { %9268 = sst [smem:[#allocation20_spill]] %s9246_s2 }
   0x4   :  { %26 = vsyncpa [#allocation6], 0 }
   0x5   :  { %27 = vsyncpa [#allocation7], 0 }
   0x6   :  { %28 = vsyncpa [#allocation10], 0 }
   0x7   :  { %29 = vsyncpa [#allocation13], 0  ;;  %s7541_s29 = smov [#allocation5]  }
   0x8   :  { %s45_s30 = sshll.u32 %s7541_s29, 4  ;;  %s46_s30 = int_to_ptr.vmem [resolvable:$true] %s45_s30 }
   0x9   :  { %s7441_s0 = scalar_lea.vmem %s46_s30, 32768  ;;  %p7446_p1 = scmp.lt.s32.totalorder %s46_s30, %s46_s30 }
   0xa   :  { %p7442_p0 = scmp.ne.s32.totalorder %s46_s30, %s7441_s0  ;;  %p7447_p2 = scmp.lt.s32.totalorder %s7441_s0, %s7441_s0 }
   0xc   :  { %p7448_p3 = por %p7447_p2, %p7446_p1 }
   0xe   :  { %p7449_p4 = pnand %p7448_p3, %p7442_p0 }
  0x10   :  { %7452 = shalt.err (!%p7449_p4)
}
  0x11   :  { %s7542_s19 = smov 512   ;;  %s7543_s1 = smov 32  }
  0x12   :  { %51 = dma.hbm_to_vmem [thread:$0]  %s9249_s5, 32768, %s46_s30, [#allocation6], %s7542_s19, %s7542_s19, %s7543_s1  }
  0x13   :  { %7533 = dma.done.wait [#allocation6], 32768  }
  0x14   :  { %7534 = vsyncadd [#allocation6], 4294934528  ;;  %v7544_v1 = vmov 0   ;;  %s9269_s2 = sld [smem:[#allocation18_spill]]  ;;  %vm1076_vm0 = vcmask 256000   ;;  %vm979_vm1 = vcmask 261120  }
  0x15   :  { %7158 = vset.pattern.permute.xlu1 %v7544_v1  ;;  %7157 = vset.pattern.permute.xlu0 %v7544_v1  ;;  %1077 = vst.msk [vmem:[#allocation2] sm:$0x7] %vm1076_vm0, %v7544_v1  ;;  %1079 = vst.msk [vmem:[#allocation2 + $0x20] sm:$0x7] %vm1076_vm0, %v7544_v1  ;;  %s9270_s23 = sld [smem:[#allocation20_spill]]  ;;  %vm1000_vm3 = vcmask 254976  }
  0x16   :  { %s9271_s21 = sld [smem:[#allocation19_spill]]  ;;  %vm1089_vm4 = vcmask 257027   ;;  %vm1095_vm6 = vcmask 1040384   ;;  %vm1096_vm7 = vcmask 1044484   ;;  %vm1118_vm8 = vcmask 257026  }
  0x17   :  { %vm1125_vm9 = vcmask 1042432   ;;  %vm8093_vm10 = vmor %vm1095_vm6, %vm1096_vm7  ;;  %vm1126_vm13 = vcmask 1046532   ;;  %vm1120_vm15 = vcmask 253952   ;;  %vm1143_vm6 = vcmask 257025  }
  0x18   :  { %vm8130_vm14 = vmor %vm1125_vm9, %vm1126_vm13 }
  0x1a   :  { %v73_v2 = vld [vmem:[%s9269_s2 + $0x10] sm:$0xff]  ;;  %v72_v3 = vld [vmem:[%s9269_s2 + $0x8] sm:$0xff]  ;;  %v74_v4 = vld [vmem:[%s9269_s2 + $0x18] sm:$0xff] }
  0x1b   :  { %105 = vperm.xlu1 %7158, %v73_v2   ;;  %100 = vperm.xlu0 %7157, %v72_v3   ;;  %v6124_v5 = vld [vmem:[%s9269_s2 + $0xb0] sm:$0xff]  ;;  %v6125_v6 = vld [vmem:[%s9269_s2 + $0xb8] sm:$0xff]  ;;  %v75_v7 = vld [vmem:[%s9269_s2 + $0x20] sm:$0xff] }
  0x1c   :  { %v6127_v8 = vld [vmem:[%s9269_s2 + $0xc8] sm:$0xff]  ;;  %v6126_v9 = vld [vmem:[%s9269_s2 + $0xc0] sm:$0xff]  ;;  %v77_v10 = vld [vmem:[%s9269_s2 + $0x30] sm:$0xff] }
  0x1d   :  { %v6147_v11 = vld [vmem:[%s9269_s2 + $0x158] sm:$0xff]  ;;  %v81_v12 = vld [vmem:[%s9269_s2 + $0x50] sm:$0xff]  ;;  %v79_v13 = vld [vmem:[%s9269_s2 + $0x40] sm:$0xff] }
  0x1e   :  { %v6131_v14 = vld [vmem:[%s9269_s2 + $0xe8] sm:$0xff]  ;;  %v6129_v15 = vld [vmem:[%s9269_s2 + $0xd8] sm:$0xff]  ;;  %v6148_v16 = vld [vmem:[%s9269_s2 + $0x160] sm:$0xff] }
  0x1f   :  { %110 = vperm.xlu1 %7158, %v74_v4   ;;  %277 = vperm.xlu0 %7157, %v6124_v5   ;;  %v6133_v17 = vld [vmem:[%s9269_s2 + $0xf8] sm:$0xff]  ;;  %v6150_v18 = vld [vmem:[%s9269_s2 + $0x170] sm:$0xff]  ;;  %v6149_v19 = vld [vmem:[%s9269_s2 + $0x168] sm:$0xff] }
  0x20   :  { %v6152_v20 = vld [vmem:[%s9269_s2 + $0x180] sm:$0xff]  ;;  %v601_v21 = vld [vmem:[%s9269_s2 + $0xe] sm:$0xff]  ;;  %v602_v25 = vld [vmem:[%s9269_s2 + $0x16] sm:$0xff] }
  0x21   :  { %v6156_v22 = vld [vmem:[%s9269_s2 + $0x1a0] sm:$0xff]  ;;  %v6154_v23 = vld [vmem:[%s9269_s2 + $0x190] sm:$0xff]  ;;  %v84_v35 = vld [vmem:[%s9269_s2 + $0x68] sm:$0xff] }
  0x22   :  { %v603_v24 = vld [vmem:[%s9269_s2 + $0x1e] sm:$0xff]  ;;  %v6172_v26 = vld [vmem:[%s9269_s2 + $0xb6] sm:$0xff]  ;;  %v604_v27 = vld [vmem:[%s9269_s2 + $0x26] sm:$0xff] }
  0x23   :  { %282 = vperm.xlu1 %7158, %v6125_v6   ;;  %115 = vperm.xlu0 %7157, %v75_v7   ;;  %v608_v28 = vld [vmem:[%s9269_s2 + $0x46] sm:$0xff]  ;;  %v606_v29 = vld [vmem:[%s9269_s2 + $0x36] sm:$0xff]  ;;  %v6173_v30 = vld [vmem:[%s9269_s2 + $0xbe] sm:$0xff] }
  0x24   :  { %v610_v31 = vld [vmem:[%s9269_s2 + $0x56] sm:$0xff]  ;;  %v6175_v32 = vld [vmem:[%s9269_s2 + $0xce] sm:$0xff]  ;;  %v6174_v33 = vld [vmem:[%s9269_s2 + $0xc6] sm:$0xff] }
  0x25   :  { %v6136_v34 = vld [vmem:[%s9269_s2 + $0x110] sm:$0xff]  ;;  %v83_v36 = vld [vmem:[%s9269_s2 + $0x60] sm:$0xff]  ;;  %v82_v37 = vld [vmem:[%s9269_s2 + $0x58] sm:$0xff] }
  0x26   :  { %v6135_v38 = vld [vmem:[%s9269_s2 + $0x108] sm:$0xff]  ;;  %v6134_v39 = vld [vmem:[%s9269_s2 + $0x100] sm:$0xff]  ;;  %v86_v42 = vld [vmem:[%s9269_s2 + $0x78] sm:$0xff] }
  0x27   :  { %292 = vperm.xlu1 %7158, %v6127_v8   ;;  %287 = vperm.xlu0 %7157, %v6126_v9   ;;  %v6179_v40 = vld [vmem:[%s9269_s2 + $0xee] sm:$0xff]  ;;  %v6177_v41 = vld [vmem:[%s9269_s2 + $0xde] sm:$0xff]  ;;  %v612_v57 = vld [vmem:[%s9269_s2 + $0x66] sm:$0xff] }
  0x28   :  { %v6181_v43 = vld [vmem:[%s9269_s2 + $0xfe] sm:$0xff]  ;;  %v6140_v46 = vld [vmem:[%s9269_s2 + $0x130] sm:$0xff]  ;;  %v88_v47 = vld [vmem:[%s9269_s2 + $0x88] sm:$0xff] }
  0x29   :  { %v6159_v44 = vld [vmem:[%s9269_s2 + $0x1b8] sm:$0xff]  ;;  %v6138_v45 = vld [vmem:[%s9269_s2 + $0x120] sm:$0xff]  ;;  %v6158_v48 = vld [vmem:[%s9269_s2 + $0x1b0] sm:$0xff] }
  0x2a   :  { %v6157_v49 = vld [vmem:[%s9269_s2 + $0x1a8] sm:$0xff]  ;;  %v7160_v50 = vld [vmem:[%s9270_s23 + $0x18] sm:$0xff]   ;;  %v7161_v53 = vld [vmem:[%s9270_s23 + $0x10] sm:$0xff]  }
  0x2b   :  { %125 = vperm.xlu1 %7158, %v77_v10   ;;  %454 = vperm.xlu0 %7157, %v6147_v11   ;;  %v613_v51 = vld [vmem:[%s9269_s2 + $0x6e] sm:$0xff]  ;;  %v611_v54 = vld [vmem:[%s9269_s2 + $0x5e] sm:$0xff]  ;;  %v6184_v61 = vld [vmem:[%s9269_s2 + $0x116] sm:$0xff] }
  0x2c   :  { %v6161_v52 = vld [vmem:[%s9269_s2 + $0x1c8] sm:$0xff]  ;;  %7027 = vmatprep.subr.bf16.mxu0 %v7160_v50  ;;  %v6163_v55 = vld [vmem:[%s9269_s2 + $0x1d8] sm:$0xff]  ;;  %v6130_v59 = vld [vmem:[%s9269_s2 + $0xe0] sm:$0xff] }
  0x2d   :  { %7028 = vmatpush3.bf16.msra.mxu0 %v7160_v50  ;;  %v78_v56 = vld [vmem:[%s9269_s2 + $0x38] sm:$0xff]  ;;  %v617_v60 = vld [vmem:[%s9269_s2 + $0x8e] sm:$0xff]  ;;  %v6182_v63 = vld [vmem:[%s9269_s2 + $0x106] sm:$0xff] }
  0x2e   :  { %7029 = vmatprep.subr.bf16.mxu0 %v7161_v53  ;;  %v615_v58 = vld [vmem:[%s9269_s2 + $0x7e] sm:$0xff]  ;;  %v6183_v62 = vld [vmem:[%s9269_s2 + $0x10e] sm:$0xff]  ;;  %v6186_v0 = vld [vmem:[%s9269_s2 + $0x126] sm:$0xff] }
  0x2f   :  { %145 = vperm.xlu1 %7158, %v81_v12   ;;  %135 = vperm.xlu0 %7157, %v79_v13   ;;  %v6153_v2 = vld [vmem:[%s9269_s2 + $0x188] sm:$0xff]  ;;  %v6188_v3 = vld [vmem:[%s9269_s2 + $0x136] sm:$0xff]  ;;  %v71_v4 = vld [vmem:[%s9269_s2] sm:$0xff] }
  0x30   :  { %v6123_v7 = vld [vmem:[%s9269_s2 + $0xa8] sm:$0xff]  ;;  %v607_v8 = vld [vmem:[%s9269_s2 + $0x3e] sm:$0xff] }
  0x31   :  { %7030 = vmatpush3.bf16.msra.mxu0 %v7161_v53  ;;  %v76_v11 = vld [vmem:[%s9269_s2 + $0x28] sm:$0xff] }
  0x32   :  { %v80_v12 = vld [vmem:[%s9269_s2 + $0x48] sm:$0xff] }
  0x33   :  { %312 = vperm.xlu1 %7158, %v6131_v14   ;;  %302 = vperm.xlu0 %7157, %v6129_v15   ;;  %v6128_v15 = vld [vmem:[%s9269_s2 + $0xd0] sm:$0xff]  ;;  %v616_v53 = vld [vmem:[%s9269_s2 + $0x86] sm:$0xff] }
  0x37   :  { %459 = vperm.xlu1 %7158, %v6148_v16   ;;  %322 = vperm.xlu0 %7157, %v6133_v17   ;;  %v6132_v16 = vld [vmem:[%s9269_s2 + $0xf0] sm:$0xff] }
  0x3b   :  { %469 = vperm.xlu1 %7158, %v6150_v18   ;;  %464 = vperm.xlu0 %7157, %v6149_v19   ;;  %v6146_v19 = vld [vmem:[%s9269_s2 + $0x150] sm:$0xff] }
  0x3f   :  { %479 = vperm.xlu1 %7158, %v6152_v20   ;;  %630 = vperm.xlu0 %7157, %v601_v21   ;;  %v6178_v20 = vld [vmem:[%s9269_s2 + $0xe6] sm:$0xff] }
  0x43   :  { %499 = vperm.xlu1 %7158, %v6156_v22   ;;  %489 = vperm.xlu0 %7157, %v6154_v23   ;;  %v6151_v23 = vld [vmem:[%s9269_s2 + $0x178] sm:$0xff] }
  0x47   :  { %640 = vperm.xlu1 %7158, %v603_v24   ;;  %635 = vperm.xlu0 %7157, %v602_v25   ;;  %v6155_v24 = vld [vmem:[%s9269_s2 + $0x198] sm:$0xff] }
  0x4b   :  { %806 = vperm.xlu1 %7158, %v6172_v26   ;;  %645 = vperm.xlu0 %7157, %v604_v27   ;;  %v87_v27 = vld [vmem:[%s9269_s2 + $0x80] sm:$0xff] }
  0x4f   :  { %665 = vperm.xlu1 %7158, %v608_v28   ;;  %655 = vperm.xlu0 %7157, %v606_v29   ;;  %v6139_v28 = vld [vmem:[%s9269_s2 + $0x128] sm:$0xff] }
  0x53   :  { %811 = vperm.xlu1 %7158, %v6173_v30   ;;  %675 = vperm.xlu0 %7157, %v610_v31   ;;  %v600_v31 = vld [vmem:[%s9269_s2 + $0x6] sm:$0xff] }
  0x57   :  { %821 = vperm.xlu1 %7158, %v6175_v32   ;;  %816 = vperm.xlu0 %7157, %v6174_v33   ;;  %v605_v32 = vld [vmem:[%s9269_s2 + $0x2e] sm:$0xff] }
  0x5b   :  { %337 = vperm.xlu1 %7158, %v6136_v34   ;;  %160 = vperm.xlu0 %7157, %v84_v35   ;;  %v609_v35 = vld [vmem:[%s9269_s2 + $0x4e] sm:$0xff] }
  0x5f   :  { %155 = vperm.xlu1 %7158, %v83_v36   ;;  %150 = vperm.xlu0 %7157, %v82_v37   ;;  %v6162_v36 = vld [vmem:[%s9269_s2 + $0x1d0] sm:$0xff] }
  0x63   :  { %332 = vperm.xlu1 %7158, %v6135_v38   ;;  %327 = vperm.xlu0 %7157, %v6134_v39   ;;  %v6171_v39 = vld [vmem:[%s9269_s2 + $0xae] sm:$0xff] }
  0x67   :  { %841 = vperm.xlu1 %7158, %v6179_v40   ;;  %831 = vperm.xlu0 %7157, %v6177_v41   ;;  %v6176_v40 = vld [vmem:[%s9269_s2 + $0xd6] sm:$0xff] }
  0x6b   :  { %170 = vperm.xlu1 %7158, %v86_v42   ;;  %851 = vperm.xlu0 %7157, %v6181_v43   ;;  %v7945_v43 = vld [vmem:[%s9271_s21 + $0x1] ss:$0 sm:$0xff] }
  0x6f   :  { %514 = vperm.xlu1 %7158, %v6159_v44   ;;  %347 = vperm.xlu0 %7157, %v6138_v45   ;;  %v6180_v44 = vld [vmem:[%s9269_s2 + $0xf6] sm:$0xff] }
  0x70   :  { %v85_v45 = vld [vmem:[%s9269_s2 + $0x70] sm:$0xff] }
  0x73   :  { %357 = vperm.xlu1 %7158, %v6140_v46   ;;  %180 = vperm.xlu0 %7157, %v88_v47   ;;  %v7956_v46 = vld [vmem:[%s9271_s21] ss:$0 sm:$0xff]  ;;  %v7961_v47 = vld [vmem:[%s9271_s21 + $0x2] ss:$0 sm:$0xff] }
  0x77   :  { %509 = vperm.xlu1 %7158, %v6158_v48   ;;  %504 = vperm.xlu0 %7157, %v6157_v49  }
  0x7b   :  { %690 = vperm.xlu1 %7158, %v613_v51   ;;  %524 = vperm.xlu0 %7157, %v6161_v52   ;;  %v7971_v51 = vld [vmem:[%s9271_s21 + $0x3] ss:$0 sm:$0xff]  ;;  %v6137_v52 = vld [vmem:[%s9269_s2 + $0x118] sm:$0xff] }
  0x7f   :  { %680 = vperm.xlu1 %7158, %v611_v54   ;;  %534 = vperm.xlu0 %7157, %v6163_v55  }
  0x83   :  { %130 = vperm.xlu1 %7158, %v78_v56   ;;  %685 = vperm.xlu0 %7157, %v612_v57  }
  0x87   :  { %700 = vperm.xlu1 %7158, %v615_v58   ;;  %307 = vperm.xlu0 %7157, %v6130_v59  }
  0x8b   :  { %710 = vperm.xlu1 %7158, %v617_v60   ;;  %866 = vperm.xlu0 %7157, %v6184_v61   ;;  %v7986_v60 = vld [vmem:[%s9271_s21 + $0x4] ss:$0 sm:$0xff] }
  0x8c   :  { %v6160_v61 = vld [vmem:[%s9269_s2 + $0x1c0] sm:$0xff] }
  0x8f   :  { %861 = vperm.xlu1 %7158, %v6183_v62   ;;  %856 = vperm.xlu0 %7157, %v6182_v63   ;;  %v6187_v62 = vld [vmem:[%s9269_s2 + $0x12e] sm:$0xff] }
  0x93   :  { %876 = vperm.xlu1 %7158, %v6186_v0   ;;  %484 = vperm.xlu0 %7157, %v6153_v2  }
  0x96   :  { %v7856_v5 = vpop.permute.xlu1 %105  ;;  %v7858_v6 = vpop.permute.xlu0 %100 }
  0x97   :  { %886 = vperm.xlu0 %7157, %v6188_v3   ;;  %95 = vperm.xlu1 %7158, %v71_v4   ;;  %v205_v54 = vmul.f32 %v7956_v46, %v7858_v6  ;;  %v7999_v6 = vld [vmem:[%s9251_s7] ss:$0 sm:$0xff] }
  0x9a   :  { %v7866_v9 = vpop.permute.xlu1 %110  ;;  %v278_v10 = vpop.permute.xlu0 %277 }
  0x9b   :  { %272 = vperm.xlu0 %7157, %v6123_v7   ;;  %660 = vperm.xlu1 %7158, %v607_v8   ;;  %v382_v50 = vmul.f32 %v7945_v43, %v278_v10  ;;  %v89_v8 = vld [vmem:[%s9269_s2 + $0x90] sm:$0xff]  ;;  %v90_v10 = vld [vmem:[%s9269_s2 + $0x98] sm:$0xff] }
  0x9d   :  { %v403_v58 = vadd.f32 %v382_v50, %v205_v54 }
  0x9e   :  { %v7874_v13 = vpop.permute.xlu1 %282  ;;  %v7876_v14 = vpop.permute.xlu0 %115 }
  0x9f   :  { %120 = vperm.xlu0 %7157, %v76_v11   ;;  %140 = vperm.xlu1 %7158, %v80_v12   ;;  %v383_v3 = vmul.f32 %v7945_v43, %v7874_v13  ;;  %v7165_v11 = vld [vmem:[%s9270_s23 + $0x8] sm:$0xff]   ;;  %v206_v13 = vmul.f32 %v7956_v46, %v7856_v5 }
  0xa0   :  { %v8014_v12 = vld [vmem:[%s9270_s23 + $0x28] sm:$0xff]   ;;  %7039 = vmatprep.subr.bf16.mxu1 %v7165_v11 }
  0xa1   :  { %7051 = vmatprep.subr.bf16.mxu0 %v8014_v12  ;;  %7040 = vmatpush3.bf16.msra.mxu1 %v7165_v11  ;;  %v6185_v11 = vld [vmem:[%s9269_s2 + $0x11e] sm:$0xff] }
  0xa2   :  { %v7884_v17 = vpop.permute.xlu1 %292  ;;  %v7886_v18 = vpop.permute.xlu0 %287 }
  0xa3   :  { %297 = vperm.xlu0 %7157, %v6128_v15   ;;  %317 = vperm.xlu1 %7158, %v6132_v16  }
  0xa6   :  { %v7894_v21 = vpop.permute.xlu1 %125  ;;  %v455_v22 = vpop.permute.xlu0 %454 }
  0xa7   :  { %449 = vperm.xlu0 %7157, %v6146_v19   ;;  %836 = vperm.xlu1 %7158, %v6178_v20   ;;  %v559_v55 = vmul.f32 %v7961_v47, %v455_v22  ;;  %v385_v19 = vmul.f32 %v7945_v43, %v7884_v17  ;;  %v384_v20 = vmul.f32 %v7945_v43, %v7886_v18 }
  0xa8   :  { %v207_v17 = vmul.f32 %v7956_v46, %v7866_v9  ;;  %v208_v18 = vmul.f32 %v7956_v46, %v7876_v14  ;;  %v7167_v9 = vld [vmem:[%s9270_s23] sm:$0xff]  }
  0xa9   :  { %v580_v63 = vadd.f32 %v559_v55, %v403_v58  ;;  %7041 = vmatprep.subr.bf16.mxu1 %v7167_v9  ;;  %v614_v55 = vld [vmem:[%s9269_s2 + $0x76] sm:$0xff] }
  0xaa   :  { %v7902_v25 = vpop.permute.xlu1 %145  ;;  %v7904_v26 = vpop.permute.xlu0 %135  ;;  %7042 = vmatpush3.bf16.msra.mxu1 %v7167_v9 }
  0xab   :  { %474 = vperm.xlu0 %7157, %v6151_v23   ;;  %494 = vperm.xlu1 %7158, %v6155_v24   ;;  %v404_v24 = vadd.f32 %v383_v3, %v206_v13 }
  0xae   :  { %v7912_v29 = vpop.permute.xlu1 %312  ;;  %v7914_v30 = vpop.permute.xlu0 %302 }
  0xaf   :  { %175 = vperm.xlu0 %7157, %v87_v27   ;;  %352 = vperm.xlu1 %7158, %v6139_v28  }
  0xb2   :  { %v460_v33 = vpop.permute.xlu1 %459  ;;  %v7922_v34 = vpop.permute.xlu0 %322 }
  0xb3   :  { %625 = vperm.xlu0 %7157, %v600_v31   ;;  %650 = vperm.xlu1 %7158, %v605_v32   ;;  %v560_v15 = vmul.f32 %v7961_v47, %v460_v33  ;;  %v6141_v32 = vld [vmem:[%s9269_s2 + $0x138] sm:$0xff]  ;;  %v6142_v33 = vld [vmem:[%s9269_s2 + $0x140] sm:$0xff] }
  0xb5   :  { %v581_v14 = vadd.f32 %v560_v15, %v404_v24 }
  0xb6   :  { %v7930_v37 = vpop.permute.xlu1 %469  ;;  %v7932_v38 = vpop.permute.xlu0 %464 }
  0xb7   :  { %670 = vperm.xlu0 %7157, %v609_v35   ;;  %529 = vperm.xlu1 %7158, %v6162_v36   ;;  %v562_v28 = vmul.f32 %v7961_v47, %v7930_v37  ;;  %v561_v31 = vmul.f32 %v7961_v47, %v7932_v38  ;;  %v406_v36 = vadd.f32 %v385_v19, %v208_v18 }
  0xb8   :  { %v405_v37 = vadd.f32 %v384_v20, %v207_v17 }
  0xba   :  { %v7940_v41 = vpop.permute.xlu1 %479  ;;  %v631_v42 = vpop.permute.xlu0 %630 }
  0xbb   :  { %801 = vperm.xlu0 %7157, %v6171_v39   ;;  %826 = vperm.xlu1 %7158, %v6176_v40   ;;  %v735_v59 = vmul.f32 %v7971_v51, %v631_v42 }
  0xbd   :  { %v756_v4 = vadd.f32 %v735_v59, %v580_v63 }
  0xbe   :  { %v7963_v48 = vpop.permute.xlu1 %499  ;;  %v7965_v49 = vpop.permute.xlu0 %489 }
  0xbf   :  { %846 = vperm.xlu0 %7157, %v6180_v44   ;;  %165 = vperm.xlu1 %7158, %v85_v45  }
  0xc2   :  { %v641_v56 = vpop.permute.xlu1 %640  ;;  %v636_v57 = vpop.permute.xlu0 %635 }
  0xc3   :  { %342 = vperm.xlu0 %7157, %v6137_v52   ;;  %705 = vperm.xlu1 %7158, %v616_v53   ;;  %v736_v5 = vmul.f32 %v7971_v51, %v636_v57  ;;  %v737_v38 = vmul.f32 %v7971_v51, %v641_v56  ;;  %v583_v52 = vadd.f32 %v562_v28, %v406_v36  ;;  %v6164_v56 = vld [vmem:[%s9269_s2 + $0x1e0] sm:$0xff] }
  0xc4   :  { %v582_v53 = vadd.f32 %v561_v31, %v405_v37  ;;  %v387_v36 = vmul.f32 %v7945_v43, %v7914_v30  ;;  %v212_v30 = vmul.f32 %v7956_v46, %v7904_v26 }
  0xc5   :  { %v757_v44 = vadd.f32 %v736_v5, %v581_v14  ;;  %v618_v5 = vld [vmem:[%s9269_s2 + $0x96] sm:$0xff] }
  0xc6   :  { %v807_v0 = vpop.permute.xlu1 %806  ;;  %v646_v2 = vpop.permute.xlu0 %645  ;;  %v758_v58 = vadd.f32 %v737_v38, %v582_v53  ;;  %v564_v53 = vmul.f32 %v7961_v47, %v7940_v41 }
  0xc7   :  { %v911_v7 = vmul.f32 %v7986_v60, %v807_v0  ;;  %519 = vperm.xlu0 %7157, %v6160_v61   ;;  %881 = vperm.xlu1 %7158, %v6187_v62   ;;  %v738_v39 = vmul.f32 %v7971_v51, %v646_v2 }
  0xc9   :  { %v932_v16 = vadd.f32 %v911_v7, %v756_v4  ;;  %v759_v61 = vadd.f32 %v738_v39, %v583_v52  ;;  %v6165_v4 = vld [vmem:[%s9269_s2 + $0x1e8] sm:$0xff]  ;;  %v6189_v52 = vld [vmem:[%s9269_s2 + $0x13e] sm:$0xff] }
  0xca   :  { %v8023_v22 = vpop.permute.xlu1 %665  ;;  %v8025_v23 = vpop.permute.xlu0 %655 }
  0xcb   :  { %v959_v27 = vadd.f32 %v7999_v6, %v932_v16  ;;  %185 = vperm.xlu0 %7157, %v89_v8   ;;  %190 = vperm.xlu1 %7158, %v90_v10  }
  0xcd   :  { %981 = vst.msk [vmem:[%s9257_s13 + $0x8] sm:$0xff] %vm979_vm1, %v959_v27  ;;  %vm1003_vm2 = vcmp.ge.f32.partialorder %v959_v27, 0.0  ;;  %v1024_v35 = vmul.f32 0.01, %v959_v27 }
  0xce   :  { %v812_v40 = vpop.permute.xlu1 %811  ;;  %v8053_v42 = vpop.permute.xlu0 %675 }
  0xcf   :  { %v8055_v45 = vsel %vm1003_vm2, %v959_v27, %v1024_v35  ;;  %v912_v50 = vmul.f32 %v7986_v60, %v812_v40  ;;  %362 = vperm.xlu0 %7157, %v6141_v32   ;;  %367 = vperm.xlu1 %7158, %v6142_v33   ;;  %v619_v27 = vld [vmem:[%s9269_s2 + $0x9e] sm:$0xff]  ;;  %v389_v35 = vmul.f32 %v7945_v43, %v7912_v29 }
  0xd0   :  { %v6852_v54 = vpack.c.bf16 %v8055_v45, %v8055_v45  ;;  %v210_v29 = vmul.f32 %v7956_v46, %v7894_v21  ;;  %v6190_v21 = vld [vmem:[%s9269_s2 + $0x146] sm:$0xff] }
  0xd1   :  { %v933_v57 = vadd.f32 %v912_v50, %v757_v44 }
  0xd2   :  { %1091 = vst.msk [vmem:[#allocation2 + $0x4] sm:$0x3] %vm1000_vm3, %v6852_v54  ;;  %v1098_v59 = vrot.slane %v6852_v54, 7  ;;  %v822_v62 = vpop.permute.xlu1 %821  ;;  %v817_v63 = vpop.permute.xlu0 %816  ;;  %v566_v54 = vmul.f32 %v7961_v47, %v7965_v49 }
  0xd3   :  { %v960_v0 = vadd.f32 %v7999_v6, %v933_v57  ;;  %v914_v2 = vmul.f32 %v7986_v60, %v822_v62  ;;  %v913_v3 = vmul.f32 %v7986_v60, %v817_v63  ;;  %695 = vperm.xlu0 %7157, %v614_v55   ;;  %539 = vperm.xlu1 %7158, %v6164_v56   ;;  %v7201_v55 = vld [vmem:[%s9247_s3 + $0x68] sm:$0xff]  }
  0xd4   :  { %1104 = vst.msk [vmem:[#allocation2 + $0x20] sm:$0x8] %vm1089_vm4, %v1098_v59  ;;  %v1099_v31 = vrot.slane %v1098_v59, 4  ;;  %v408_v59 = vadd.f32 %v387_v36, %v210_v29  ;;  %v740_v62 = vmul.f32 %v7971_v51, %v8025_v23  ;;  %v391_v63 = vmul.f32 %v7945_v43, %v7922_v34  ;;  %v6143_v34 = vld [vmem:[%s9269_s2 + $0x148] sm:$0x3] }
  0xd5   :  { %982 = vst.msk [vmem:[%s9257_s13 + $0x10] sm:$0xff] %vm979_vm1, %v960_v0  ;;  %vm1004_vm5 = vcmp.ge.f32.partialorder %v960_v0, 0.0  ;;  %v1025_v7 = vmul.f32 0.01, %v960_v0  ;;  %v935_v8 = vadd.f32 %v914_v2, %v759_v61  ;;  %v934_v10 = vadd.f32 %v913_v3, %v758_v58 }
  0xd6   :  { %v8081_v13 = vpop.permute.xlu1 %337  ;;  %v8083_v15 = vpop.permute.xlu0 %160  ;;  %v410_v58 = vadd.f32 %v389_v35, %v212_v30  ;;  %v742_v61 = vmul.f32 %v7971_v51, %v8023_v22  ;;  %v585_v22 = vadd.f32 %v564_v53, %v408_v59  ;;  %v214_v23 = vmul.f32 %v7956_v46, %v7902_v25  ;;  %v8197_v30 = vld [vmem:[%s9270_s23 + $0x38] sm:$0xff]  }
  0xd7   :  { %v1046_v16 = vsel %vm1004_vm5, %v960_v0, %v1025_v7  ;;  %v962_v19 = vadd.f32 %v7999_v6, %v935_v8  ;;  %v961_v20 = vadd.f32 %v7999_v6, %v934_v10  ;;  %544 = vperm.xlu0 %7157, %v6165_v4   ;;  %871 = vperm.xlu1 %7158, %v6185_v11   ;;  %v91_v4 = vld [vmem:[%s9269_s2 + $0xa0] sm:$0x3] }
  0xd8   :  { %v6853_v24 = vpack.c.bf16 %v1046_v16, %v1046_v16  ;;  %v587_v7 = vadd.f32 %v566_v54, %v410_v58  ;;  %v568_v8 = vmul.f32 %v7961_v47, %v7963_v48  ;;  %v744_v25 = vmul.f32 %v7971_v51, %v8053_v42  ;;  %v6166_v48 = vld [vmem:[%s9269_s2 + $0x1f0] sm:$0x3]  ;;  %7063 = vmatprep.subr.bf16.mxu1 %v8197_v30 }
  0xd9   :  { %984 = vst.msk [vmem:[%s9257_s13 + $0x20] sm:$0xff] %vm979_vm1, %v962_v19  ;;  %vm1006_vm11 = vcmp.ge.f32.partialorder %v962_v19, 0.0  ;;  %v1027_v18 = vmul.f32 0.01, %v962_v19  ;;  %983 = vst.msk [vmem:[%s9257_s13 + $0x18] sm:$0xff] %vm979_vm1, %v961_v20  ;;  %vm1005_vm12 = vcmp.ge.f32.partialorder %v961_v20, 0.0 }
  0xda   :  { %v1026_v28 = vmul.f32 0.01, %v961_v20  ;;  %v1100_v32 = vrot.slane %v6853_v24, 7  ;;  %v1106_v33 = vrot.slane %v6853_v24, 6  ;;  %v8105_v9 = vpop.permute.xlu1 %155  ;;  %v8107_v14 = vpop.permute.xlu0 %150  ;;  %v763_v16 = vadd.f32 %v742_v61, %v587_v7 }
  0xdb   :  { %v1048_v37 = vsel %vm1006_vm11, %v962_v19, %v1027_v18  ;;  %715 = vperm.xlu0 %7157, %v618_v5   ;;  %720 = vperm.xlu1 %7158, %v619_v27   ;;  %v761_v19 = vadd.f32 %v740_v62, %v585_v22  ;;  %v412_v5 = vadd.f32 %v391_v63, %v214_v23 }
  0xdc   :  { %v1047_v38 = vsel %vm1005_vm12, %v961_v20, %v1026_v28  ;;  %v1101_v39 = vsel %vm8093_vm10, %v1099_v31, %v1100_v32  ;;  %v1107_v40 = vrot.slane %v1106_v33, 4  ;;  %1110 = vst.msk [vmem:[#allocation2 + $0x40] sm:$0x8] %vm1089_vm4, %v1106_v33  ;;  %v6855_v44 = vpack.c.bf16 %v1048_v37, %v1048_v37  ;;  %v620_v28 = vld [vmem:[%s9269_s2 + $0xa6] sm:$0x3] }
  0xdd   :  { %v6854_v50 = vpack.c.bf16 %v1047_v38, %v1047_v38  ;;  %1105 = vst.msk [vmem:[#allocation2 + $0x24] sm:$0x3] %vm1000_vm3, %v1101_v39  ;;  %v589_v31 = vadd.f32 %v568_v8, %v412_v5  ;;  %v6191_v37 = vld [vmem:[%s9269_s2 + $0x14e] sm:$0x3]  ;;  %v7169_v8 = vld [vmem:[%s9270_s23 + $0x20] sm:$0xff]  }
  0xde   :  { %1111 = vst.msk [vmem:[#allocation2 + $0x44] sm:$0x3] %vm1000_vm3, %v1107_v40  ;;  %v1130_v26 = vrot.slane %v6855_v44, 5  ;;  %v8139_v56 = vpop.permute.xlu1 %332  ;;  %v8141_v57 = vpop.permute.xlu0 %327  ;;  %v8236_v5 = vld [vmem:[%s9270_s23 + $0x48] sm:$0xff]  }
  0xdf   :  { %1141 = vst.msk [vmem:[#allocation2 + $0x44] sm:$0xc] %vm1118_vm8, %v6855_v44  ;;  %v1114_v41 = vrot.slane %v6854_v50, 6  ;;  %v6200_v49 = vrot.slane %v6854_v50, 9  ;;  %891 = vperm.xlu0 %7157, %v6189_v52   ;;  %896 = vperm.xlu1 %7158, %v6190_v21   ;;  %v765_v38 = vadd.f32 %v744_v25, %v589_v31  ;;  %v392_v25 = vmul.f32 %v7945_v43, %v8141_v57 }
  0xe0   :  { %v1132_v0 = vrot.slane %v1130_v26, 4  ;;  %v216_v31 = vmul.f32 %v7956_v46, %v8105_v9 }
  0xe1   :  { %v1115_v2 = vrot.slane %v1114_v41, 4  ;;  %1119 = vst.msk [vmem:[#allocation2 + $0x4] sm:$0xc] %vm1118_vm8, %v1114_v41  ;;  %v1131_v3 = vsel %vm8130_vm14, %v6200_v49, %v1130_v26 }
  0xe2   :  { %1135 = vst.msk [vmem:[#allocation2 + $0x24] sm:$0xc] %vm1118_vm8, %v1131_v3  ;;  %v842_v10 = vpop.permute.xlu1 %841  ;;  %v832_v11 = vpop.permute.xlu0 %831 }
  0xe3   :  { %1136 = vst.msk [vmem:[#allocation2 + $0x28] sm:$0x1] %vm1120_vm15, %v1132_v0  ;;  %1121 = vst.msk [vmem:[#allocation2 + $0x8] sm:$0x1] %vm1120_vm15, %v1115_v2  ;;  %v918_v20 = vmul.f32 %v7986_v60, %v842_v10  ;;  %v916_v24 = vmul.f32 %v7986_v60, %v832_v11  ;;  %195 = vperm.xlu0 %7157, %v91_v4   ;;  %372 = vperm.xlu1 %7158, %v6143_v34  }
  0xe5   :  { %v939_v27 = vadd.f32 %v918_v20, %v763_v16  ;;  %v937_v18 = vadd.f32 %v916_v24, %v761_v19  ;;  %v394_v19 = vmul.f32 %v7945_v43, %v8081_v13  ;;  %v217_v20 = vmul.f32 %v7956_v46, %v8083_v15 }
  0xe6   :  { %v8175_v32 = vpop.permute.xlu1 %170  ;;  %v852_v33 = vpop.permute.xlu0 %851  ;;  %v393_v15 = vmul.f32 %v7945_v43, %v8139_v56 }
  0xe7   :  { %v966_v35 = vadd.f32 %v7999_v6, %v939_v27  ;;  %v964_v36 = vadd.f32 %v7999_v6, %v937_v18  ;;  %v920_v42 = vmul.f32 %v7986_v60, %v852_v33  ;;  %549 = vperm.xlu0 %7157, %v6166_v48   ;;  %725 = vperm.xlu1 %7158, %v620_v28  }
  0xe8   :  { %v415_v27 = vadd.f32 %v394_v19, %v217_v20  ;;  %v215_v18 = vmul.f32 %v7956_v46, %v8107_v14 }
  0xe9   :  { %v7159_v39 = vld [vmem:[#allocation2 + $0x20] sm:$0xff]   ;;  %988 = vst.msk [vmem:[%s9257_s13 + $0x40] sm:$0xff] %vm979_vm1, %v966_v35  ;;  %vm1010_vm2 = vcmp.ge.f32.partialorder %v966_v35, 0.0  ;;  %v1031_v40 = vmul.f32 0.01, %v966_v35  ;;  %986 = vst.msk [vmem:[%s9257_s13 + $0x30] sm:$0xff] %vm979_vm1, %v964_v36  ;;  %v941_v50 = vadd.f32 %v920_v42, %v765_v38 }
  0xea   :  { %vm1008_vm5 = vcmp.ge.f32.partialorder %v964_v36, 0.0  ;;  %v1029_v44 = vmul.f32 0.01, %v964_v36  ;;  %v515_v52 = vpop.permute.xlu1 %514  ;;  %v8191_v29 = vpop.permute.xlu0 %347  ;;  %7031 = vmatprep.mubr.msk.bf16.mxu0 %vm979_vm1, %v7159_v39 }
  0xeb   :  { %v1052_v53 = vsel %vm1010_vm2, %v966_v35, %v1031_v40  ;;  %901 = vperm.xlu0 %7157, %v6191_v37   ;;  %v968_v41 = vadd.f32 %v7999_v6, %v941_v50  ;;  %v571_v24 = vmul.f32 %v7961_v47, %v515_v52  ;;  %v413_v35 = vadd.f32 %v392_v25, %v215_v18 }
  0xec   :  { %v1050_v54 = vsel %vm1008_vm5, %v964_v36, %v1029_v44  ;;  %v8199_v21 = vpack.c.bf16 %v1052_v53, %v1052_v53  ;;  %v414_v37 = vadd.f32 %v393_v15, %v216_v31  ;;  %v396_v40 = vmul.f32 %v7945_v43, %v8191_v29 }
  0xed   :  { %v8201_v26 = vpack.c.bf16 %v1050_v54, %v1050_v54  ;;  %990 = vst.msk [vmem:[%s9257_s13 + $0x50] sm:$0xff] %vm979_vm1, %v968_v41  ;;  %vm1012_vm7 = vcmp.ge.f32.partialorder %v968_v41, 0.0  ;;  %v1033_v62 = vmul.f32 0.01, %v968_v41  ;;  %v592_v33 = vadd.f32 %v571_v24, %v415_v27 }
  0xee   :  { %v6206_v49 = vrot.slane %v8199_v21, 9  ;;  %v358_v59 = vpop.permute.xlu1 %357  ;;  %v181_v61 = vpop.permute.xlu0 %180  ;;  %v219_v44 = vmul.f32 %v7956_v46, %v8175_v32  ;;  %vm1153_vm5 = vcmask 1041408  }
  0xef   :  { %v1148_v58 = vrot.slane %v8201_v26, 7  ;;  %v1054_v63 = vsel %vm1012_vm7, %v968_v41, %v1033_v62  ;;  %v398_v53 = vmul.f32 %v7945_v43, %v358_v59  ;;  %v221_v54 = vmul.f32 %v7956_v46, %v181_v61 }
  0xf0   :  { %1173 = vst.msk [vmem:[#allocation2 + $0x2c] sm:$0x7] %vm1076_vm0, %v6206_v49  ;;  %v8213_v0 = vpack.c.bf16 %v1054_v63, %v1054_v63  ;;  %vm1154_vm7 = vcmask 1045508  }
  0xf1   :  { %1150 = vst.msk [vmem:[#allocation2 + $0x28] sm:$0xe] %vm1143_vm6, %v1148_v58 }
  0xf2   :  { %v510_v2 = vpop.permute.xlu1 %509  ;;  %v505_v3 = vpop.permute.xlu0 %504  ;;  %1183 = vst.msk [vmem:[#allocation2 + $0x10] sm:$0x3] %vm1000_vm3, %v8213_v0  ;;  %v1186_v4 = vrot.slane %v8213_v0, 7 }
  0xf3   :  { %v569_v28 = vmul.f32 %v7961_v47, %v505_v3  ;;  %v570_v57 = vmul.f32 %v7961_v47, %v510_v2 }
  0xf4   :  { %1192 = vst.msk [vmem:[#allocation2 + $0x2c] sm:$0x8] %vm1089_vm4, %v1186_v4 }
  0xf5   :  { %v590_v9 = vadd.f32 %v569_v28, %v413_v35  ;;  %v591_v50 = vadd.f32 %v570_v57, %v414_v37 }
  0xf6   :  { %v691_v22 = vpop.permute.xlu1 %690  ;;  %v525_v7 = vpop.permute.xlu0 %524 }
  0xf7   :  { %v573_v41 = vmul.f32 %v7961_v47, %v525_v7 }
  0xfa   :  { %v681_v34 = vpop.permute.xlu1 %680  ;;  %v535_v23 = vpop.permute.xlu0 %534 }
  0xfb   :  { %v7162_v10 = vld [vmem:[#allocation2 + $0x28] sm:$0xff]   ;;  %v745_v36 = vmul.f32 %v7971_v51, %v681_v34  ;;  %v575_v32 = vmul.f32 %v7961_v47, %v535_v23 }
  0xfc   :  { %7032 = vmatmul.mubr.msk.bf16.vlgmr.msra.gmra.mxu0 %vm979_vm1, %v7162_v10 }
  0xfd   :  { %7052 = vmatpush3.bf16.msra.mxu0 %v8014_v12  ;;  %v747_v12 = vmul.f32 %v7971_v51, %v691_v22  ;;  %v766_v49 = vadd.f32 %v745_v36, %v590_v9  ;;  %v417_v22 = vadd.f32 %v396_v40, %v219_v44  ;;  %v1187_v9 = vrot.slane %v1186_v4, 4 }
  0xfe   :  { %v8224_v11 = vpop.permute.xlu1 %130  ;;  %v686_v16 = vpop.permute.xlu0 %685  ;;  %7053 = vmatprep.subr.bf16.mxu0 %v7169_v8 }
  0xff   :  { %v768_v38 = vadd.f32 %v747_v12, %v592_v33  ;;  %v746_v14 = vmul.f32 %v7971_v51, %v686_v16  ;;  %v594_v10 = vadd.f32 %v573_v41, %v417_v22 }
 0x101   :  { %7054 = vmatpush3.bf16.msra.mxu0 %v7169_v8  ;;  %v767_v63 = vadd.f32 %v746_v14, %v591_v50  ;;  %v419_v8 = vadd.f32 %v398_v53, %v221_v54 }
 0x102   :  { %v701_v48 = vpop.permute.xlu1 %700  ;;  %v8240_v13 = vpop.permute.xlu0 %307  ;;  %7075 = vmatprep.subr.bf16.mxu0 %v8236_v5 }
 0x103   :  { %v749_v34 = vmul.f32 %v7971_v51, %v701_v48  ;;  %v596_v27 = vadd.f32 %v575_v32, %v419_v8 }
 0x105   :  { %v770_v15 = vadd.f32 %v749_v34, %v594_v10  ;;  %v211_v10 = vmul.f32 %v7956_v46, %v8224_v11 }
 0x106   :  { %v711_v56 = vpop.permute.xlu1 %710  ;;  %v867_v42 = vpop.permute.xlu0 %866 }
 0x107   :  { %v923_v39 = vmul.f32 %v7986_v60, %v867_v42  ;;  %v751_v16 = vmul.f32 %v7971_v51, %v711_v56 }
 0x109   :  { %v944_v52 = vadd.f32 %v923_v39, %v768_v38  ;;  %v772_v36 = vadd.f32 %v751_v16, %v596_v27 }
 0x10a   :  { %v862_v58 = vpop.permute.xlu1 %861  ;;  %v857_v62 = vpop.permute.xlu0 %856 }
 0x10b   :  { %v971_v2 = vadd.f32 %v7999_v6, %v944_v52  ;;  %v922_v29 = vmul.f32 %v7986_v60, %v862_v58  ;;  %v921_v3 = vmul.f32 %v7986_v60, %v857_v62 }
 0x10d   :  { %993 = vst.msk [vmem:[%s9257_s13 + $0x68] sm:$0xff] %vm979_vm1, %v971_v2  ;;  %vm1015_vm9 = vcmp.ge.f32.partialorder %v971_v2, 0.0  ;;  %v1036_v59 = vmul.f32 0.01, %v971_v2  ;;  %v943_v61 = vadd.f32 %v922_v29, %v767_v63  ;;  %v942_v7 = vadd.f32 %v921_v3, %v766_v49 }
 0x10e   :  { %v877_v19 = vpop.permute.xlu1 %876  ;;  %v485_v20 = vpop.permute.xlu0 %484 }
 0x10f   :  { %v1057_v24 = vsel %vm1015_vm9, %v971_v2, %v1036_v59  ;;  %v970_v23 = vadd.f32 %v7999_v6, %v943_v61  ;;  %v969_v25 = vadd.f32 %v7999_v6, %v942_v7  ;;  %v925_v48 = vmul.f32 %v7986_v60, %v877_v19  ;;  %vm8337_vm9 = vmor %vm1153_vm5, %vm1154_vm7 }
 0x110   :  { %v6864_v12 = vpack.c.bf16 %v1057_v24, %v1057_v24  ;;  %v388_v59 = vmul.f32 %v7945_v43, %v8240_v13  ;;  %v565_v16 = vmul.f32 %v7961_v47, %v485_v20 }
 0x111   :  { %992 = vst.msk [vmem:[%s9257_s13 + $0x60] sm:$0xff] %vm979_vm1, %v970_v23  ;;  %vm1014_vm11 = vcmp.ge.f32.partialorder %v970_v23, 0.0  ;;  %v1035_v18 = vmul.f32 0.01, %v970_v23  ;;  %991 = vst.msk [vmem:[%s9257_s13 + $0x58] sm:$0xff] %vm979_vm1, %v969_v25  ;;  %vm1013_vm12 = vcmp.ge.f32.partialorder %v969_v25, 0.0  ;;  %v946_v33 = vadd.f32 %v925_v48, %v770_v15 }
 0x112   :  { %v1034_v28 = vmul.f32 0.01, %v969_v25  ;;  %v1213_v31 = vrot.slane %v6864_v12, 5  ;;  %1225 = vst.msk [vmem:[#allocation2 + $0x50] sm:$0xc] %vm1118_vm8, %v6864_v12  ;;  %v887_v57 = vpop.permute.xlu0 %886  ;;  %v8284_v35 = vpop.permute.xlu1 %95 }
 0x113   :  { %v1056_v56 = vsel %vm1014_vm11, %v970_v23, %v1035_v18  ;;  %v927_v37 = vmul.f32 %v7986_v60, %v887_v57  ;;  %v973_v40 = vadd.f32 %v7999_v6, %v946_v33 }
 0x114   :  { %v1055_v42 = vsel %vm1013_vm12, %v969_v25, %v1034_v28  ;;  %v1215_v38 = vrot.slane %v1213_v31, 4  ;;  %v6863_v14 = vpack.c.bf16 %v1056_v56, %v1056_v56  ;;  %v409_v25 = vadd.f32 %v388_v59, %v211_v10 }
 0x115   :  { %v6862_v39 = vpack.c.bf16 %v1055_v42, %v1055_v42  ;;  %v948_v44 = vadd.f32 %v927_v37, %v772_v36  ;;  %995 = vst.msk [vmem:[%s9257_s13 + $0x78] sm:$0xff] %vm979_vm1, %v973_v40  ;;  %vm1017_vm13 = vcmp.ge.f32.partialorder %v973_v40, 0.0  ;;  %v1038_v58 = vmul.f32 0.01, %v973_v40 }
 0x116   :  { %1219 = vst.msk [vmem:[#allocation2 + $0x34] sm:$0x1] %vm1120_vm15, %v1215_v38  ;;  %v1203_v50 = vrot.slane %v6863_v14, 6  ;;  %v6212_v52 = vrot.slane %v6863_v14, 9  ;;  %v273_v41 = vpop.permute.xlu0 %272  ;;  %v661_v49 = vpop.permute.xlu1 %660  ;;  %v586_v13 = vadd.f32 %v565_v16, %v409_v25 }
 0x117   :  { %v1188_v53 = vrot.slane %v6862_v39, 7  ;;  %v1194_v54 = vrot.slane %v6862_v39, 6  ;;  %v975_v62 = vadd.f32 %v7999_v6, %v948_v44  ;;  %v8304_v29 = vsel %vm1017_vm13, %v973_v40, %v1038_v58 }
 0x118   :  { %v1204_v0 = vrot.slane %v1203_v50, 4  ;;  %1207 = vst.msk [vmem:[#allocation2 + $0x10] sm:$0xc] %vm1118_vm8, %v1203_v50  ;;  %v1214_v4 = vsel %vm8130_vm14, %v6212_v52, %v1213_v31  ;;  %v8314_v22 = vpack.c.bf16 %v8304_v29, %v8304_v29  ;;  %v741_v48 = vmul.f32 %v7971_v51, %v661_v49 }
 0x119   :  { %v1189_v63 = vsel %vm8093_vm10, %v1187_v9, %v1188_v53  ;;  %v1195_v2 = vrot.slane %v1194_v54, 4  ;;  %1198 = vst.msk [vmem:[#allocation2 + $0x4c] sm:$0x8] %vm1089_vm4, %v1194_v54  ;;  %vm1019_vm2 = vcmp.ge.f32.partialorder %v975_v62, 0.0  ;;  %v1040_v3 = vmul.f32 0.01, %v975_v62 }
 0x11a   :  { %1218 = vst.msk [vmem:[#allocation2 + $0x30] sm:$0xc] %vm1118_vm8, %v1214_v4  ;;  %v121_v32 = vpop.permute.xlu0 %120  ;;  %v141_v34 = vpop.permute.xlu1 %140  ;;  %v1230_v7 = vrot.slane %v8314_v22, 7  ;;  %v762_v12 = vadd.f32 %v741_v48, %v586_v13  ;;  %v6204_v39 = vrot.slane %v8201_v26, 10  ;;  %v381_v50 = vmul.f32 %v7945_v43, %v273_v41 }
 0x11b   :  { %1193 = vst.msk [vmem:[#allocation2 + $0x30] sm:$0x3] %vm1000_vm3, %v1189_v63  ;;  %1199 = vst.msk [vmem:[#allocation2 + $0x50] sm:$0x3] %vm1000_vm3, %v1195_v2  ;;  %v1061_v61 = vsel %vm1019_vm2, %v975_v62, %v1040_v3  ;;  %v1166_v53 = vrot.slane %v8199_v21, 6  ;;  %v204_v58 = vmul.f32 %v7956_v46, %v8284_v35 }
 0x11c   :  { %997 = vst.msk [vmem:[%s9257_s13 + $0x88] sm:$0xff] %vm979_vm1, %v975_v62  ;;  %v8319_v8 = vpack.c.bf16 %v1061_v61, %v1061_v61  ;;  %v209_v62 = vmul.f32 %v7956_v46, %v121_v32 }
 0x11d   :  { %1208 = vst.msk [vmem:[#allocation2 + $0x14] sm:$0x1] %vm1120_vm15, %v1204_v0  ;;  %v402_v63 = vadd.f32 %v381_v50, %v204_v58 }
 0x11e   :  { %1232 = vst.msk [vmem:[#allocation2 + $0x34] sm:$0xe] %vm1143_vm6, %v1230_v7  ;;  %v6218_v19 = vrot.slane %v8319_v8, 9  ;;  %v298_v24 = vpop.permute.xlu0 %297  ;;  %v318_v23 = vpop.permute.xlu1 %317  ;;  %v213_v7 = vmul.f32 %v7956_v46, %v141_v34 }
 0x11f   :  { %v386_v52 = vmul.f32 %v7945_v43, %v298_v24  ;;  %v390_v32 = vmul.f32 %v7945_v43, %v318_v23 }
 0x120   :  { %1252 = vst.msk [vmem:[#allocation2 + $0x38] sm:$0x7] %vm1076_vm0, %v6218_v19 }
 0x121   :  { %v407_v2 = vadd.f32 %v386_v52, %v209_v62 }
 0x122   :  { %v450_v27 = vpop.permute.xlu0 %449  ;;  %v837_v15 = vpop.permute.xlu1 %836 }
 0x123   :  { %v917_v18 = vmul.f32 %v7986_v60, %v837_v15  ;;  %v558_v26 = vmul.f32 %v7961_v47, %v450_v27  ;;  %v411_v27 = vadd.f32 %v390_v32, %v213_v7 }
 0x125   :  { %v938_v11 = vadd.f32 %v917_v18, %v762_v12  ;;  %v7163_v28 = vld [vmem:[#allocation2 + $0x30] sm:$0xff]   ;;  %v579_v59 = vadd.f32 %v558_v26, %v402_v63 }
 0x126   :  { %v475_v20 = vpop.permute.xlu0 %474  ;;  %v495_v31 = vpop.permute.xlu1 %494  ;;  %7035 = vmatprep.mubr.msk.bf16.mxu0 %vm979_vm1, %v7163_v28 }
 0x127   :  { %v965_v33 = vadd.f32 %v7999_v6, %v938_v11  ;;  %v7164_v57 = vld [vmem:[#allocation2 + $0x38] ss:$0 sps:$4 sm:$0x77]   ;;  %v563_v0 = vmul.f32 %v7961_v47, %v475_v20  ;;  %v567_v10 = vmul.f32 %v7961_v47, %v495_v31 }
 0x128   :  { %7036 = vmatmul.mubr.msk.bf16.gmra.mxu0 %vm979_vm1, %v7164_v57 }
 0x129   :  { %987 = vst.msk [vmem:[%s9257_s13 + $0x38] sm:$0xff] %vm979_vm1, %v965_v33  ;;  %vm1009_vm8 = vcmp.ge.f32.partialorder %v965_v33, 0.0  ;;  %v1030_v36 = vmul.f32 0.01, %v965_v33  ;;  %v584_v61 = vadd.f32 %v563_v0, %v407_v2  ;;  %v588_v23 = vadd.f32 %v567_v10, %v411_v27 }
 0x12a   :  { %v176_v56 = vpop.permute.xlu0 %175  ;;  %v353_v42 = vpop.permute.xlu1 %352  ;;  %v6216_v10 = vrot.slane %v8314_v22, 10 }
 0x12b   :  { %v1051_v37 = vsel %vm1009_vm8, %v965_v33, %v1030_v36  ;;  %v220_v11 = vmul.f32 %v7956_v46, %v176_v56  ;;  %v397_v20 = vmul.f32 %v7945_v43, %v353_v42 }
 0x12c   :  { %v6858_v38 = vpack.c.bf16 %v1051_v37, %v1051_v37 }
 0x12e   :  { %v1158_v40 = vrot.slane %v6858_v38, 6  ;;  %v626_v9 = vpop.permute.xlu0 %625  ;;  %v651_v44 = vpop.permute.xlu1 %650 }
 0x12f   :  { %v734_v3 = vmul.f32 %v7971_v51, %v626_v9  ;;  %v739_v35 = vmul.f32 %v7971_v51, %v651_v44 }
 0x130   :  { %v1159_v54 = vsel %vm8337_vm9, %v6204_v39, %v1158_v40  ;;  %v1165_v49 = vrot.slane %v1158_v40, 4  ;;  %v418_v39 = vadd.f32 %v397_v20, %v220_v11  ;;  %v8430_v20 = vld [vmem:[%s9271_s21 + $0x3] ss:$0 sm:$0xff] }
 0x131   :  { %1161 = vst.msk [vmem:[#allocation2 + $0x48] sm:$0xe] %vm1143_vm6, %v1159_v54  ;;  %v755_v24 = vadd.f32 %v734_v3, %v579_v59  ;;  %v760_v25 = vadd.f32 %v739_v35, %v584_v61  ;;  %v8401_v61 = vld [vmem:[%s9271_s21 + $0x1] ss:$0 sm:$0xff] }
 0x132   :  { %v1167_v41 = vsel %vm8337_vm9, %v1165_v49, %v1166_v53  ;;  %v671_v4 = vpop.permute.xlu0 %670  ;;  %v530_v21 = vpop.permute.xlu1 %529 }
 0x133   :  { %1169 = vst.msk [vmem:[#allocation2 + $0xc] sm:$0x7] %vm1076_vm0, %v1167_v41  ;;  %v743_v15 = vmul.f32 %v7971_v51, %v671_v4  ;;  %v574_v37 = vmul.f32 %v7961_v47, %v530_v21 }
 0x135   :  { %v764_v36 = vadd.f32 %v743_v15, %v588_v23  ;;  %v595_v54 = vadd.f32 %v574_v37, %v418_v39  ;;  %v7185_v23 = vld [vmem:[%s9270_s23 + $0x40] sm:$0xff]  }
 0x136   :  { %v802_v16 = vpop.permute.xlu0 %801  ;;  %v827_v19 = vpop.permute.xlu1 %826 }
 0x137   :  { %v910_v48 = vmul.f32 %v7986_v60, %v802_v16  ;;  %v915_v13 = vmul.f32 %v7986_v60, %v827_v19  ;;  %v7180_v16 = vld [vmem:[%s9270_s23 + $0x30] sm:$0xff]   ;;  %v8412_v19 = vld [vmem:[%s9271_s21] ss:$0 sm:$0xff]  ;;  %s7546_s23 = smov [#allocation8]  }
 0x139   :  { %v931_v12 = vadd.f32 %v910_v48, %v755_v24  ;;  %v936_v18 = vadd.f32 %v915_v13, %v760_v25  ;;  %v8418_v25 = vld [vmem:[%s9271_s21 + $0x2] ss:$0 sm:$0xff] }
 0x13a   :  { %v847_v28 = vpop.permute.xlu0 %846  ;;  %v166_v34 = vpop.permute.xlu1 %165 }
 0x13b   :  { %v958_v31 = vadd.f32 %v7999_v6, %v931_v12  ;;  %v963_v33 = vadd.f32 %v7999_v6, %v936_v18  ;;  %v919_v57 = vmul.f32 %v7986_v60, %v847_v28  ;;  %v218_v24 = vmul.f32 %v8412_v19, %v166_v34 }
 0x13c   :  { %v1245_v12 = vrot.slane %v8319_v8, 6 }
 0x13d   :  { %980 = vst.msk [vmem:[%s9257_s13] sm:$0xff] %vm979_vm1, %v958_v31  ;;  %vm1002_vm11 = vcmp.ge.f32.partialorder %v958_v31, 0.0  ;;  %v1023_v46 = vmul.f32 0.01, %v958_v31  ;;  %985 = vst.msk [vmem:[%s9257_s13 + $0x28] sm:$0xff] %vm979_vm1, %v963_v33  ;;  %vm1007_vm12 = vcmp.ge.f32.partialorder %v963_v33, 0.0  ;;  %v940_v56 = vadd.f32 %v919_v57, %v764_v36 }
 0x13e   :  { %v1028_v43 = vmul.f32 0.01, %v963_v33  ;;  %v343_v42 = vpop.permute.xlu0 %342  ;;  %v706_v38 = vpop.permute.xlu1 %705 }
 0x13f   :  { %v1044_v40 = vsel %vm1002_vm11, %v958_v31, %v1023_v46  ;;  %v750_v9 = vmul.f32 %v7971_v51, %v706_v38  ;;  %v967_v53 = vadd.f32 %v7999_v6, %v940_v56  ;;  %vm1968_vm11 = vcmask 517120  }
 0x140   :  { %v1049_v47 = vsel %vm1007_vm12, %v963_v33, %v1028_v43  ;;  %v1065_v44 = vpack.c.bf16 %v8055_v45, %v1044_v40  ;;  %v6851_v50 = vpack.c.bf16 %v1044_v40, %v1044_v40 }
 0x141   :  { %v6856_v52 = vpack.c.bf16 %v1049_v47, %v1049_v47  ;;  %989 = vst.msk [vmem:[%s9257_s13 + $0x48] sm:$0xff] %vm979_vm1, %v967_v53  ;;  %vm1011_vm13 = vcmp.ge.f32.partialorder %v967_v53, 0.0  ;;  %v1032_v51 = vmul.f32 0.01, %v967_v53  ;;  %v771_v58 = vadd.f32 %v750_v9, %v595_v54 }
 0x142   :  { %1081 = vst.msk [vmem:[#allocation2 + $0x40] sm:$0x7] %vm1076_vm0, %v1065_v44  ;;  %v520_v45 = vpop.permute.xlu0 %519  ;;  %v882_v49 = vpop.permute.xlu1 %881 }
 0x143   :  { %1090 = vst.msk [vmem:[#allocation2] sm:$0x8] %vm1089_vm4, %v6851_v50  ;;  %v926_v62 = vmul.f32 %v7986_v60, %v882_v49  ;;  %v1053_v26 = vsel %vm1011_vm13, %v967_v53, %v1032_v51  ;;  %v572_v48 = vmul.f32 %v8418_v25, %v520_v45 }
 0x144   :  { %1142 = vst.msk [vmem:[#allocation2 + $0x48] sm:$0x1] %vm1120_vm15, %v6856_v52  ;;  %v6860_v0 = vpack.c.bf16 %v1053_v26, %v1053_v26 }
 0x145   :  { %1144 = vst.msk [vmem:[#allocation2 + $0x8] sm:$0xe] %vm1143_vm6, %v6856_v52  ;;  %v947_v41 = vadd.f32 %v926_v62, %v771_v58  ;;  %v8457_v52 = vld [vmem:[%s9251_s7] ss:$0 sm:$0xff] }
 0x146   :  { %v186_v4 = vpop.permute.xlu0 %185  ;;  %v191_v21 = vpop.permute.xlu1 %190  ;;  %1177 = vst.msk [vmem:[#allocation2 + $0x4c] sm:$0x7] %vm1076_vm0, %v6860_v0 }
 0x147   :  { %1182 = vst.msk [vmem:[#allocation2 + $0xc] sm:$0x8] %vm1089_vm4, %v6860_v0  ;;  %v974_v63 = vadd.f32 %v7999_v6, %v947_v41  ;;  %v395_v6 = vmul.f32 %v8401_v61, %v343_v42  ;;  %v222_v56 = vmul.f32 %v8412_v19, %v186_v4  ;;  %v223_v42 = vmul.f32 %v8412_v19, %v191_v21 }
 0x149   :  { %996 = vst.msk [vmem:[%s9257_s13 + $0x80] sm:$0xff] %vm979_vm1, %v974_v63  ;;  %vm1018_vm2 = vcmp.ge.f32.partialorder %v974_v63, 0.0  ;;  %v1039_v2 = vmul.f32 0.01, %v974_v63  ;;  %v7170_v32 = vld [vmem:[#allocation2 + $0x40] sm:$0xff]   ;;  %v416_v11 = vadd.f32 %v395_v6, %v218_v24 }
 0x14a   :  { %v7168_v3 = vld [vmem:[#allocation2] sm:$0xff]   ;;  %v363_v60 = vpop.permute.xlu0 %362  ;;  %v368_v35 = vpop.permute.xlu1 %367  ;;  %7055 = vmatprep.mubr.msk.bf16.mxu0 %vm979_vm1, %v7170_v32 }
 0x14b   :  { %v1060_v59 = vsel %vm1018_vm2, %v974_v63, %v1039_v2  ;;  %7043 = vmatprep.mubr.msk.bf16.mxu1 %vm979_vm1, %v7168_v3  ;;  %v593_v8 = vadd.f32 %v572_v48, %v416_v11  ;;  %v399_v36 = vmul.f32 %v8401_v61, %v363_v60  ;;  %v400_v46 = vmul.f32 %v8401_v61, %v368_v35 }
 0x14c   :  { %v6867_v7 = vpack.c.bf16 %v1060_v59, %v1060_v59  ;;  %vm1926_vm2 = vcmask 521216  }
 0x14d   :  { %v7172_v18 = vld [vmem:[#allocation2 + $0x48] sm:$0xff]   ;;  %v420_v47 = vadd.f32 %v399_v36, %v222_v56  ;;  %v421_v50 = vadd.f32 %v400_v46, %v223_v42 }
 0x14e   :  { %v1238_v13 = vrot.slane %v6867_v7, 6  ;;  %v696_v22 = vpop.permute.xlu0 %695  ;;  %v540_v27 = vpop.permute.xlu1 %539  ;;  %v7171_v15 = vld [vmem:[#allocation2 + $0x8] sm:$0xff]   ;;  %7056 = vmatmul.mubr.msk.bf16.vlgmr.msra.gmra.mxu0 %vm979_vm1, %v7172_v18 }
 0x14f   :  { %v748_v31 = vmul.f32 %v8430_v20, %v696_v22  ;;  %7044 = vmatmul.mubr.msk.bf16.vlgmr.msra.gmra.mxu1 %vm979_vm1, %v7171_v15  ;;  %7076 = vmatpush3.bf16.msra.mxu0 %v8236_v5  ;;  %v576_v5 = vmul.f32 %v8418_v25, %v540_v27  ;;  %v7177_v27 = vld [vmem:[#allocation2] sm:$0xf8]  }
 0x150   :  { %v1239_v28 = vsel %vm8337_vm9, %v6216_v10, %v1238_v13  ;;  %v1244_v34 = vrot.slane %v1238_v13, 4  ;;  %7064 = vmatpush3.bf16.msra.mxu1 %v8197_v30  ;;  %7077 = vmatprep.subr.bf16.mxu0 %v7185_v23  ;;  %v8446_v30 = vld [vmem:[%s9271_s21 + $0x4] ss:$0 sm:$0xff]  ;;  %v1669_v46 = vrot.slane %v7177_v27, 3 }
 0x151   :  { %1241 = vst.msk [vmem:[#allocation2 + $0x54] sm:$0xe] %vm1143_vm6, %v1239_v28  ;;  %7065 = vmatprep.subr.bf16.mxu1 %v7180_v16  ;;  %v769_v43 = vadd.f32 %v748_v31, %v593_v8  ;;  %v597_v51 = vadd.f32 %v576_v5, %v420_v47  ;;  %v7183_v5 = vld [vmem:[#allocation2 + $0x20] sm:$0xf8]  }
 0x152   :  { %v1246_v33 = vsel %vm8337_vm9, %v1244_v34, %v1245_v12  ;;  %v545_v57 = vpop.permute.xlu0 %544  ;;  %v872_v37 = vpop.permute.xlu1 %871  ;;  %v1804_v47 = vrot.slane %v7183_v5, 3 }
 0x153   :  { %1248 = vst.msk [vmem:[#allocation2 + $0x18] sm:$0x7] %vm1076_vm0, %v1246_v33  ;;  %v924_v14 = vmul.f32 %v8446_v30, %v872_v37  ;;  %v577_v38 = vmul.f32 %v8418_v25, %v545_v57  ;;  %7078 = vmatpush3.bf16.msra.mxu0 %v7185_v23 }
 0x154   :  { %7066 = vmatpush3.bf16.msra.mxu1 %v7180_v16  ;;  %v7178_v16 = vld [vmem:[#allocation2 + $0x8] sm:$0xff]  }
 0x155   :  { %v945_v39 = vadd.f32 %v924_v14, %v769_v43  ;;  %v598_v45 = vadd.f32 %v577_v38, %v421_v50  ;;  %v1670_v18 = vrot.slane %v7178_v16, 3  ;;  %v7187_v50 = vld [vmem:[#allocation2 + $0x30] sm:$0xff]   ;;  %v8552_v16 = vld [vmem:[%s9247_s3 + $0x58] sm:$0xff]  }
 0x156   :  { %v716_v40 = vpop.permute.xlu0 %715  ;;  %v721_v44 = vpop.permute.xlu1 %720 }
 0x157   :  { %v752_v9 = vmul.f32 %v8430_v20, %v716_v40  ;;  %v972_v53 = vadd.f32 %v8457_v52, %v945_v39  ;;  %v753_v54 = vmul.f32 %v8430_v20, %v721_v44 }
 0x159   :  { %994 = vst.msk [vmem:[%s9257_s13 + $0x70] sm:$0xff] %vm979_vm1, %v972_v53  ;;  %vm1016_vm8 = vcmp.ge.f32.partialorder %v972_v53, 0.0  ;;  %v1037_v49 = vmul.f32 0.01, %v972_v53  ;;  %v773_v62 = vadd.f32 %v752_v9, %v597_v51  ;;  %v774_v4 = vadd.f32 %v753_v54, %v598_v45 }
 0x15a   :  { %v892_v58 = vpop.permute.xlu0 %891  ;;  %v897_v0 = vpop.permute.xlu1 %896  ;;  %v7176_v31 = vld [vmem:[#allocation2 + $0x18] ss:$0 sps:$4 sm:$0x77]  }
 0x15b   :  { %v928_v26 = vmul.f32 %v8446_v30, %v892_v58  ;;  %v1058_v41 = vsel %vm1016_vm8, %v972_v53, %v1037_v49  ;;  %v929_v21 = vmul.f32 %v8446_v30, %v897_v0 }
 0x15c   :  { %v1072_v63 = vpack.c.bf16 %v8304_v29, %v1058_v41  ;;  %v6865_v2 = vpack.c.bf16 %v1058_v41, %v1058_v41 }
 0x15d   :  { %v949_v3 = vadd.f32 %v928_v26, %v773_v62  ;;  %v950_v60 = vadd.f32 %v929_v21, %v774_v4  ;;  %v1807_v62 = vrot.slane %v7187_v50, 3 }
 0x15e   :  { %v196_v35 = vpop.permute.xlu0 %195  ;;  %1226 = vst.msk [vmem:[#allocation2 + $0x54] sm:$0x1] %vm1120_vm15, %v6865_v2  ;;  %v373_v6 = vpop.permute.xlu1 %372  ;;  %v7190_v2 = vld [vmem:[%s9247_s3 + $0x10] sm:$0xff]  }
 0x15f   :  { %1227 = vst.msk [vmem:[#allocation2 + $0x14] sm:$0xe] %vm1143_vm6, %v1072_v63  ;;  %v976_v32 = vadd.f32 %v8457_v52, %v949_v3  ;;  %v224_v59 = vmul.f32 %v8412_v19, %v196_v35  ;;  %v977_v7 = vadd.f32 %v8457_v52, %v950_v60  ;;  %v401_v10 = vmul.f32 %v8401_v61, %v373_v6  ;;  %v7189_v63 = vld [vmem:[%s9247_s3 + $0x18] sm:$0xff]   ;;  %v7191_v3 = vld [vmem:[%s9247_s3 + $0x8] sm:$0xff]   ;;  %v7193_v35 = vld [vmem:[%s9247_s3] sm:$0xff]  }
 0x160   :  { %vm1668_vm6 = vcmask 1044480   ;;  %7099 = vmatprep.subr.bf16.mxu0 %v7189_v63  ;;  %v7192_v60 = vld [vmem:[%s9247_s3 + $0x38] sm:$0xff]   ;;  %v7197_v6 = vld [vmem:[%s9247_s3 + $0x28] sm:$0xff]  }
 0x161   :  { %998 = vst.msk [vmem:[%s9257_s13 + $0x90] sm:$0xff] %vm979_vm1, %v976_v32  ;;  %vm1020_vm7 = vcmp.ge.f32.partialorder %v976_v32, 0.0  ;;  %v1041_v29 = vmul.f32 0.01, %v976_v32  ;;  %999 = vst.msk [vmem:[%s9257_s13 + $0x98] sm:$0xff] %vm979_vm1, %v977_v7  ;;  %vm1021_vm15 = vcmp.ge.f32.partialorder %v977_v7, 0.0  ;;  %v422_v13 = vadd.f32 %v401_v10, %v224_v59  ;;  %7087 = vmatprep.subr.bf16.mxu1 %v7192_v60 }
 0x162   :  { %v1042_v19 = vmul.f32 0.01, %v977_v7  ;;  %v550_v24 = vpop.permute.xlu0 %549  ;;  %v726_v22 = vpop.permute.xlu1 %725  ;;  %v1671_v56 = vsel %vm1668_vm6, %v1669_v46, %v1670_v18  ;;  %v8540_v59 = vld [vmem:[%s9247_s3 + $0x78] sm:$0xff]  }
 0x163   :  { %v1062_v48 = vsel %vm1020_vm7, %v976_v32, %v1041_v29  ;;  %v578_v61 = vmul.f32 %v8418_v25, %v550_v24  ;;  %v754_v34 = vmul.f32 %v8430_v20, %v726_v22  ;;  %v7184_v20 = vld [vmem:[#allocation2 + $0x28] sm:$0xff]   ;;  %v7194_v32 = vld [vmem:[%s9247_s3 + $0x30] sm:$0xff]   ;;  %vm1993_vm7 = vcmask 519170  }
 0x164   :  { %v6869_v15 = vpack.c.bf16 %v1062_v48, %v1062_v48  ;;  %v1063_v12 = vsel %vm1021_vm15, %v977_v7, %v1042_v19  ;;  %v1805_v38 = vrot.slane %v7184_v20, 3  ;;  %v7200_v7 = vld [vmem:[%s9247_s3 + $0x20] sm:$0xff]   ;;  %vm1995_vm15 = vcmask 516096  }
 0x165   :  { %v1074_v23 = vpack.c.bf16 %v1063_v12, %v1062_v48  ;;  %v6870_v11 = vpack.c.bf16 %v1063_v12, %v1063_v12  ;;  %v599_v28 = vadd.f32 %v578_v61, %v422_v13  ;;  %v7174_v37 = vld [vmem:[#allocation2 + $0x50] sm:$0xff]  }
 0x166   :  { %1261 = vst.msk [vmem:[#allocation2 + $0x18] sm:$0x8] %vm1089_vm4, %v6869_v15  ;;  %v902_v8 = vpop.permute.xlu0 %901  ;;  %v7173_v33 = vld [vmem:[#allocation2 + $0x10] sm:$0xff]   ;;  %7059 = vmatprep.mubr.msk.bf16.mxu0 %vm979_vm1, %v7174_v37  ;;  %v1808_v0 = vsel %vm1668_vm6, %v1805_v38, %v1807_v62 }
 0x167   :  { %1253 = vst.msk [vmem:[#allocation2 + $0x58] sm:$0x7] %vm1076_vm0, %v1074_v23  ;;  %v1266_v25 = vrot.slane %v6870_v11, 7  ;;  %v775_v57 = vadd.f32 %v754_v34, %v599_v28  ;;  %v930_v36 = vmul.f32 %v8446_v30, %v902_v8  ;;  %7047 = vmatprep.mubr.msk.bf16.mxu1 %vm979_vm1, %v7173_v33  ;;  %v7182_v43 = vld [vmem:[#allocation2 + $0x10] sm:$0xff]  }
 0x168   :  { %1262 = vst.msk [vmem:[#allocation2 + $0x1c] sm:$0x3] %vm1000_vm3, %v6870_v11  ;;  %7048 = vmatmul.mubr.msk.bf16.gmra.mxu1 %vm979_vm1, %v7176_v31  ;;  %v1672_v42 = vrot.slane %v7182_v43, 3 }
 0x169   :  { %1272 = vst.msk [vmem:[#allocation2 + $0x38] sm:$0x8] %vm1089_vm4, %v1266_v25  ;;  %v951_v14 = vadd.f32 %v930_v36, %v775_v57  ;;  %7067 = vmatprep.mubr.msk.bf16.mxu1 %vm979_vm1, %v1671_v56  ;;  %v1267_v45 = vrot.slane %v1266_v25, 4  ;;  %vm1966_vm4 = vcmask 519171  }
 0x16a   :  { %v1673_v54 = vsel %vm1668_vm6, %v1670_v18, %v1672_v42 }
 0x16b   :  { %v978_v30 = vadd.f32 %v8457_v52, %v951_v14  ;;  %v1806_v52 = vsel %vm1668_vm6, %v1804_v47, %v1805_v38 }
 0x16d   :  { %1001 = vst.msk [vmem:[%s9257_s13 + $0xa0] sm:$0x3] %vm1000_vm3, %v978_v30  ;;  %vm1022_vm0 = vcmp.ge.f32.partialorder %v978_v30, 0.0  ;;  %v1043_v39 = vmul.f32 0.01, %v978_v30 }
 0x16e   :  { %v7181_v40 = vld [vmem:[#allocation2 + $0x58] ss:$0 sps:$4 sm:$0x77]  }
 0x16f   :  { %v1064_v9 = vsel %vm1022_vm0, %v978_v30, %v1043_v39  ;;  %v7186_v44 = vld [vmem:[#allocation2 + $0x18] sm:$0x3f]   ;;  %7060 = vmatmul.mubr.msk.bf16.gmra.mxu0 %vm979_vm1, %v7181_v40 }
 0x170   :  { %v6871_v53 = vpack.c.bf16 %v1064_v9, %v1064_v9  ;;  %7068 = vmatmul.mubr.msk.bf16.vlgmr.msra.gmra.mxu1 %vm979_vm1, %v1673_v54  ;;  %7079 = vmatprep.mubr.msk.bf16.mxu0 %vm979_vm1, %v1806_v52  ;;  %v1674_v51 = vrot.slane %v7186_v44, 3  ;;  %v8558_v9 = vld [vmem:[%s9252_s8] ss:$0 sm:$0xff] }
 0x171   :  { %7088 = vmatpush3.bf16.msra.mxu1 %v7192_v60 }
 0x172   :  { %v1268_v49 = vrot.slane %v6871_v53, 7  ;;  %v1675_v58 = vsel %vm1668_vm6, %v1672_v42, %v1674_v51  ;;  %7089 = vmatprep.subr.bf16.mxu1 %v7194_v32 }
 0x173   :  { %7071 = vmatprep.mubr.msk.bf16.mxu1 %vm979_vm1, %v1675_v58 }
 0x174   :  { %v1269_v26 = vsel %vm8093_vm10, %v1267_v45, %v1268_v49 }
 0x175   :  { %1273 = vst.msk [vmem:[#allocation2 + $0x3c] sm:$0x3] %vm1000_vm3, %v1269_v26  ;;  %vm1953_vm3 = vcmask 518144   ;;  %7090 = vmatpush3.bf16.msra.mxu1 %v7194_v32 }
 0x176   :  { %1954 = vst.msk [vmem:[#allocation3] sm:$0x7] %vm1953_vm3, %v7544_v1  ;;  %1956 = vst.msk [vmem:[#allocation3 + $0xc] sm:$0x7] %vm1953_vm3, %v7544_v1  ;;  %7091 = vmatprep.subr.bf16.mxu1 %v7197_v6 }
 0x177   :  { %7080 = vmatmul.mubr.msk.bf16.vlgmr.msra.gmra.mxu0 %vm979_vm1, %v1808_v0 }
 0x178   :  { %7072 = vmatmul.mubr.msk.bf16.gmra.mxu1 %vm979_vm1, %v1674_v51  ;;  %7100 = vmatpush3.bf16.msra.mxu0 %v7189_v63 }
 0x179   :  { %7101 = vmatprep.subr.bf16.mxu0 %v7190_v2  ;;  %7092 = vmatpush3.bf16.msra.mxu1 %v7197_v6 }
 0x17a   :  { %7093 = vmatprep.subr.bf16.mxu1 %v7200_v7 }
 0x17c   :  { %v7188_v41 = vld [vmem:[#allocation2 + $0x38] sm:$0x3f]   ;;  %7102 = vmatpush3.bf16.msra.mxu0 %v7190_v2 }
 0x17d   :  { %v1809_v4 = vrot.slane %v7188_v41, 3  ;;  %7103 = vmatprep.subr.bf16.mxu0 %v7191_v3  ;;  %7094 = vmatpush3.bf16.msra.mxu1 %v7200_v7 }
 0x17e   :  { %7111 = vmatprep.subr.bf16.mxu1 %v8552_v16 }
 0x17f   :  { %v1810_v21 = vsel %vm1668_vm6, %v1807_v62, %v1809_v4 }
 0x180   :  { %7083 = vmatprep.mubr.msk.bf16.mxu0 %vm979_vm1, %v1810_v21  ;;  %7104 = vmatpush3.bf16.msra.mxu0 %v7191_v3 }
 0x181   :  { %7084 = vmatmul.mubr.msk.bf16.gmra.mxu0 %vm979_vm1, %v1809_v4  ;;  %7105 = vmatprep.subr.bf16.mxu0 %v7193_v35  ;;  %vm1919_vm1 = vcmask 523264  }
 0x184   :  { %7106 = vmatpush3.bf16.msra.mxu0 %v7193_v35 }
 0x185   :  { %7123 = vmatprep.subr.bf16.mxu0 %v8540_v59 }
 0x1bc   :  { %v7033_v10 = vpop.f32.mrf.mxu0 }
 0x1be   :  { %v1374_v29 = vpop.f32.mrf.mxu0 }
 0x1c0   :  { %v7034_v19 = vpop.f32.mrf.mxu0 }
 0x1c2   :  { %v1377_v24 = vpop.f32.mrf.mxu0 }
 0x1e8   :  { %v7037_v48 = vpop.f32.mrf.mxu0 }
 0x1ea   :  { %v1390_v13 = vpop.f32.mrf.mxu0 }
 0x1ec   :  { %v7038_v61 = vpop.f32.mrf.mxu0 }
 0x1ee   :  { %v1393_v15 = vpop.f32.mrf.mxu0 }
 0x20e   :  { %v7057_v12 = vpop.f32.mrf.mxu0 }
 0x20f   :  { %v7045_v22 = vpop.f32.mrf.mxu1 }
 0x210   :  { %v1598_v23 = vpop.f32.mrf.mxu0  ;;  %v1489_v36 = vadd.f32 %v7045_v22, %v7033_v10 }
 0x211   :  { %v1480_v27 = vpop.f32.mrf.mxu1 }
 0x212   :  { %v7058_v34 = vpop.f32.mrf.mxu0  ;;  %v1481_v43 = vadd.f32 %v1480_v27, %v1374_v29  ;;  %v1630_v56 = vadd.f32 %v7057_v12, %v1489_v36 }
 0x213   :  { %v7046_v18 = vpop.f32.mrf.mxu1 }
 0x214   :  { %v1601_v33 = vpop.f32.mrf.mxu0  ;;  %v1492_v5 = vadd.f32 %v7046_v18, %v7034_v19  ;;  %v1628_v38 = vadd.f32 %v1598_v23, %v1481_v43 }
 0x215   :  { %v1483_v11 = vpop.f32.mrf.mxu1 }
 0x216   :  { %v1484_v47 = vadd.f32 %v1483_v11, %v1377_v24  ;;  %v1631_v50 = vadd.f32 %v7058_v34, %v1492_v5 }
 0x218   :  { %v1629_v26 = vadd.f32 %v1601_v33, %v1484_v47 }
 0x228   :  { %v7049_v28 = vpop.f32.mrf.mxu1 }
 0x229   :  { %v1505_v0 = vadd.f32 %v7049_v28, %v7037_v48 }
 0x22a   :  { %v1496_v31 = vpop.f32.mrf.mxu1 }
 0x22b   :  { %v1497_v3 = vadd.f32 %v1496_v31, %v1390_v13 }
 0x22c   :  { %v7050_v8 = vpop.f32.mrf.mxu1 }
 0x22e   :  { %v1499_v25 = vpop.f32.mrf.mxu1 }
 0x22f   :  { %v7061_v57 = vpop.f32.mrf.mxu0  ;;  %v1500_v29 = vadd.f32 %v1499_v25, %v1393_v15 }
 0x230   :  { %v7069_v37 = vpop.f32.mrf.mxu1  ;;  %v1634_v60 = vadd.f32 %v7061_v57, %v1505_v0 }
 0x231   :  { %v1614_v46 = vpop.f32.mrf.mxu0  ;;  %v1766_v39 = vadd.f32 %v7069_v37, %v1630_v56 }
 0x232   :  { %v1734_v20 = vpop.f32.mrf.mxu1  ;;  %v1632_v19 = vadd.f32 %v1614_v46, %v1497_v3 }
 0x233   :  { %v7062_v14 = vpop.f32.mrf.mxu0  ;;  %v1764_v53 = vadd.f32 %v1734_v20, %v1628_v38 }
 0x234   :  { %v7070_v30 = vpop.f32.mrf.mxu1 }
 0x235   :  { %v1617_v42 = vpop.f32.mrf.mxu0  ;;  %v1767_v45 = vadd.f32 %v7070_v30, %v1631_v50 }
 0x236   :  { %v1737_v40 = vpop.f32.mrf.mxu1  ;;  %v1633_v11 = vadd.f32 %v1617_v42, %v1500_v29 }
 0x237   :  { %v7081_v44 = vpop.f32.mrf.mxu0  ;;  %v1765_v35 = vadd.f32 %v1737_v40, %v1629_v26 }
 0x238   :  { %v1901_v54 = vadd.f32 %v7081_v44, %v1766_v39  ;;  %v7073_v52 = vpop.f32.mrf.mxu1 }
 0x239   :  { %v1869_v51 = vpop.f32.mrf.mxu0  ;;  %v1770_v61 = vadd.f32 %v7073_v52, %v1634_v60 }
 0x23a   :  { %v1914_v49 = vadd.f32 %v8558_v9, %v1901_v54  ;;  %v1899_v58 = vadd.f32 %v1869_v51, %v1764_v53  ;;  %v1750_v62 = vpop.f32.mrf.mxu1 }
 0x23b   :  { %v7082_v41 = vpop.f32.mrf.mxu0  ;;  %v1768_v28 = vadd.f32 %v1750_v62, %v1632_v19 }
 0x23c   :  { %1922 = vst.msk [vmem:[#allocation8 + $0x10] sm:$0xff] %vm1919_vm1, %v1914_v49  ;;  %vm1930_vm9 = vcmp.ge.f32.partialorder %v1914_v49, 0.0  ;;  %v1937_v4 = vmul.f32 0.01, %v1914_v49  ;;  %v1912_v21 = vadd.f32 %v8558_v9, %v1899_v58  ;;  %v1902_v63 = vadd.f32 %v7082_v41, %v1767_v45  ;;  %v7074_v2 = vpop.f32.mrf.mxu1 }
 0x23d   :  { %v1872_v32 = vpop.f32.mrf.mxu0 }
 0x23e   :  { %v1944_v6 = vsel %vm1930_vm9, %v1914_v49, %v1937_v4  ;;  %1920 = vst.msk [vmem:[#allocation8] sm:$0xff] %vm1919_vm1, %v1912_v21  ;;  %vm1928_vm12 = vcmp.ge.f32.partialorder %v1912_v21, 0.0  ;;  %v1935_v7 = vmul.f32 0.01, %v1912_v21  ;;  %v1915_v10 = vadd.f32 %v8558_v9, %v1902_v63  ;;  %v1753_v31 = vpop.f32.mrf.mxu1  ;;  %v7199_v63 = vld [vmem:[%s9247_s3 + $0x70] sm:$0xff]  }
 0x23f   :  { %v6874_v24 = vpack.c.bf16 %v1944_v6, %v1944_v6  ;;  %v1900_v48 = vadd.f32 %v1872_v32, %v1765_v35  ;;  %v1769_v20 = vadd.f32 %v1753_v31, %v1633_v11  ;;  %v7217_v31 = vld [vmem:[%s9247_s3 + $0x88] sm:$0xff]  }
 0x240   :  { %v1942_v22 = vsel %vm1928_vm12, %v1912_v21, %v1935_v7  ;;  %1923 = vst.msk [vmem:[#allocation8 + $0x18] sm:$0xff] %vm1919_vm1, %v1915_v10  ;;  %vm1931_vm13 = vcmp.ge.f32.partialorder %v1915_v10, 0.0  ;;  %v1938_v13 = vmul.f32 0.01, %v1915_v10 }
 0x241   :  { %v1981_v27 = vrot.slane %v6874_v24, 6  ;;  %v6872_v12 = vpack.c.bf16 %v1942_v22, %v1942_v22  ;;  %v1913_v18 = vadd.f32 %v8558_v9, %v1900_v48  ;;  %v7085_v23 = vpop.f32.mrf.mxu0  ;;  %v1975_v44 = vrot.slane %v6874_v24, 7 }
 0x242   :  { %v1945_v34 = vsel %vm1931_vm13, %v1915_v10, %v1938_v13  ;;  %v1905_v15 = vadd.f32 %v7085_v23, %v1770_v61  ;;  %v7206_v10 = vld [vmem:[%s9247_s3 + $0x60] sm:$0xff]   ;;  %v7210_v61 = vld [vmem:[%s9247_s3 + $0x48] sm:$0xff]  }
 0x243   :  { %v1982_v8 = vrot.slane %v1981_v27, 4  ;;  %1985 = vst.msk [vmem:[#allocation3 + $0x18] sm:$0x8] %vm1966_vm4, %v1981_v27  ;;  %1967 = vst.msk [vmem:[#allocation3] sm:$0x8] %vm1966_vm4, %v6872_v12  ;;  %v6875_v33 = vpack.c.bf16 %v1945_v34, %v1945_v34  ;;  %vm1929_vm8 = vcmp.ge.f32.partialorder %v1913_v18, 0.0  ;;  %v1885_v57 = vpop.f32.mrf.mxu0 }
 0x244   :  { %1921 = vst.msk [vmem:[#allocation8 + $0x8] sm:$0xff] %vm1919_vm1, %v1913_v18  ;;  %v1936_v25 = vmul.f32 0.01, %v1913_v18  ;;  %v1918_v36 = vadd.f32 %v8558_v9, %v1905_v15  ;;  %v1903_v37 = vadd.f32 %v1885_v57, %v1768_v28  ;;  %v7213_v12 = vld [vmem:[%s9247_s3 + $0x98] sm:$0xff]   ;;  %v7216_v28 = vld [vmem:[%s9247_s3 + $0x90] sm:$0xff]   ;;  %v7218_v15 = vld [vmem:[%s9247_s3 + $0x80] sm:$0xff]  }
 0x245   :  { %v1989_v46 = vrot.slane %v6875_v33, 6  ;;  %1986 = vst.msk [vmem:[#allocation3 + $0x1c] sm:$0x3] %vm1968_vm11, %v1982_v8  ;;  %v7086_v14 = vpop.f32.mrf.mxu0  ;;  %v6294_v49 = vrot.slane %v6875_v33, 9  ;;  %v7219_v8 = vld [vmem:[%s9248_s4 + $0x1e0] ss:$16 sps:$4 sm:$0xff]  }
 0x246   :  { %v1943_v43 = vsel %vm1929_vm8, %v1913_v18, %v1936_v25  ;;  %1927 = vst.msk [vmem:[#allocation8 + $0x30] sm:$0x3f] %vm1926_vm2, %v1918_v36  ;;  %v1916_v42 = vadd.f32 %v8558_v9, %v1903_v37  ;;  %v7221_v33 = vld [vmem:[%s9248_s4 + $0x1e4] ss:$16 sps:$4 sm:$0xff]   ;;  %v7222_v25 = vld [vmem:[%s9248_s4 + $0x1e8] ss:$16 sps:$4 sm:$0xff]  }
 0x247   :  { %v1949_v56 = vpack.c.bf16 %v1943_v43, %v1942_v22  ;;  %v6873_v5 = vpack.c.bf16 %v1943_v43, %v1943_v43  ;;  %v1990_v30 = vrot.slane %v1989_v46, 4  ;;  %1994 = vst.msk [vmem:[#allocation3 + $0x4] sm:$0xc] %vm1993_vm7, %v1989_v46  ;;  %v1888_v38 = vpop.f32.mrf.mxu0  ;;  %v7211_v22 = vld [vmem:[%s9247_s3 + $0x40] sm:$0xff]   ;;  %v7224_v57 = vld [vmem:[%s9248_s4 + $0x1ec] ss:$16 sps:$4 sm:$0xff]  }
 0x248   :  { %v1904_v40 = vadd.f32 %v1888_v38, %v1769_v20  ;;  %1924 = vst.msk [vmem:[#allocation8 + $0x20] sm:$0xff] %vm1919_vm1, %v1916_v42  ;;  %vm1932_vm0 = vcmp.ge.f32.partialorder %v1916_v42, 0.0  ;;  %v1939_v47 = vmul.f32 0.01, %v1916_v42  ;;  %v7225_v36 = vld [vmem:[%s9248_s4 + $0x1c0] ss:$16 sps:$4 sm:$0xff]  }
 0x249   :  { %1958 = vst.msk [vmem:[#allocation3 + $0x18] sm:$0x7] %vm1953_vm3, %v1949_v56  ;;  %v1973_v39 = vrot.slane %v6873_v5, 7  ;;  %v7227_v37 = vld [vmem:[%s9248_s4 + $0x1c4] ss:$16 sps:$4 sm:$0xff]  }
 0x24a   :  { %1969 = vst.msk [vmem:[#allocation3 + $0x4] sm:$0x3] %vm1968_vm11, %v6873_v5  ;;  %v1917_v53 = vadd.f32 %v8558_v9, %v1904_v40  ;;  %v1946_v54 = vsel %vm1932_vm0, %v1916_v42, %v1939_v47  ;;  %v2024_v0 = vld [vmem:[#allocation3] sm:$0xf]  ;;  %v7228_v46 = vld [vmem:[%s9248_s4 + $0x1c8] ss:$16 sps:$4 sm:$0xff]  }
 0x24b   :  { %1996 = vst.msk [vmem:[#allocation3 + $0x8] sm:$0x1] %vm1995_vm15, %v1990_v30  ;;  %v1974_v50 = vrot.slane %v1973_v39, 4  ;;  %v6876_v51 = vpack.c.bf16 %v1946_v54, %v1946_v54  ;;  %v2320_v2 = vld [vmem:[#allocation3] sm:$0x8] }
 0x24c   :  { %1979 = vst.msk [vmem:[#allocation3 + $0xc] sm:$0x8] %vm1966_vm4, %v1973_v39  ;;  %vm1933_vm3 = vcmp.ge.f32.partialorder %v1917_v53, 0.0  ;;  %v1940_v45 = vmul.f32 0.01, %v1917_v53 }
 0x24d   :  { %v1976_v52 = vsel %vm8093_vm10, %v1974_v50, %v1975_v44  ;;  %1925 = vst.msk [vmem:[#allocation8 + $0x28] sm:$0xff] %vm1919_vm1, %v1917_v53  ;;  %v2002_v58 = vrot.slane %v6876_v51, 5  ;;  %v7230_v43 = vld [vmem:[%s9248_s4 + $0x1cc] ss:$16 sps:$4 sm:$0xff]   ;;  %v7233_v20 = vld [vmem:[%s9248_s4 + $0x1a4] ss:$16 sps:$4 sm:$0xff]  }
 0x24e   :  { %1980 = vst.msk [vmem:[#allocation3 + $0x10] sm:$0x3] %vm1968_vm11, %v1976_v52  ;;  %v1947_v62 = vsel %vm1933_vm3, %v1917_v53, %v1940_v45  ;;  %v7231_v14 = vld [vmem:[%s9248_s4 + $0x1a0] ss:$16 sps:$4 sm:$0xff]   ;;  %v7236_v56 = vld [vmem:[%s9248_s4 + $0x1ac] ss:$16 sps:$4 sm:$0xff]  }
 0x24f   :  { %2013 = vst.msk [vmem:[#allocation3 + $0x1c] sm:$0xc] %vm1993_vm7, %v6876_v51  ;;  %v6877_v26 = vpack.c.bf16 %v1947_v62, %v1947_v62  ;;  %v2003_v9 = vsel %vm8130_vm14, %v6294_v49, %v2002_v58  ;;  %v2004_v17 = vrot.slane %v2002_v58, 4  ;;  %v7234_v5 = vld [vmem:[%s9248_s4 + $0x1a8] ss:$16 sps:$4 sm:$0xff]  }
 0x250   :  { %2007 = vst.msk [vmem:[#allocation3 + $0x10] sm:$0xc] %vm1993_vm7, %v2003_v9  ;;  %v7239_v30 = vld [vmem:[%s9248_s4 + $0x184] ss:$16 sps:$4 sm:$0xff]   ;;  %v7242_v42 = vld [vmem:[%s9248_s4 + $0x18c] ss:$16 sps:$4 sm:$0xff]  }
 0x251   :  { %v2025_v41 = vld [vmem:[#allocation3 + $0x4] sm:$0xf]  ;;  %2014 = vst.msk [vmem:[#allocation3 + $0x20] sm:$0x1] %vm1995_vm15, %v6877_v26  ;;  %2008 = vst.msk [vmem:[#allocation3 + $0x14] sm:$0x1] %vm1995_vm15, %v2004_v17 }
 0x252   :  { %v6313_v4 = vcombine.low %v2024_v0, %v2025_v41  ;;  %v7198_v21 = vld [vmem:[#allocation3 + $0x8] ss:$0 sps:$4 sm:$0x11]   ;;  %v6345_v3 = vcombine.low %v2320_v2, %v2025_v41  ;;  %v7237_v38 = vld [vmem:[%s9248_s4 + $0x180] ss:$16 sps:$4 sm:$0xff]  }
 0x253   :  { %v2035_v60 = vld [vmem:[#allocation3 + $0xc] sm:$0xf]  ;;  %v7209_v32 = vld [vmem:[#allocation3 + $0x8] ss:$0 sps:$4 sm:$0xff]   ;;  %v7245_v40 = vld [vmem:[%s9248_s4 + $0x164] ss:$16 sps:$4 sm:$0xff]  }
 0x254   :  { %7107 = vmatprep.mubr.msk.bf16.mxu0 %vm1919_vm1, %v6313_v4  ;;  %v2337_v29 = vrot.slane %v6345_v3, 3  ;;  %v2338_v19 = vrot.slane %v7209_v32, 3  ;;  %v7240_v39 = vld [vmem:[%s9248_s4 + $0x188] ss:$16 sps:$4 sm:$0xff]   ;;  %v7248_v47 = vld [vmem:[%s9248_s4 + $0x16c] ss:$16 sps:$4 sm:$0xff]  }
 0x255   :  { %7108 = vmatmul.mubr.msk.bf16.vlgmr.msra.gmra.mxu0 %vm1919_vm1, %v7198_v21  ;;  %v7243_v44 = vld [vmem:[%s9248_s4 + $0x160] ss:$16 sps:$4 sm:$0xff]   ;;  %v7246_v50 = vld [vmem:[%s9248_s4 + $0x168] ss:$16 sps:$4 sm:$0xff]   ;;  %v7251_v53 = vld [vmem:[%s9248_s4 + $0x144] ss:$16 sps:$4 sm:$0xff]  }
 0x256   :  { %7124 = vmatpush3.bf16.msra.mxu0 %v8540_v59  ;;  %v7207_v59 = vld [vmem:[%s9247_s3 + $0x50] sm:$0xff]   ;;  %v7205_v24 = vld [vmem:[#allocation3 + $0x18] sm:$0xff]   ;;  %v2339_v48 = vsel %vm1668_vm6, %v2337_v29, %v2338_v19  ;;  %s6061_s3 = sshll.u32 %s7546_s23, 4  ;;  %s6062_s3 = int_to_ptr.vmem [resolvable:$true] %s6061_s3 }
 0x257   :  { %7125 = vmatprep.subr.bf16.mxu0 %v7199_v63  ;;  %v2036_v35 = vld [vmem:[#allocation3 + $0x10] sm:$0xf]  ;;  %7131 = vmatprep.mubr.msk.bf16.mxu0 %vm1919_vm1, %v2339_v48  ;;  %v7254_v54 = vld [vmem:[%s9248_s4 + $0x14c] ss:$16 sps:$4 sm:$0xff]   ;;  %v7252_v51 = vld [vmem:[%s9248_s4 + $0x148] ss:$16 sps:$4 sm:$0xff]  }
 0x258   :  { %v6305_v6 = vcombine.low %v2035_v60, %v2036_v35  ;;  %v7204_v7 = vld [vmem:[#allocation3 + $0x14] ss:$0 sps:$4 sm:$0x11]   ;;  %v7212_v11 = vld [vmem:[#allocation3 + $0x20] ss:$0 sps:$4 sm:$0x11]  }
 0x259   :  { %v7215_v27 = vld [vmem:[#allocation3 + $0x14] ss:$0 sps:$4 sm:$0xff]   ;;  %v7249_v52 = vld [vmem:[%s9248_s4 + $0x140] ss:$16 sps:$4 sm:$0xff]   ;;  %v7260_v49 = vld [vmem:[%s9248_s4 + $0x12c] ss:$16 sps:$4 sm:$0xff]  }
 0x25a   :  { %7126 = vmatpush3.bf16.msra.mxu0 %v7199_v63  ;;  %7095 = vmatprep.mubr.msk.bf16.mxu1 %vm1919_vm1, %v6305_v6  ;;  %v2439_v23 = vrot.slane %v7215_v27, 3  ;;  %v7257_v45 = vld [vmem:[%s9248_s4 + $0x124] ss:$16 sps:$4 sm:$0xff]   ;;  %v7255_v58 = vld [vmem:[%s9248_s4 + $0x120] ss:$16 sps:$4 sm:$0xff]  }
 0x25b   :  { %7127 = vmatprep.subr.bf16.mxu0 %v7201_v55  ;;  %7096 = vmatmul.mubr.msk.bf16.vlgmr.msra.gmra.mxu1 %vm1919_vm1, %v7204_v7  ;;  %v7258_v62 = vld [vmem:[%s9248_s4 + $0x128] ss:$16 sps:$4 sm:$0xff]   ;;  %v7263_v26 = vld [vmem:[%s9248_s4 + $0x104] ss:$16 sps:$4 sm:$0xff]   ;;  %v7266_v0 = vld [vmem:[%s9248_s4 + $0x10c] ss:$16 sps:$4 sm:$0xff]  }
 0x25c   :  { %7112 = vmatpush3.bf16.msra.mxu1 %v8552_v16  ;;  %7119 = vmatprep.mubr.msk.bf16.mxu1 %vm1919_vm1, %v7205_v24  ;;  %v2421_v16 = vld [vmem:[#allocation3 + $0xc] sm:$0x8]  ;;  %v7261_v41 = vld [vmem:[%s9248_s4 + $0x100] ss:$16 sps:$4 sm:$0xff]   ;;  %v7264_v9 = vld [vmem:[%s9248_s4 + $0x108] ss:$16 sps:$4 sm:$0xff]  }
 0x25d   :  { %7113 = vmatprep.subr.bf16.mxu1 %v7207_v59  ;;  %v6361_v13 = vcombine.low %v2421_v16, %v2036_v35  ;;  %v7269_v17 = vld [vmem:[%s9248_s4 + $0xe4] ss:$16 sps:$4 sm:$0xff]   ;;  %v7272_v4 = vld [vmem:[%s9248_s4 + $0xec] ss:$16 sps:$4 sm:$0xff]  }
 0x25e   :  { %7128 = vmatpush3.bf16.msra.mxu0 %v7201_v55 }
 0x25f   :  { %7129 = vmatprep.subr.bf16.mxu0 %v7206_v10  ;;  %v2438_v18 = vrot.slane %v6361_v13, 3 }
 0x260   :  { %7114 = vmatpush3.bf16.msra.mxu1 %v7207_v59 }
 0x261   :  { %7115 = vmatprep.subr.bf16.mxu1 %v7210_v61  ;;  %v2440_v34 = vsel %vm1668_vm6, %v2438_v18, %v2439_v23 }
 0x262   :  { %7130 = vmatpush3.bf16.msra.mxu0 %v7206_v10 }
 0x263   :  { %2774 = vmatprep.subr.bf16.mxu0 %v7221_v33 }
 0x264   :  { %7116 = vmatpush3.bf16.msra.mxu1 %v7210_v61 }
 0x265   :  { %7132 = vmatmul.mubr.msk.bf16.vlgmr.msra.gmra.mxu0 %vm1919_vm1, %v2338_v19  ;;  %7117 = vmatprep.subr.bf16.mxu1 %v7211_v22 }
 0x266   :  { %2806 = vmatprep.mubr.bf16.mxu0 %v7544_v1  ;;  %2775 = vmatpush1.bf16.msra.mxu0 %v7219_v8 }
 0x267   :  { %2776 = vmatprep.subr.bf16.mxu0 %v7227_v37 }
 0x268   :  { %7118 = vmatpush3.bf16.msra.mxu1 %v7211_v22 }
 0x269   :  { %7135 = vmatprep.subr.bf16.mxu1 %v7213_v12 }
 0x26a   :  { %2777 = vmatpush1.bf16.msra.mxu0 %v7225_v36 }
 0x26b   :  { %7120 = vmatmul.mubr.msk.bf16.vlgmr.msra.gmra.mxu1 %vm1919_vm1, %v7212_v11  ;;  %2778 = vmatprep.subr.bf16.mxu0 %v7233_v20 }
 0x26c   :  { %7136 = vmatpush3.bf16.msra.mxu1 %v7213_v12  ;;  %7143 = vmatprep.mubr.msk.bf16.mxu1 %vm1919_vm1, %v2440_v34  ;;  %v6369_v12 = vld [vmem:[%s9253_s9] ss:$0 sm:$0xff] }
 0x26d   :  { %7137 = vmatprep.subr.bf16.mxu1 %v7216_v28 }
 0x26e   :  { %2779 = vmatpush1.bf16.msra.mxu0 %v7231_v14 }
 0x26f   :  { %2780 = vmatprep.subr.bf16.mxu0 %v7239_v30 }
 0x270   :  { %7138 = vmatpush3.bf16.msra.mxu1 %v7216_v28 }
 0x271   :  { %7139 = vmatprep.subr.bf16.mxu1 %v7217_v31 }
 0x272   :  { %2781 = vmatpush1.bf16.msra.mxu0 %v7237_v38 }
 0x273   :  { %2782 = vmatprep.subr.bf16.mxu0 %v7245_v40  ;;  %v7270_v40 = vld [vmem:[%s9248_s4 + $0xe8] ss:$16 sps:$4 sm:$0xff]  }
 0x274   :  { %7140 = vmatpush3.bf16.msra.mxu1 %v7217_v31 }
 0x275   :  { %7141 = vmatprep.subr.bf16.mxu1 %v7218_v15 }
 0x276   :  { %2783 = vmatpush1.bf16.msra.mxu0 %v7243_v44 }
 0x277   :  { %2784 = vmatprep.subr.bf16.mxu0 %v7251_v53 }
 0x278   :  { %7142 = vmatpush3.bf16.msra.mxu1 %v7218_v15 }
 0x279   :  { %2815 = vmatprep.subr.bf16.mxu1 %v7224_v57 }
 0x27a   :  { %2785 = vmatpush1.bf16.msra.mxu0 %v7249_v52 }
 0x27b   :  { %7144 = vmatmul.mubr.msk.bf16.vlgmr.msra.gmra.mxu1 %vm1919_vm1, %v2439_v23  ;;  %2786 = vmatprep.subr.bf16.mxu0 %v7257_v45  ;;  %v7276_v45 = vld [vmem:[%s9248_s4 + $0xc8] ss:$16 sps:$4 sm:$0xff]  }
 0x27c   :  { %2847 = vmatprep.mubr.bf16.mxu1 %v7544_v1  ;;  %2816 = vmatpush1.bf16.msra.mxu1 %v7222_v25 }
 0x27d   :  { %2817 = vmatprep.subr.bf16.mxu1 %v7230_v43 }
 0x27e   :  { %2787 = vmatpush1.bf16.msra.mxu0 %v7255_v58  ;;  %v7284_v58 = vld [vmem:[%s9248_s4 + $0xac] ss:$16 sps:$4 sm:$0xff]  }
 0x27f   :  { %2788 = vmatprep.subr.bf16.mxu0 %v7263_v26  ;;  %v7282_v26 = vld [vmem:[%s9248_s4 + $0xa8] ss:$16 sps:$4 sm:$0xff]  }
 0x280   :  { %2818 = vmatpush1.bf16.msra.mxu1 %v7228_v46 }
 0x281   :  { %2819 = vmatprep.subr.bf16.mxu1 %v7236_v56 }
 0x282   :  { %2789 = vmatpush1.bf16.msra.mxu0 %v7261_v41  ;;  %v7290_v41 = vld [vmem:[%s9248_s4 + $0x8c] ss:$16 sps:$4 sm:$0xff]  }
 0x283   :  { %3016 = vmatprep.subr.bf16.mxu0 %v7269_v17  ;;  %v7288_v17 = vld [vmem:[%s9248_s4 + $0x88] ss:$16 sps:$4 sm:$0xff]  }
 0x284   :  { %2820 = vmatpush1.bf16.msra.mxu1 %v7234_v5 }
 0x285   :  { %2821 = vmatprep.subr.bf16.mxu1 %v7242_v42 }
 0x288   :  { %2822 = vmatpush1.bf16.msra.mxu1 %v7240_v39  ;;  %v7267_v39 = vld [vmem:[%s9248_s4 + $0xe0] ss:$16 sps:$4 sm:$0xff]  }
 0x289   :  { %2823 = vmatprep.subr.bf16.mxu1 %v7248_v47  ;;  %v7275_v47 = vld [vmem:[%s9248_s4 + $0xc4] ss:$16 sps:$4 sm:$0xff]  }
 0x28c   :  { %2824 = vmatpush1.bf16.msra.mxu1 %v7246_v50  ;;  %v7278_v50 = vld [vmem:[%s9248_s4 + $0xcc] ss:$16 sps:$4 sm:$0xff]  }
 0x28d   :  { %2825 = vmatprep.subr.bf16.mxu1 %v7254_v54 }
 0x290   :  { %2826 = vmatpush1.bf16.msra.mxu1 %v7252_v51  ;;  %v7273_v51 = vld [vmem:[%s9248_s4 + $0xc0] ss:$16 sps:$4 sm:$0xff]  }
 0x291   :  { %2827 = vmatprep.subr.bf16.mxu1 %v7260_v49  ;;  %v7281_v49 = vld [vmem:[%s9248_s4 + $0xa4] ss:$16 sps:$4 sm:$0xff]  }
 0x294   :  { %2828 = vmatpush1.bf16.msra.mxu1 %v7258_v62  ;;  %v7279_v62 = vld [vmem:[%s9248_s4 + $0xa0] ss:$16 sps:$4 sm:$0xff]  }
 0x295   :  { %2829 = vmatprep.subr.bf16.mxu1 %v7266_v0  ;;  %v7287_v0 = vld [vmem:[%s9248_s4 + $0x84] ss:$16 sps:$4 sm:$0xff]  }
 0x298   :  { %2830 = vmatpush1.bf16.msra.mxu1 %v7264_v9  ;;  %v7285_v9 = vld [vmem:[%s9248_s4 + $0x80] ss:$16 sps:$4 sm:$0xff]  }
 0x299   :  { %3057 = vmatprep.subr.bf16.mxu1 %v7272_v4  ;;  %v7293_v4 = vld [vmem:[%s9248_s4 + $0x64] ss:$16 sps:$4 sm:$0xff]  }
 0x315   :  { %v7109_v21 = vpop.f32.mrf.mxu0 }
 0x317   :  { %v2205_v63 = vpop.f32.mrf.mxu0 }
 0x319   :  { %v7110_v55 = vpop.f32.mrf.mxu0 }
 0x31a   :  { %v7294_v55 = vld [vmem:[%s9248_s4 + $0x68] ss:$16 sps:$4 sm:$0xff]  }
 0x31b   :  { %v7097_v2 = vpop.f32.mrf.mxu1  ;;  %v2208_v35 = vpop.f32.mrf.mxu0 }
 0x31c   :  { %v2214_v24 = vadd.f32 %v7109_v21, %v7097_v2  ;;  %v7296_v21 = vld [vmem:[%s9248_s4 + $0x6c] ss:$16 sps:$4 sm:$0xff]   ;;  %v7299_v2 = vld [vmem:[%s9248_s4 + $0x44] ss:$16 sps:$4 sm:$0xff]  }
 0x31d   :  { %v2119_v3 = vpop.f32.mrf.mxu1 }
 0x31e   :  { %v2206_v48 = vadd.f32 %v2205_v63, %v2119_v3  ;;  %v7291_v63 = vld [vmem:[%s9248_s4 + $0x60] ss:$16 sps:$4 sm:$0xff]   ;;  %v7302_v3 = vld [vmem:[%s9248_s4 + $0x4c] ss:$16 sps:$4 sm:$0xff]  }
 0x31f   :  { %v7098_v60 = vpop.f32.mrf.mxu1 }
 0x320   :  { %v7297_v60 = vld [vmem:[%s9248_s4 + $0x40] ss:$16 sps:$4 sm:$0xff]  }
 0x321   :  { %v2122_v10 = vpop.f32.mrf.mxu1 }
 0x322   :  { %v2209_v13 = vadd.f32 %v2208_v35, %v2122_v10  ;;  %v7300_v35 = vld [vmem:[%s9248_s4 + $0x48] ss:$16 sps:$4 sm:$0xff]  }
 0x323   :  { %v7306_v10 = vld [vmem:[%s9248_s4 + $0x28] ss:$16 sps:$4 sm:$0xff]  }
 0x325   :  { %v7133_v32 = vpop.f32.mrf.mxu0 }
 0x327   :  { %v2404_v6 = vpop.f32.mrf.mxu0 }
 0x329   :  { %v7134_v7 = vpop.f32.mrf.mxu0 }
 0x32a   :  { %v7303_v7 = vld [vmem:[%s9248_s4 + $0x20] ss:$16 sps:$4 sm:$0xff]  }
 0x32b   :  { %v7121_v59 = vpop.f32.mrf.mxu1  ;;  %v2407_v8 = vpop.f32.mrf.mxu0 }
 0x32c   :  { %v2319_v61 = vadd.f32 %v7121_v59, %v2214_v24  ;;  %v7311_v59 = vld [vmem:[%s9248_s4 + $0x4] ss:$16 sps:$4 sm:$0xff]   ;;  %v7312_v24 = vld [vmem:[%s9248_s4 + $0x8] ss:$16 sps:$4 sm:$0xff]  }
 0x32d   :  { %v2303_v29 = vpop.f32.mrf.mxu1 }
 0x32e   :  { %v2317_v22 = vadd.f32 %v2303_v29, %v2206_v48  ;;  %v2420_v27 = vadd.f32 %v7133_v32, %v2319_v61  ;;  %v7305_v32 = vld [vmem:[%s9248_s4 + $0x24] ss:$16 sps:$4 sm:$0xff]   ;;  %v7314_v29 = vld [vmem:[%s9248_s4 + $0xc] ss:$16 sps:$4 sm:$0xff]  }
 0x32f   :  { %v7122_v19 = vpop.f32.mrf.mxu1  ;;  %v7317_v48 = vld [vmem:[%s9248_s4 + $0x2e4] ss:$16 sps:$4 sm:$0xff]   ;;  %v7320_v61 = vld [vmem:[%s9248_s4 + $0x2ec] ss:$16 sps:$4 sm:$0xff]  }
 0x330   :  { %v2418_v28 = vadd.f32 %v2404_v6, %v2317_v22  ;;  %v7308_v6 = vld [vmem:[%s9248_s4 + $0x2c] ss:$16 sps:$4 sm:$0xff]   ;;  %v7309_v19 = vld [vmem:[%s9248_s4] ss:$16 sps:$4 sm:$0xff]  }
 0x331   :  { %v2306_v16 = vpop.f32.mrf.mxu1  ;;  %v7315_v22 = vld [vmem:[%s9248_s4 + $0x2e0] ss:$16 sps:$4 sm:$0xff]  }
 0x332   :  { %v2318_v23 = vadd.f32 %v2306_v16, %v2209_v13  ;;  %v7318_v16 = vld [vmem:[%s9248_s4 + $0x2e8] ss:$16 sps:$4 sm:$0xff]   ;;  %v7323_v13 = vld [vmem:[%s9248_s4 + $0x2c4] ss:$16 sps:$4 sm:$0xff]  }
 0x334   :  { %v2419_v36 = vadd.f32 %v2407_v8, %v2318_v23  ;;  %v7329_v23 = vld [vmem:[%s9248_s4 + $0x2a4] ss:$16 sps:$4 sm:$0xff]   ;;  %v7336_v8 = vld [vmem:[%s9248_s4 + $0x288] ss:$16 sps:$4 sm:$0xff]  }
 0x33b   :  { %v7145_v18 = vpop.f32.mrf.mxu1 }
 0x33c   :  { %v2521_v11 = vadd.f32 %v7145_v18, %v2420_v27  ;;  %v7326_v27 = vld [vmem:[%s9248_s4 + $0x2cc] ss:$16 sps:$4 sm:$0xff]   ;;  %v7324_v18 = vld [vmem:[%s9248_s4 + $0x2c8] ss:$16 sps:$4 sm:$0xff]  }
 0x33d   :  { %v2505_v34 = vpop.f32.mrf.mxu1 }
 0x33e   :  { %v2530_v31 = vadd.f32 %v6369_v12, %v2521_v11  ;;  %v2519_v15 = vadd.f32 %v2505_v34, %v2418_v28  ;;  %v7332_v11 = vld [vmem:[%s9248_s4 + $0x2ac] ss:$16 sps:$4 sm:$0xff]   ;;  %v7327_v28 = vld [vmem:[%s9248_s4 + $0x2a0] ss:$16 sps:$4 sm:$0xff]   ;;  %v7330_v34 = vld [vmem:[%s9248_s4 + $0x2a8] ss:$16 sps:$4 sm:$0xff]  }
 0x33f   :  { %v7146_v33 = vpop.f32.mrf.mxu1 }
 0x340   :  { %2533 = vst [vmem:[#allocation9 + $0x10] sm:$0x3] %v2530_v31  ;;  %v2539_v25 = vmul.f32 0.01, %v2530_v31  ;;  %v2528_v57 = vadd.f32 %v6369_v12, %v2519_v15  ;;  %vm2536_vm10 = vcmp.ge.f32.partialorder %v2530_v31, 0.0 }
 0x341   :  { %v2508_v37 = vpop.f32.mrf.mxu1  ;;  %v7333_v15 = vld [vmem:[%s9248_s4 + $0x280] ss:$16 sps:$4 sm:$0xff]   ;;  %v7341_v33 = vld [vmem:[%s9248_s4 + $0x264] ss:$16 sps:$4 sm:$0xff]  }
 0x342   :  { %2531 = vst [vmem:[#allocation9] sm:$0xff] %v2528_v57  ;;  %v2520_v46 = vadd.f32 %v2508_v37, %v2419_v36  ;;  %v2537_v43 = vmul.f32 0.01, %v2528_v57  ;;  %v2542_v14 = vsel %vm2536_vm10, %v2530_v31, %v2539_v25  ;;  %vm2534_vm14 = vcmp.ge.f32.partialorder %v2528_v57, 0.0  ;;  %v7335_v31 = vld [vmem:[%s9248_s4 + $0x284] ss:$16 sps:$4 sm:$0xff]  }
 0x343   :  { %v2544_v5 = vpack.c.bf16 %v2542_v14, %v2542_v14  ;;  %v7344_v25 = vld [vmem:[%s9248_s4 + $0x26c] ss:$16 sps:$4 sm:$0xff]   ;;  %v7342_v36 = vld [vmem:[%s9248_s4 + $0x268] ss:$16 sps:$4 sm:$0xff]   ;;  %v7347_v37 = vld [vmem:[%s9248_s4 + $0x244] ss:$16 sps:$4 sm:$0xff]  }
 0x344   :  { %v2529_v20 = vadd.f32 %v6369_v12, %v2520_v46  ;;  %v2540_v30 = vsel %vm2534_vm14, %v2528_v57, %v2537_v43  ;;  %v7321_v12 = vld [vmem:[%s9248_s4 + $0x2c0] ss:$16 sps:$4 sm:$0xff]   ;;  %v7350_v46 = vld [vmem:[%s9248_s4 + $0x24c] ss:$16 sps:$4 sm:$0xff]   ;;  %v7353_v14 = vld [vmem:[%s9248_s4 + $0x224] ss:$16 sps:$4 sm:$0xff]  }
 0x345   :  { %v3133_v54 = vrot.slane %v2544_v5, 6  ;;  %v7339_v57 = vld [vmem:[%s9248_s4 + $0x260] ss:$16 sps:$4 sm:$0xff]  }
 0x346   :  { %2532 = vst [vmem:[#allocation9 + $0x8] sm:$0xff] %v2529_v20  ;;  %vm2535_vm6 = vcmp.ge.f32.partialorder %v2529_v20, 0.0  ;;  %v2538_v56 = vmul.f32 0.01, %v2529_v20  ;;  %v7345_v43 = vld [vmem:[%s9248_s4 + $0x240] ss:$16 sps:$4 sm:$0xff]  }
 0x347   :  { %v7351_v5 = vld [vmem:[%s9248_s4 + $0x220] ss:$16 sps:$4 sm:$0xff]  }
 0x348   :  { %v2541_v42 = vsel %vm2535_vm6, %v2529_v20, %v2538_v56  ;;  %v7348_v20 = vld [vmem:[%s9248_s4 + $0x248] ss:$16 sps:$4 sm:$0xff]   ;;  %v7356_v56 = vld [vmem:[%s9248_s4 + $0x22c] ss:$16 sps:$4 sm:$0xff]  }
 0x349   :  { %v8742_v38 = vpack.c.bf16 %v2541_v42, %v2540_v30  ;;  %v7354_v30 = vld [vmem:[%s9248_s4 + $0x228] ss:$16 sps:$4 sm:$0xff]   ;;  %v7359_v42 = vld [vmem:[%s9248_s4 + $0x204] ss:$16 sps:$4 sm:$0xff]  }
 0x34b   :  { %v2612_v44 = vrot.slane %v8742_v38, 3  ;;  %v3132_v53 = vrot.slane %v8742_v38, 6 }
 0x34d   :  { %2807 = vmatmul.mubr.bf16.vlgmr.msra.gmra.mxu0 %v2612_v44  ;;  %2848 = vmatmul.mubr.bf16.vlgmr.msra.gmra.mxu1 %v2612_v44  ;;  %v8759_v52 = vsel %vm1153_vm5, %v3132_v53, %v3133_v54  ;;  %v3488_v44 = vld [vmem:[#allocation5 + $0x1e0] sm:$0xff] }
 0x34e   :  { %3017 = vmatpush1.bf16.msra.mxu0 %v7267_v39  ;;  %3058 = vmatpush1.bf16.msra.mxu1 %v7270_v40  ;;  %v7357_v39 = vld [vmem:[%s9248_s4 + $0x200] ss:$16 sps:$4 sm:$0xff]   ;;  %v7360_v40 = vld [vmem:[%s9248_s4 + $0x208] ss:$16 sps:$4 sm:$0xff]  }
 0x34f   :  { %3018 = vmatprep.subr.bf16.mxu0 %v7275_v47  ;;  %3059 = vmatprep.subr.bf16.mxu1 %v7278_v50  ;;  %v3484_v47 = vld [vmem:[#allocation5 + $0x1c0] sm:$0xff] }
 0x350   :  { %3048 = vmatprep.mubr.bf16.mxu0 %v7544_v1  ;;  %3089 = vmatprep.mubr.bf16.mxu1 %v7544_v1  ;;  %v3612_v50 = vld [vmem:[#allocation5 + $0x5c0] sm:$0xff]  ;;  %v6586_v53 = vcombine.low %v3484_v47, %v3488_v44  ;;  %v6587_v54 = vcombine.high %v3484_v47, %v3488_v44 }
 0x352   :  { %3019 = vmatpush1.bf16.msra.mxu0 %v7273_v51  ;;  %3060 = vmatpush1.bf16.msra.mxu1 %v7276_v45  ;;  %v3616_v51 = vld [vmem:[#allocation5 + $0x5e0] sm:$0xff] }
 0x353   :  { %3020 = vmatprep.subr.bf16.mxu0 %v7281_v49  ;;  %3061 = vmatprep.subr.bf16.mxu1 %v7284_v58  ;;  %v3476_v45 = vld [vmem:[#allocation5 + $0x180] sm:$0xff]  ;;  %v6714_v58 = vcombine.low %v3612_v50, %v3616_v51 }
 0x354   :  { %v3480_v49 = vld [vmem:[#allocation5 + $0x1a0] sm:$0xff] }
 0x356   :  { %3021 = vmatpush1.bf16.msra.mxu0 %v7279_v62  ;;  %3062 = vmatpush1.bf16.msra.mxu1 %v7282_v26  ;;  %v6715_v62 = vcombine.high %v3612_v50, %v3616_v51  ;;  %v6579_v26 = vcombine.high %v3476_v45, %v3480_v49  ;;  %v3540_v51 = vld [vmem:[#allocation5 + $0x380] sm:$0xff] }
 0x357   :  { %3022 = vmatprep.subr.bf16.mxu0 %v7287_v0  ;;  %3063 = vmatprep.subr.bf16.mxu1 %v7290_v41  ;;  %v3604_v0 = vld [vmem:[#allocation5 + $0x580] sm:$0xff] }
 0x358   :  { %v3608_v41 = vld [vmem:[#allocation5 + $0x5a0] sm:$0xff] }
 0x35a   :  { %3023 = vmatpush1.bf16.msra.mxu0 %v7285_v9  ;;  %3064 = vmatpush1.bf16.msra.mxu1 %v7288_v17  ;;  %v3468_v9 = vld [vmem:[#allocation5 + $0x140] sm:$0xff]  ;;  %v6707_v17 = vcombine.high %v3604_v0, %v3608_v41 }
 0x35b   :  { %3024 = vmatprep.subr.bf16.mxu0 %v7293_v4  ;;  %3065 = vmatprep.subr.bf16.mxu1 %v7296_v21  ;;  %v3472_v4 = vld [vmem:[#allocation5 + $0x160] sm:$0xff] }
 0x35c   :  { %v3596_v21 = vld [vmem:[#allocation5 + $0x540] sm:$0xff] }
 0x35e   :  { %3025 = vmatpush1.bf16.msra.mxu0 %v7291_v63  ;;  %3066 = vmatpush1.bf16.msra.mxu1 %v7294_v55  ;;  %v3600_v63 = vld [vmem:[#allocation5 + $0x560] sm:$0xff]  ;;  %v6706_v55 = vcombine.low %v3604_v0, %v3608_v41 }
 0x35f   :  { %3026 = vmatprep.subr.bf16.mxu0 %v7299_v2  ;;  %3067 = vmatprep.subr.bf16.mxu1 %v7302_v3  ;;  %v6571_v2 = vcombine.high %v3468_v9, %v3472_v4  ;;  %v6699_v3 = vcombine.high %v3596_v21, %v3600_v63 }
 0x362   :  { %3027 = vmatpush1.bf16.msra.mxu0 %v7297_v60  ;;  %3068 = vmatpush1.bf16.msra.mxu1 %v7300_v35  ;;  %v3460_v60 = vld [vmem:[#allocation5 + $0x100] sm:$0xff] }
 0x363   :  { %3028 = vmatprep.subr.bf16.mxu0 %v7305_v32  ;;  %3069 = vmatprep.subr.bf16.mxu1 %v7308_v6  ;;  %v3464_v35 = vld [vmem:[#allocation5 + $0x120] sm:$0xff] }
 0x364   :  { %v3588_v32 = vld [vmem:[#allocation5 + $0x500] sm:$0xff] }
 0x365   :  { %v3592_v6 = vld [vmem:[#allocation5 + $0x520] sm:$0xff] }
 0x366   :  { %3029 = vmatpush1.bf16.msra.mxu0 %v7303_v7  ;;  %3070 = vmatpush1.bf16.msra.mxu1 %v7306_v10  ;;  %v6570_v7 = vcombine.low %v3468_v9, %v3472_v4  ;;  %v6698_v10 = vcombine.low %v3596_v21, %v3600_v63  ;;  %v3536_v4 = vld [vmem:[#allocation5 + $0x360] sm:$0xff] }
 0x367   :  { %3030 = vmatprep.subr.bf16.mxu0 %v7311_v59  ;;  %3071 = vmatprep.subr.bf16.mxu1 %v7314_v29  ;;  %v6563_v59 = vcombine.high %v3460_v60, %v3464_v35  ;;  %v6691_v29 = vcombine.high %v3588_v32, %v3592_v6  ;;  %v3660_v21 = vld [vmem:[#allocation5 + $0x740] sm:$0xff] }
 0x368   :  { %v3664_v63 = vld [vmem:[#allocation5 + $0x760] sm:$0xff] }
 0x36a   :  { %3031 = vmatpush1.bf16.msra.mxu0 %v7309_v19  ;;  %3072 = vmatpush1.bf16.msra.mxu1 %v7312_v24  ;;  %v3452_v19 = vld [vmem:[#allocation5 + $0xc0] sm:$0xff] }
 0x36b   :  { %3296 = vmatprep.subr.bf16.mxu0 %v7317_v48  ;;  %3337 = vmatprep.subr.bf16.mxu1 %v7320_v61  ;;  %v3456_v24 = vld [vmem:[#allocation5 + $0xe0] sm:$0xff] }
 0x36c   :  { %v3580_v48 = vld [vmem:[#allocation5 + $0x4c0] sm:$0xff] }
 0x36d   :  { %3049 = vmatmul.mubr.bf16.vlgmr.msra.gmra.mxu0 %v8742_v38  ;;  %3090 = vmatmul.mubr.bf16.vlgmr.msra.gmra.mxu1 %v8742_v38  ;;  %v7362_v38 = vld [vmem:[%s9248_s4 + $0x20c] ss:$16 sps:$4 sm:$0xff]  }
 0x36e   :  { %3297 = vmatpush1.bf16.msra.mxu0 %v7315_v22  ;;  %3338 = vmatpush1.bf16.msra.mxu1 %v7318_v16  ;;  %v3584_v61 = vld [vmem:[#allocation5 + $0x4e0] sm:$0xff]  ;;  %v6562_v22 = vcombine.low %v3460_v60, %v3464_v35  ;;  %v6690_v16 = vcombine.low %v3588_v32, %v3592_v6 }
 0x36f   :  { %3298 = vmatprep.subr.bf16.mxu0 %v7323_v13  ;;  %3339 = vmatprep.subr.bf16.mxu1 %v7326_v27  ;;  %v6555_v13 = vcombine.high %v3452_v19, %v3456_v24  ;;  %v6683_v27 = vcombine.high %v3580_v48, %v3584_v61  ;;  %v3524_v60 = vld [vmem:[#allocation5 + $0x300] sm:$0xff] }
 0x370   :  { %3328 = vmatprep.mubr.bf16.mxu0 %v7544_v1  ;;  %3369 = vmatprep.mubr.bf16.mxu1 %v7544_v1  ;;  %v7338_v1 = vld [vmem:[%s9248_s4 + $0x28c] ss:$16 sps:$4 sm:$0xff]  }
 0x371   :  { %v3528_v35 = vld [vmem:[#allocation5 + $0x320] sm:$0xff] }
 0x372   :  { %3299 = vmatpush1.bf16.msra.mxu0 %v7321_v12  ;;  %3340 = vmatpush1.bf16.msra.mxu1 %v7324_v18  ;;  %v6554_v12 = vcombine.low %v3452_v19, %v3456_v24  ;;  %v6682_v18 = vcombine.low %v3580_v48, %v3584_v61  ;;  %v3652_v32 = vld [vmem:[#allocation5 + $0x700] sm:$0xff] }
 0x373   :  { %3300 = vmatprep.subr.bf16.mxu0 %v7329_v23  ;;  %3341 = vmatprep.subr.bf16.mxu1 %v7332_v11  ;;  %v3444_v23 = vld [vmem:[#allocation5 + $0x80] sm:$0xff] }
 0x374   :  { %v3448_v11 = vld [vmem:[#allocation5 + $0xa0] sm:$0xff] }
 0x375   :  { %v3656_v6 = vld [vmem:[#allocation5 + $0x720] sm:$0xff] }
 0x376   :  { %3301 = vmatpush1.bf16.msra.mxu0 %v7327_v28  ;;  %3342 = vmatpush1.bf16.msra.mxu1 %v7330_v34  ;;  %v3572_v28 = vld [vmem:[#allocation5 + $0x480] sm:$0xff]  ;;  %v6547_v34 = vcombine.high %v3444_v23, %v3448_v11 }
 0x377   :  { %3302 = vmatprep.subr.bf16.mxu0 %v7335_v31  ;;  %3343 = vmatprep.subr.bf16.mxu1 %v7338_v1  ;;  %v3576_v31 = vld [vmem:[#allocation5 + $0x4a0] sm:$0xff]  ;;  %v6546_v1 = vcombine.low %v3444_v23, %v3448_v11 }
 0x378   :  { %v3516_v19 = vld [vmem:[#allocation5 + $0x2c0] sm:$0xff] }
 0x379   :  { %v3520_v24 = vld [vmem:[#allocation5 + $0x2e0] sm:$0xff] }
 0x37a   :  { %3303 = vmatpush1.bf16.msra.mxu0 %v7333_v15  ;;  %3344 = vmatpush1.bf16.msra.mxu1 %v7336_v8  ;;  %v6674_v15 = vcombine.low %v3572_v28, %v3576_v31  ;;  %v6675_v8 = vcombine.high %v3572_v28, %v3576_v31  ;;  %v3644_v48 = vld [vmem:[#allocation5 + $0x6c0] sm:$0xff] }
 0x37b   :  { %3304 = vmatprep.subr.bf16.mxu0 %v7341_v33  ;;  %3345 = vmatprep.subr.bf16.mxu1 %v7344_v25  ;;  %v3436_v33 = vld [vmem:[#allocation5 + $0x40] sm:$0xff] }
 0x37c   :  { %v3440_v25 = vld [vmem:[#allocation5 + $0x60] sm:$0xff] }
 0x37d   :  { %v3648_v61 = vld [vmem:[#allocation5 + $0x6e0] sm:$0xff] }
 0x37e   :  { %3305 = vmatpush1.bf16.msra.mxu0 %v7339_v57  ;;  %3346 = vmatpush1.bf16.msra.mxu1 %v7342_v36  ;;  %v3564_v57 = vld [vmem:[#allocation5 + $0x440] sm:$0xff]  ;;  %v6539_v36 = vcombine.high %v3436_v33, %v3440_v25 }
 0x37f   :  { %3306 = vmatprep.subr.bf16.mxu0 %v7347_v37  ;;  %3347 = vmatprep.subr.bf16.mxu1 %v7350_v46  ;;  %v3568_v37 = vld [vmem:[#allocation5 + $0x460] sm:$0xff]  ;;  %v6538_v46 = vcombine.low %v3436_v33, %v3440_v25 }
 0x380   :  { %v3508_v23 = vld [vmem:[#allocation5 + $0x280] sm:$0xff] }
 0x381   :  { %v3512_v11 = vld [vmem:[#allocation5 + $0x2a0] sm:$0xff] }
 0x382   :  { %3307 = vmatpush1.bf16.msra.mxu0 %v7345_v43  ;;  %3348 = vmatpush1.bf16.msra.mxu1 %v7348_v20  ;;  %v6666_v43 = vcombine.low %v3564_v57, %v3568_v37  ;;  %v6667_v20 = vcombine.high %v3564_v57, %v3568_v37  ;;  %v3636_v28 = vld [vmem:[#allocation5 + $0x680] sm:$0xff] }
 0x383   :  { %3308 = vmatprep.subr.bf16.mxu0 %v7353_v14  ;;  %3349 = vmatprep.subr.bf16.mxu1 %v7356_v56  ;;  %v3428_v14 = vld [vmem:[#allocation5] sm:$0xff] }
 0x384   :  { %v3432_v56 = vld [vmem:[#allocation5 + $0x20] sm:$0xff] }
 0x385   :  { %v3640_v31 = vld [vmem:[#allocation5 + $0x6a0] sm:$0xff] }
 0x386   :  { %3309 = vmatpush1.bf16.msra.mxu0 %v7351_v5  ;;  %3350 = vmatpush1.bf16.msra.mxu1 %v7354_v30  ;;  %v3556_v5 = vld [vmem:[#allocation5 + $0x400] sm:$0xff]  ;;  %v6530_v30 = vcombine.low %v3428_v14, %v3432_v56 }
 0x387   :  { %3310 = vmatprep.subr.bf16.mxu0 %v7359_v42  ;;  %3351 = vmatprep.subr.bf16.mxu1 %v7362_v38  ;;  %v6531_v42 = vcombine.high %v3428_v14, %v3432_v56  ;;  %v3560_v38 = vld [vmem:[#allocation5 + $0x420] sm:$0xff] }
 0x388   :  { %v6658_v47 = vcombine.low %v3556_v5, %v3560_v38  ;;  %v6659_v44 = vcombine.high %v3556_v5, %v3560_v38  ;;  %v3500_v33 = vld [vmem:[#allocation5 + $0x240] sm:$0xff] }
 0x389   :  { %v3504_v25 = vld [vmem:[#allocation5 + $0x260] sm:$0xff] }
 0x38a   :  { %3311 = vmatpush1.bf16.msra.mxu0 %v7357_v39  ;;  %3352 = vmatpush1.bf16.msra.mxu1 %v7360_v40  ;;  %v3548_v39 = vld [vmem:[#allocation5 + $0x3c0] sm:$0xff] }
 0x38b   :  { %5005 = vmatprep.subr.bf16.mxu0 %v6587_v54  ;;  %5046 = vmatprep.subr.bf16.mxu1 %v6715_v62  ;;  %v3552_v40 = vld [vmem:[#allocation5 + $0x3e0] sm:$0xff] }
 0x38c   :  { %v6651_v50 = vcombine.high %v3548_v39, %v3552_v40  ;;  %v3680_v54 = vld [vmem:[#allocation5 + $0x7e0] sm:$0xff] }
 0x38d   :  { %3329 = vmatmul.mubr.bf16.vlgmr.msra.gmra.mxu0 %v8759_v52  ;;  %3370 = vmatmul.mubr.bf16.vlgmr.msra.gmra.mxu1 %v8759_v52  ;;  %v6578_v52 = vcombine.low %v3476_v45, %v3480_v49  ;;  %v3544_v49 = vld [vmem:[#allocation5 + $0x3a0] sm:$0xff] }
 0x38e   :  { %5006 = vmatpush1.bf16.msra.mxu0 %v6586_v53  ;;  %5047 = vmatpush1.bf16.msra.mxu1 %v6714_v58  ;;  %v3676_v53 = vld [vmem:[#allocation5 + $0x7c0] sm:$0xff]  ;;  %v6643_v41 = vcombine.high %v3540_v51, %v3544_v49 }
 0x38f   :  { %5007 = vmatprep.subr.bf16.mxu0 %v6579_v26  ;;  %5048 = vmatprep.subr.bf16.mxu1 %v6707_v17  ;;  %v6779_v45 = vcombine.high %v3676_v53, %v3680_v54  ;;  %v3668_v58 = vld [vmem:[#allocation5 + $0x780] sm:$0xff]  ;;  %v6650_v26 = vcombine.low %v3548_v39, %v3552_v40  ;;  %v6778_v0 = vcombine.low %v3676_v53, %v3680_v54  ;;  %v8951_v54 = vld [vmem:[#allocation5 + $0x5e8] sm:$0xff] }
 0x390   :  { %v3672_v62 = vld [vmem:[#allocation5 + $0x7a0] sm:$0xff] }
 0x391   :  { %v6771_v9 = vcombine.high %v3668_v58, %v3672_v62  ;;  %v3532_v17 = vld [vmem:[#allocation5 + $0x340] sm:$0xff] }
 0x392   :  { %5008 = vmatpush1.bf16.msra.mxu0 %v6578_v52  ;;  %5049 = vmatpush1.bf16.msra.mxu1 %v6706_v55  ;;  %v6642_v52 = vcombine.low %v3540_v51, %v3544_v49  ;;  %v6770_v55 = vcombine.low %v3668_v58, %v3672_v62  ;;  %v3628_v57 = vld [vmem:[#allocation5 + $0x640] sm:$0xff] }
 0x393   :  { %5009 = vmatprep.subr.bf16.mxu0 %v6571_v2  ;;  %5050 = vmatprep.subr.bf16.mxu1 %v6699_v3  ;;  %v6635_v2 = vcombine.high %v3532_v17, %v3536_v4  ;;  %v6763_v3 = vcombine.high %v3660_v21, %v3664_v63  ;;  %v3632_v37 = vld [vmem:[#allocation5 + $0x660] sm:$0xff] }
 0x394   :  { %v3492_v14 = vld [vmem:[#allocation5 + $0x200] sm:$0xff] }
 0x395   :  { %v3496_v56 = vld [vmem:[#allocation5 + $0x220] sm:$0xff] }
 0x396   :  { %5010 = vmatpush1.bf16.msra.mxu0 %v6570_v7  ;;  %5051 = vmatpush1.bf16.msra.mxu1 %v6698_v10  ;;  %v6634_v7 = vcombine.low %v3532_v17, %v3536_v4  ;;  %v6762_v10 = vcombine.low %v3660_v21, %v3664_v63  ;;  %v3620_v5 = vld [vmem:[#allocation5 + $0x600] sm:$0xff] }
 0x397   :  { %5011 = vmatprep.subr.bf16.mxu0 %v6563_v59  ;;  %5052 = vmatprep.subr.bf16.mxu1 %v6691_v29  ;;  %v6627_v59 = vcombine.high %v3524_v60, %v3528_v35  ;;  %v6755_v29 = vcombine.high %v3652_v32, %v3656_v6  ;;  %v3624_v38 = vld [vmem:[#allocation5 + $0x620] sm:$0xff] }
 0x398   :  { %v6722_v39 = vcombine.low %v3620_v5, %v3624_v38  ;;  %v6723_v40 = vcombine.high %v3620_v5, %v3624_v38  ;;  %v3477_v38 = vld [vmem:[#allocation5 + $0x188] sm:$0xff] }
 0x39a   :  { %5012 = vmatpush1.bf16.msra.mxu0 %v6562_v22  ;;  %5053 = vmatpush1.bf16.msra.mxu1 %v6690_v16  ;;  %v6626_v22 = vcombine.low %v3524_v60, %v3528_v35  ;;  %v6754_v16 = vcombine.low %v3652_v32, %v3656_v6  ;;  %v3383_v32 = vlaneseq }
 0x39b   :  { %5013 = vmatprep.subr.bf16.mxu0 %v6555_v13  ;;  %5054 = vmatprep.subr.bf16.mxu1 %v6683_v27  ;;  %v6619_v13 = vcombine.high %v3516_v19, %v3520_v24  ;;  %v6747_v27 = vcombine.high %v3644_v48, %v3648_v61 }
 0x39c   :  { %v8959_v6 = vshrl.u32 %v3383_v32, 7  ;;  %v3465_v32 = vld [vmem:[#allocation5 + $0x128] sm:$0xff] }
 0x39e   :  { %5014 = vmatpush1.bf16.msra.mxu0 %v6554_v12  ;;  %5055 = vmatpush1.bf16.msra.mxu1 %v6682_v18  ;;  %v6618_v12 = vcombine.low %v3516_v19, %v3520_v24  ;;  %v6746_v18 = vcombine.low %v3644_v48, %v3648_v61  ;;  %v3397_v19 = vsub.s32 3, %v8959_v6 }
 0x39f   :  { %5015 = vmatprep.subr.bf16.mxu0 %v6547_v34  ;;  %5056 = vmatprep.subr.bf16.mxu1 %v6675_v8  ;;  %v6611_v34 = vcombine.high %v3508_v23, %v3512_v11  ;;  %v6739_v8 = vcombine.high %v3636_v28, %v3640_v31 }
 0x3a2   :  { %5016 = vmatpush1.bf16.msra.mxu0 %v6546_v1  ;;  %5057 = vmatpush1.bf16.msra.mxu1 %v6674_v15  ;;  %v6610_v1 = vcombine.low %v3508_v23, %v3512_v11  ;;  %v6738_v15 = vcombine.low %v3636_v28, %v3640_v31 }
 0x3a3   :  { %5017 = vmatprep.subr.bf16.mxu0 %v6539_v36  ;;  %5058 = vmatprep.subr.bf16.mxu1 %v6667_v20  ;;  %v6603_v36 = vcombine.high %v3500_v33, %v3504_v25  ;;  %v6731_v20 = vcombine.high %v3628_v57, %v3632_v37 }
 0x3a6   :  { %5018 = vmatpush1.bf16.msra.mxu0 %v6538_v46  ;;  %5059 = vmatpush1.bf16.msra.mxu1 %v6666_v43  ;;  %v6602_v46 = vcombine.low %v3500_v33, %v3504_v25  ;;  %v6730_v43 = vcombine.low %v3628_v57, %v3632_v37 }
 0x3a7   :  { %5019 = vmatprep.subr.bf16.mxu0 %v6531_v42  ;;  %5060 = vmatprep.subr.bf16.mxu1 %v6659_v44  ;;  %v6595_v42 = vcombine.high %v3492_v14, %v3496_v56  ;;  %v8945_v44 = vld [vmem:[#allocation5 + $0x1e8] sm:$0xff] }
 0x3aa   :  { %5020 = vmatpush1.bf16.msra.mxu0 %v6530_v30  ;;  %5061 = vmatpush1.bf16.msra.mxu1 %v6658_v47  ;;  %v6594_v30 = vcombine.low %v3492_v14, %v3496_v56  ;;  %v8943_v47 = vld [vmem:[#allocation5 + $0x1c8] sm:$0xff] }
 0x3ab   :  { %5021 = vmatprep.subr.bf16.mxu0 %v6651_v50  ;;  %5062 = vmatprep.subr.bf16.mxu1 %v6779_v45  ;;  %v8947_v50 = vld [vmem:[#allocation5 + $0x5c8] sm:$0xff]  ;;  %v6589_v53 = vcombine.high %v8943_v47, %v8945_v44  ;;  %v6588_v51 = vcombine.low %v8943_v47, %v8945_v44 }
 0x3ac   :  { %v6716_v45 = vcombine.low %v8947_v50, %v8951_v54  ;;  %v6717_v49 = vcombine.high %v8947_v50, %v8951_v54 }
 0x3ae   :  { %5022 = vmatpush2.bf16.msra.mxu0 %v6650_v26  ;;  %5063 = vmatpush2.bf16.msra.mxu1 %v6778_v0 }
 0x3af   :  { %5023 = vmatprep.subr.bf16.mxu0 %v6643_v41  ;;  %5064 = vmatprep.subr.bf16.mxu1 %v6771_v9 }
 0x3b2   :  { %5024 = vmatpush2.bf16.msra.mxu0 %v6642_v52  ;;  %5065 = vmatpush2.bf16.msra.mxu1 %v6770_v55 }
 0x3b3   :  { %5025 = vmatprep.subr.bf16.mxu0 %v6635_v2  ;;  %5066 = vmatprep.subr.bf16.mxu1 %v6763_v3 }
 0x3b6   :  { %5026 = vmatpush2.bf16.msra.mxu0 %v6634_v7  ;;  %5067 = vmatpush2.bf16.msra.mxu1 %v6762_v10  ;;  %v3385_v7 = vsub.s32 0, %v8959_v6  ;;  %v3393_v10 = vsub.s32 2, %v8959_v6 }
 0x3b7   :  { %5027 = vmatprep.subr.bf16.mxu0 %v6627_v59  ;;  %5068 = vmatprep.subr.bf16.mxu1 %v6755_v29  ;;  %v2545_v59 = vld [vmem:[%s9254_s10] sm:$0xf]  ;;  %v3389_v29 = vsub.s32 1, %v8959_v6 }
 0x3b8   :  { %v3386_v61 = vrot.slane %v2545_v59, %v3385_v7 }
 0x3ba   :  { %5028 = vmatpush2.bf16.msra.mxu0 %v6626_v22  ;;  %5069 = vmatpush2.bf16.msra.mxu1 %v6754_v16  ;;  %v3394_v22 = vrot.slane %v2545_v59, %v3393_v10 }
 0x3bb   :  { %5029 = vmatprep.subr.bf16.mxu0 %v6619_v13  ;;  %5070 = vmatprep.subr.bf16.mxu1 %v6747_v27  ;;  %v3390_v27 = vrot.slane %v2545_v59, %v3389_v29 }
 0x3be   :  { %5030 = vmatpush2.bf16.msra.mxu0 %v6618_v12  ;;  %5071 = vmatpush2.bf16.msra.mxu1 %v6746_v18  ;;  %v3398_v12 = vrot.slane %v2545_v59, %v3397_v19  ;;  %v3589_v59 = vld [vmem:[#allocation5 + $0x508] sm:$0xff] }
 0x3bf   :  { %5031 = vmatprep.subr.bf16.mxu0 %v6611_v34  ;;  %5072 = vmatprep.subr.bf16.mxu1 %v6739_v8 }
 0x3c2   :  { %5032 = vmatpush2.bf16.msra.mxu0 %v6610_v1  ;;  %5073 = vmatpush2.bf16.msra.mxu1 %v6738_v15 }
 0x3c3   :  { %5033 = vmatprep.subr.bf16.mxu0 %v6603_v36  ;;  %5074 = vmatprep.subr.bf16.mxu1 %v6731_v20 }
 0x3c6   :  { %5034 = vmatpush2.bf16.msra.mxu0 %v6602_v46  ;;  %5075 = vmatpush2.bf16.msra.mxu1 %v6730_v43 }
 0x3c7   :  { %5035 = vmatprep.subr.bf16.mxu0 %v6595_v42  ;;  %5076 = vmatprep.subr.bf16.mxu1 %v6723_v40 }
 0x3ca   :  { %5036 = vmatpush2.bf16.msra.mxu0 %v6594_v30  ;;  %5077 = vmatpush2.bf16.msra.mxu1 %v6722_v39 }
 0x3cb   :  { %5087 = vmatprep.subr.bf16.mxu0 %v6589_v53  ;;  %5128 = vmatprep.subr.bf16.mxu1 %v6717_v49  ;;  %v3481_v53 = vld [vmem:[#allocation5 + $0x1a8] sm:$0xff] }
 0x3cc   :  { %v3605_v49 = vld [vmem:[#allocation5 + $0x588] sm:$0xff] }
 0x40d   :  { %v2808_v58 = vpop.f32.mrf.mxu0  ;;  %v2849_v62 = vpop.f32.mrf.mxu1 }
 0x40f   :  { %v2810_v26 = vpop.f32.mrf.mxu0  ;;  %v2851_v0 = vpop.f32.mrf.mxu1 }
 0x411   :  { %v2812_v41 = vpop.f32.mrf.mxu0  ;;  %v2853_v9 = vpop.f32.mrf.mxu1 }
 0x412   :  { %v3469_v9 = vld [vmem:[#allocation5 + $0x148] sm:$0xff] }
 0x413   :  { %v2813_v17 = vpop.f32.mrf.mxu0  ;;  %v2854_v4 = vpop.f32.mrf.mxu1 }
 0x414   :  { %v6581_v17 = vcombine.high %v3477_v38, %v3481_v53 }
 0x42d   :  { %v3050_v21 = vpop.f32.mrf.mxu0  ;;  %v3091_v63 = vpop.f32.mrf.mxu1 }
 0x42e   :  { %v3051_v24 = vadd.f32 %v3050_v21, %v2808_v58  ;;  %v3092_v48 = vadd.f32 %v3091_v63, %v2849_v62  ;;  %v3609_v58 = vld [vmem:[#allocation5 + $0x5a8] sm:$0xff] }
 0x42f   :  { %v3052_v52 = vpop.f32.mrf.mxu0  ;;  %v3093_v55 = vpop.f32.mrf.mxu1  ;;  %v6709_v4 = vcombine.high %v3605_v49, %v3609_v58  ;;  %v3473_v21 = vld [vmem:[#allocation5 + $0x168] sm:$0xff] }
 0x430   :  { %v3053_v18 = vadd.f32 %v3052_v52, %v2810_v26  ;;  %v3094_v23 = vadd.f32 %v3093_v55, %v2851_v0  ;;  %v3597_v63 = vld [vmem:[#allocation5 + $0x548] sm:$0xff]  ;;  %v6580_v55 = vcombine.low %v3477_v38, %v3481_v53  ;;  %v6572_v47 = vcombine.low %v3469_v9, %v3473_v21 }
 0x431   :  { %v3054_v2 = vpop.f32.mrf.mxu0  ;;  %v3095_v3 = vpop.f32.mrf.mxu1  ;;  %v3601_v52 = vld [vmem:[#allocation5 + $0x568] sm:$0xff] }
 0x432   :  { %v6708_v2 = vcombine.low %v3605_v49, %v3609_v58  ;;  %v6573_v3 = vcombine.high %v3469_v9, %v3473_v21  ;;  %v6700_v44 = vcombine.low %v3597_v63, %v3601_v52  ;;  %v3677_v53 = vld [vmem:[#allocation5 + $0x7c8] sm:$0xff] }
 0x433   :  { %v3055_v60 = vpop.f32.mrf.mxu0  ;;  %v3096_v35 = vpop.f32.mrf.mxu1  ;;  %v3681_v49 = vld [vmem:[#allocation5 + $0x7e8] sm:$0xff] }
 0x434   :  { %v6701_v60 = vcombine.high %v3597_v63, %v3601_v52  ;;  %v3461_v35 = vld [vmem:[#allocation5 + $0x108] sm:$0xff] }
 0x435   :  { %v6565_v50 = vcombine.high %v3461_v35, %v3465_v32  ;;  %v3541_v21 = vld [vmem:[#allocation5 + $0x388] sm:$0xff] }
 0x436   :  { %v3545_v63 = vld [vmem:[#allocation5 + $0x3a8] sm:$0xff] }
 0x437   :  { %v3669_v52 = vld [vmem:[#allocation5 + $0x788] sm:$0xff] }
 0x44d   :  { %v3330_v16 = vpop.f32.mrf.mxu0  ;;  %v3371_v13 = vpop.f32.mrf.mxu1 }
 0x44e   :  { %v3378_v11 = vadd.f32 %v3330_v16, %v3051_v24  ;;  %v3380_v28 = vadd.f32 %v3371_v13, %v3092_v48  ;;  %v3593_v24 = vld [vmem:[#allocation5 + $0x528] sm:$0xff] }
 0x44f   :  { %v3332_v34 = vpop.f32.mrf.mxu0  ;;  %v3373_v31 = vpop.f32.mrf.mxu1  ;;  %v6693_v54 = vcombine.high %v3589_v59, %v3593_v24  ;;  %v3581_v48 = vld [vmem:[#allocation5 + $0x4c8] sm:$0xff]  ;;  %v6692_v16 = vcombine.low %v3589_v59, %v3593_v24 }
 0x450   :  { %v3403_v1 = vadd.f32 %v3386_v61, %v3378_v11  ;;  %v3405_v15 = vadd.f32 %v3394_v22, %v3380_v28  ;;  %v3379_v8 = vadd.f32 %v3332_v34, %v3053_v18  ;;  %v3381_v33 = vadd.f32 %v3373_v31, %v3094_v23  ;;  %v3585_v61 = vld [vmem:[#allocation5 + $0x4e8] sm:$0xff] }
 0x451   :  { %v3334_v25 = vpop.f32.mrf.mxu0  ;;  %v3375_v57 = vpop.f32.mrf.mxu1  ;;  %v6564_v22 = vcombine.low %v3461_v35, %v3465_v32  ;;  %v3449_v18 = vld [vmem:[#allocation5 + $0xa8] sm:$0xff]  ;;  %v6684_v34 = vcombine.low %v3581_v48, %v3585_v61 }
 0x452   :  { %3407 = vst [vmem:[#allocation11] sm:$0x3f] %v3403_v1  ;;  %v3415_v36 = vmul.f32 0.01, %v3403_v1  ;;  %3409 = vst [vmem:[#allocation11 + $0x10] sm:$0x3f] %v3405_v15  ;;  %v3404_v46 = vadd.f32 %v3390_v27, %v3379_v8  ;;  %v3406_v43 = vadd.f32 %v3398_v12, %v3381_v33  ;;  %v6685_v27 = vcombine.high %v3581_v48, %v3585_v61 }
 0x453   :  { %v3417_v37 = vmul.f32 0.01, %v3405_v15  ;;  %v3335_v20 = vpop.f32.mrf.mxu0  ;;  %v3376_v14 = vpop.f32.mrf.mxu1  ;;  %vm3411_vm5 = vcmp.ge.f32.partialorder %v3403_v1, 0.0  ;;  %vm3413_vm1 = vcmp.ge.f32.partialorder %v3405_v15, 0.0  ;;  %v3445_v12 = vld [vmem:[#allocation5 + $0x88] sm:$0xff] }
 0x454   :  { %3408 = vst [vmem:[#allocation11 + $0x8] sm:$0x3f] %v3404_v46  ;;  %v3416_v56 = vmul.f32 0.01, %v3404_v46  ;;  %3410 = vst [vmem:[#allocation11 + $0x18] sm:$0x3f] %v3406_v43  ;;  %v3419_v30 = vsel %vm3411_vm5, %v3403_v1, %v3415_v36  ;;  %v6549_v31 = vcombine.high %v3445_v12, %v3449_v18  ;;  %v6548_v57 = vcombine.low %v3445_v12, %v3449_v18 }
 0x455   :  { %v3418_v5 = vmul.f32 0.01, %v3406_v43  ;;  %vm3412_vm4 = vcmp.ge.f32.partialorder %v3404_v46, 0.0  ;;  %vm3414_vm9 = vcmp.ge.f32.partialorder %v3406_v43, 0.0  ;;  %v3421_v42 = vsel %vm3413_vm1, %v3405_v15, %v3417_v37  ;;  %v3573_v23 = vld [vmem:[#allocation5 + $0x488] sm:$0xff] }
 0x456   :  { %v3420_v39 = vsel %vm3412_vm4, %v3404_v46, %v3416_v56  ;;  %v8980_v0 = vpack.c.bf16 %v3419_v30, %v3419_v30  ;;  %v8982_v41 = vpack.c.bf16 %v3421_v42, %v3421_v42  ;;  %v3577_v11 = vld [vmem:[#allocation5 + $0x4a8] sm:$0xff] }
 0x457   :  { %v3422_v40 = vsel %vm3414_vm9, %v3406_v43, %v3418_v5  ;;  %v8976_v62 = vpack.c.bf16 %v3420_v39, %v3420_v39  ;;  %v6677_v1 = vcombine.high %v3573_v23, %v3577_v11  ;;  %v3437_v15 = vld [vmem:[#allocation5 + $0x48] sm:$0xff]  ;;  %v6676_v36 = vcombine.low %v3573_v23, %v3577_v11 }
 0x458   :  { %v8978_v26 = vpack.c.bf16 %v3422_v40, %v3422_v40  ;;  %v3441_v8 = vld [vmem:[#allocation5 + $0x68] sm:$0xff] }
 0x459   :  { %5037 = vmatprep.mubr.bf16.mxu0 %v8976_v62  ;;  %v3565_v33 = vld [vmem:[#allocation5 + $0x448] sm:$0xff]  ;;  %v6541_v37 = vcombine.high %v3437_v15, %v3441_v8  ;;  %v6540_v5 = vcombine.low %v3437_v15, %v3441_v8 }
 0x45a   :  { %5078 = vmatprep.mubr.bf16.mxu1 %v8978_v26  ;;  %5038 = vmatmul.mubr.bf16.vlgmr.msra.gmra.mxu0 %v8980_v0  ;;  %v3569_v25 = vld [vmem:[#allocation5 + $0x468] sm:$0xff] }
 0x45b   :  { %5079 = vmatmul.mubr.bf16.vlgmr.msra.gmra.mxu1 %v8982_v41  ;;  %5088 = vmatpush1.bf16.msra.mxu0 %v6588_v51  ;;  %v3453_v51 = vld [vmem:[#allocation5 + $0xc8] sm:$0xff]  ;;  %v6669_v46 = vcombine.high %v3565_v33, %v3569_v25  ;;  %v6668_v30 = vcombine.low %v3565_v33, %v3569_v25 }
 0x45c   :  { %5129 = vmatpush1.bf16.msra.mxu1 %v6716_v45  ;;  %5119 = vmatprep.mubr.bf16.mxu0 %v8976_v62  ;;  %v3457_v45 = vld [vmem:[#allocation5 + $0xe8] sm:$0xff] }
 0x45d   :  { %5160 = vmatprep.mubr.bf16.mxu1 %v8978_v26  ;;  %5089 = vmatprep.subr.bf16.mxu0 %v6581_v17  ;;  %v6557_v13 = vcombine.high %v3453_v51, %v3457_v45  ;;  %v6556_v28 = vcombine.low %v3453_v51, %v3457_v45  ;;  %v3429_v43 = vld [vmem:[#allocation5 + $0x8] sm:$0xff] }
 0x45e   :  { %5130 = vmatprep.subr.bf16.mxu1 %v6709_v4  ;;  %v3433_v20 = vld [vmem:[#allocation5 + $0x28] sm:$0xff]  ;;  %v6781_v4 = vcombine.high %v3677_v53, %v3681_v49 }
 0x45f   :  { %5090 = vmatpush1.bf16.msra.mxu0 %v6580_v55  ;;  %v3557_v14 = vld [vmem:[#allocation5 + $0x408] sm:$0xff]  ;;  %v6533_v42 = vcombine.high %v3429_v43, %v3433_v20  ;;  %v6532_v58 = vcombine.low %v3429_v43, %v3433_v20 }
 0x460   :  { %5131 = vmatpush1.bf16.msra.mxu1 %v6708_v2  ;;  %5091 = vmatprep.subr.bf16.mxu0 %v6573_v3  ;;  %v3561_v56 = vld [vmem:[#allocation5 + $0x428] sm:$0xff]  ;;  %v6780_v3 = vcombine.low %v3677_v53, %v3681_v49 }
 0x461   :  { %5132 = vmatprep.subr.bf16.mxu1 %v6701_v60  ;;  %v6661_v38 = vcombine.high %v3557_v14, %v3561_v56  ;;  %v3549_v39 = vld [vmem:[#allocation5 + $0x3c8] sm:$0xff]  ;;  %v6660_v9 = vcombine.low %v3557_v14, %v3561_v56  ;;  %v6645_v60 = vcombine.high %v3541_v21, %v3545_v63 }
 0x462   :  { %v3553_v40 = vld [vmem:[#allocation5 + $0x3e8] sm:$0xff] }
 0x463   :  { %5092 = vmatpush1.bf16.msra.mxu0 %v6572_v47  ;;  %v6653_v17 = vcombine.high %v3549_v39, %v3553_v40  ;;  %v3673_v55 = vld [vmem:[#allocation5 + $0x7a8] sm:$0xff]  ;;  %v6652_v2 = vcombine.low %v3549_v39, %v3553_v40 }
 0x464   :  { %5133 = vmatpush1.bf16.msra.mxu1 %v6700_v44  ;;  %5093 = vmatprep.subr.bf16.mxu0 %v6565_v50  ;;  %v6773_v35 = vcombine.high %v3669_v52, %v3673_v55  ;;  %v3533_v32 = vld [vmem:[#allocation5 + $0x348] sm:$0xff]  ;;  %v6644_v44 = vcombine.low %v3541_v21, %v3545_v63  ;;  %v6772_v50 = vcombine.low %v3669_v52, %v3673_v55  ;;  %v3486_v63 = vld [vmem:[#allocation5 + $0x1d0] sm:$0xff] }
 0x465   :  { %5134 = vmatprep.subr.bf16.mxu1 %v6693_v54  ;;  %v3537_v59 = vld [vmem:[#allocation5 + $0x368] sm:$0xff]  ;;  %v3490_v52 = vld [vmem:[#allocation5 + $0x1f0] sm:$0xff] }
 0x466   :  { %v3661_v24 = vld [vmem:[#allocation5 + $0x748] sm:$0xff]  ;;  %v6637_v54 = vcombine.high %v3533_v32, %v3537_v59  ;;  %v3614_v55 = vld [vmem:[#allocation5 + $0x5d0] sm:$0xff] }
 0x467   :  { %5094 = vmatpush1.bf16.msra.mxu0 %v6564_v22  ;;  %v3665_v47 = vld [vmem:[#allocation5 + $0x768] sm:$0xff] }
 0x468   :  { %5135 = vmatpush1.bf16.msra.mxu1 %v6692_v16  ;;  %5095 = vmatprep.subr.bf16.mxu0 %v6557_v13  ;;  %v6765_v51 = vcombine.high %v3661_v24, %v3665_v47  ;;  %v3525_v45 = vld [vmem:[#allocation5 + $0x308] sm:$0xff]  ;;  %v6636_v16 = vcombine.low %v3533_v32, %v3537_v59  ;;  %v6764_v13 = vcombine.low %v3661_v24, %v3665_v47  ;;  %v3478_v59 = vld [vmem:[#allocation5 + $0x190] sm:$0xff] }
 0x469   :  { %5136 = vmatprep.subr.bf16.mxu1 %v6685_v27  ;;  %v3529_v48 = vld [vmem:[#allocation5 + $0x328] sm:$0xff]  ;;  %v3482_v24 = vld [vmem:[#allocation5 + $0x1b0] sm:$0xff] }
 0x46a   :  { %v3653_v61 = vld [vmem:[#allocation5 + $0x708] sm:$0xff]  ;;  %v6629_v27 = vcombine.high %v3525_v45, %v3529_v48  ;;  %v3606_v47 = vld [vmem:[#allocation5 + $0x590] sm:$0xff] }
 0x46b   :  { %5096 = vmatpush1.bf16.msra.mxu0 %v6556_v28  ;;  %v3657_v22 = vld [vmem:[#allocation5 + $0x728] sm:$0xff] }
 0x46c   :  { %5137 = vmatpush1.bf16.msra.mxu1 %v6684_v34  ;;  %5097 = vmatprep.subr.bf16.mxu0 %v6549_v31  ;;  %v6757_v12 = vcombine.high %v3653_v61, %v3657_v22  ;;  %v3517_v18 = vld [vmem:[#allocation5 + $0x2c8] sm:$0xff]  ;;  %v6628_v34 = vcombine.low %v3525_v45, %v3529_v48  ;;  %v6756_v31 = vcombine.low %v3653_v61, %v3657_v22  ;;  %v3470_v48 = vld [vmem:[#allocation5 + $0x150] sm:$0xff] }
 0x46d   :  { %5138 = vmatprep.subr.bf16.mxu1 %v6677_v1  ;;  %v3521_v23 = vld [vmem:[#allocation5 + $0x2e8] sm:$0xff]  ;;  %v3474_v61 = vld [vmem:[#allocation5 + $0x170] sm:$0xff] }
 0x46e   :  { %v3645_v11 = vld [vmem:[#allocation5 + $0x6c8] sm:$0xff]  ;;  %v6621_v1 = vcombine.high %v3517_v18, %v3521_v23  ;;  %v3598_v22 = vld [vmem:[#allocation5 + $0x550] sm:$0xff] }
 0x46f   :  { %5098 = vmatpush1.bf16.msra.mxu0 %v6548_v57  ;;  %v3649_v28 = vld [vmem:[#allocation5 + $0x6e8] sm:$0xff] }
 0x470   :  { %5139 = vmatpush1.bf16.msra.mxu1 %v6676_v36  ;;  %5099 = vmatprep.subr.bf16.mxu0 %v6541_v37  ;;  %v6749_v15 = vcombine.high %v3645_v11, %v3649_v28  ;;  %v3509_v8 = vld [vmem:[#allocation5 + $0x288] sm:$0xff]  ;;  %v6620_v36 = vcombine.low %v3517_v18, %v3521_v23  ;;  %v6748_v37 = vcombine.low %v3645_v11, %v3649_v28  ;;  %v3462_v23 = vld [vmem:[#allocation5 + $0x110] sm:$0xff] }
 0x471   :  { %5140 = vmatprep.subr.bf16.mxu1 %v6669_v46  ;;  %v3513_v33 = vld [vmem:[#allocation5 + $0x2a8] sm:$0xff]  ;;  %v3466_v11 = vld [vmem:[#allocation5 + $0x130] sm:$0xff] }
 0x472   :  { %v3637_v25 = vld [vmem:[#allocation5 + $0x688] sm:$0xff]  ;;  %v6613_v46 = vcombine.high %v3509_v8, %v3513_v33  ;;  %v3590_v28 = vld [vmem:[#allocation5 + $0x510] sm:$0xff] }
 0x473   :  { %5100 = vmatpush1.bf16.msra.mxu0 %v6540_v5  ;;  %v3641_v57 = vld [vmem:[#allocation5 + $0x6a8] sm:$0xff] }
 0x474   :  { %5141 = vmatpush1.bf16.msra.mxu1 %v6668_v30  ;;  %5101 = vmatprep.subr.bf16.mxu0 %v6533_v42  ;;  %v6741_v43 = vcombine.high %v3637_v25, %v3641_v57  ;;  %v3501_v20 = vld [vmem:[#allocation5 + $0x248] sm:$0xff]  ;;  %v6612_v30 = vcombine.low %v3509_v8, %v3513_v33  ;;  %v6740_v42 = vcombine.low %v3637_v25, %v3641_v57  ;;  %v3454_v33 = vld [vmem:[#allocation5 + $0xd0] sm:$0xff] }
 0x475   :  { %5142 = vmatprep.subr.bf16.mxu1 %v6661_v38  ;;  %v3505_v14 = vld [vmem:[#allocation5 + $0x268] sm:$0xff]  ;;  %v3458_v25 = vld [vmem:[#allocation5 + $0xf0] sm:$0xff] }
 0x476   :  { %v3629_v56 = vld [vmem:[#allocation5 + $0x648] sm:$0xff]  ;;  %v6605_v38 = vcombine.high %v3501_v20, %v3505_v14  ;;  %v3582_v57 = vld [vmem:[#allocation5 + $0x4d0] sm:$0xff] }
 0x477   :  { %5102 = vmatpush1.bf16.msra.mxu0 %v6532_v58  ;;  %v3633_v5 = vld [vmem:[#allocation5 + $0x668] sm:$0xff] }
 0x478   :  { %5143 = vmatpush1.bf16.msra.mxu1 %v6660_v9  ;;  %5103 = vmatprep.subr.bf16.mxu0 %v6653_v17  ;;  %v6733_v39 = vcombine.high %v3629_v56, %v3633_v5  ;;  %v3493_v40 = vld [vmem:[#allocation5 + $0x208] sm:$0xff]  ;;  %v6604_v9 = vcombine.low %v3501_v20, %v3505_v14  ;;  %v6732_v17 = vcombine.low %v3629_v56, %v3633_v5  ;;  %v3446_v14 = vld [vmem:[#allocation5 + $0x90] sm:$0xff] }
 0x479   :  { %5144 = vmatprep.subr.bf16.mxu1 %v6781_v4  ;;  %v3497_v53 = vld [vmem:[#allocation5 + $0x228] sm:$0xff]  ;;  %v3450_v56 = vld [vmem:[#allocation5 + $0xb0] sm:$0xff] }
 0x47a   :  { %v3621_v49 = vld [vmem:[#allocation5 + $0x608] sm:$0xff]  ;;  %v6597_v4 = vcombine.high %v3493_v40, %v3497_v53  ;;  %v3574_v5 = vld [vmem:[#allocation5 + $0x490] sm:$0xff] }
 0x47b   :  { %5104 = vmatpush2.bf16.msra.mxu0 %v6652_v2  ;;  %v3625_v58 = vld [vmem:[#allocation5 + $0x628] sm:$0xff]  ;;  %v3618_v2 = vld [vmem:[#allocation5 + $0x5f0] sm:$0xff] }
 0x47c   :  { %5145 = vmatpush2.bf16.msra.mxu1 %v6780_v3  ;;  %5105 = vmatprep.subr.bf16.mxu0 %v6645_v60  ;;  %v6725_v21 = vcombine.high %v3621_v49, %v3625_v58  ;;  %v6596_v3 = vcombine.low %v3493_v40, %v3497_v53  ;;  %v6724_v60 = vcombine.low %v3621_v49, %v3625_v58  ;;  %v3438_v53 = vld [vmem:[#allocation5 + $0x50] sm:$0xff] }
 0x47d   :  { %5146 = vmatprep.subr.bf16.mxu1 %v6773_v35  ;;  %v6591_v35 = vcombine.high %v3486_v63, %v3490_v52  ;;  %v6719_v32 = vcombine.high %v3614_v55, %v3618_v2  ;;  %v3442_v49 = vld [vmem:[#allocation5 + $0x70] sm:$0xff] }
 0x47e   :  { %v3566_v58 = vld [vmem:[#allocation5 + $0x450] sm:$0xff] }
 0x47f   :  { %5106 = vmatpush2.bf16.msra.mxu0 %v6644_v44  ;;  %v3610_v44 = vld [vmem:[#allocation5 + $0x5b0] sm:$0xff] }
 0x480   :  { %5147 = vmatpush2.bf16.msra.mxu1 %v6772_v50  ;;  %5107 = vmatprep.subr.bf16.mxu0 %v6637_v54  ;;  %v6590_v50 = vcombine.low %v3486_v63, %v3490_v52  ;;  %v6718_v54 = vcombine.low %v3614_v55, %v3618_v2  ;;  %v6711_v45 = vcombine.high %v3606_v47, %v3610_v44  ;;  %v3430_v52 = vld [vmem:[#allocation5 + $0x10] sm:$0xff] }
 0x481   :  { %5148 = vmatprep.subr.bf16.mxu1 %v6765_v51  ;;  %v6583_v51 = vcombine.high %v3478_v59, %v3482_v24  ;;  %v3434_v55 = vld [vmem:[#allocation5 + $0x30] sm:$0xff] }
 0x482   :  { %v3558_v2 = vld [vmem:[#allocation5 + $0x410] sm:$0xff] }
 0x483   :  { %5108 = vmatpush2.bf16.msra.mxu0 %v6636_v16  ;;  %v3602_v16 = vld [vmem:[#allocation5 + $0x570] sm:$0xff] }
 0x484   :  { %5149 = vmatpush2.bf16.msra.mxu1 %v6764_v13  ;;  %5109 = vmatprep.subr.bf16.mxu0 %v6629_v27  ;;  %v6582_v13 = vcombine.low %v3478_v59, %v3482_v24  ;;  %v6710_v27 = vcombine.low %v3606_v47, %v3610_v44  ;;  %v6703_v18 = vcombine.high %v3598_v22, %v3602_v16  ;;  %v3550_v24 = vld [vmem:[#allocation5 + $0x3d0] sm:$0xff] }
 0x485   :  { %5150 = vmatprep.subr.bf16.mxu1 %v6757_v12  ;;  %v6575_v12 = vcombine.high %v3470_v48, %v3474_v61  ;;  %v3554_v47 = vld [vmem:[#allocation5 + $0x3f0] sm:$0xff] }
 0x486   :  { %v3678_v44 = vld [vmem:[#allocation5 + $0x7d0] sm:$0xff] }
 0x487   :  { %5110 = vmatpush2.bf16.msra.mxu0 %v6628_v34  ;;  %v3594_v34 = vld [vmem:[#allocation5 + $0x530] sm:$0xff] }
 0x488   :  { %5151 = vmatpush2.bf16.msra.mxu1 %v6756_v31  ;;  %5111 = vmatprep.subr.bf16.mxu0 %v6621_v1  ;;  %v6574_v31 = vcombine.low %v3470_v48, %v3474_v61  ;;  %v6702_v1 = vcombine.low %v3598_v22, %v3602_v16  ;;  %v6695_v8 = vcombine.high %v3590_v28, %v3594_v34  ;;  %v3542_v61 = vld [vmem:[#allocation5 + $0x390] sm:$0xff] }
 0x489   :  { %5152 = vmatprep.subr.bf16.mxu1 %v6749_v15  ;;  %v6567_v15 = vcombine.high %v3462_v23, %v3466_v11  ;;  %v3546_v22 = vld [vmem:[#allocation5 + $0x3b0] sm:$0xff] }
 0x48a   :  { %v3670_v16 = vld [vmem:[#allocation5 + $0x790] sm:$0xff] }
 0x48b   :  { %5112 = vmatpush2.bf16.msra.mxu0 %v6620_v36  ;;  %v3586_v36 = vld [vmem:[#allocation5 + $0x4f0] sm:$0xff] }
 0x48c   :  { %5153 = vmatpush2.bf16.msra.mxu1 %v6748_v37  ;;  %5113 = vmatprep.subr.bf16.mxu0 %v6613_v46  ;;  %v6566_v37 = vcombine.low %v3462_v23, %v3466_v11  ;;  %v6694_v46 = vcombine.low %v3590_v28, %v3594_v34  ;;  %v6687_v20 = vcombine.high %v3582_v57, %v3586_v36  ;;  %v3534_v11 = vld [vmem:[#allocation5 + $0x350] sm:$0xff] }
 0x48d   :  { %5154 = vmatprep.subr.bf16.mxu1 %v6741_v43  ;;  %v6559_v43 = vcombine.high %v3454_v33, %v3458_v25  ;;  %v3538_v28 = vld [vmem:[#allocation5 + $0x370] sm:$0xff] }
 0x48e   :  { %v3662_v34 = vld [vmem:[#allocation5 + $0x750] sm:$0xff] }
 0x48f   :  { %5114 = vmatpush2.bf16.msra.mxu0 %v6612_v30  ;;  %v3578_v30 = vld [vmem:[#allocation5 + $0x4b0] sm:$0xff] }
 0x490   :  { %5155 = vmatpush2.bf16.msra.mxu1 %v6740_v42  ;;  %5115 = vmatprep.subr.bf16.mxu0 %v6605_v38  ;;  %v6558_v42 = vcombine.low %v3454_v33, %v3458_v25  ;;  %v6686_v38 = vcombine.low %v3582_v57, %v3586_v36  ;;  %v6679_v40 = vcombine.high %v3574_v5, %v3578_v30  ;;  %v3526_v25 = vld [vmem:[#allocation5 + $0x310] sm:$0xff] }
 0x491   :  { %5156 = vmatprep.subr.bf16.mxu1 %v6733_v39  ;;  %v6551_v39 = vcombine.high %v3446_v14, %v3450_v56  ;;  %v3530_v57 = vld [vmem:[#allocation5 + $0x330] sm:$0xff] }
 0x492   :  { %v3654_v36 = vld [vmem:[#allocation5 + $0x710] sm:$0xff] }
 0x493   :  { %5116 = vmatpush2.bf16.msra.mxu0 %v6604_v9  ;;  %v3570_v9 = vld [vmem:[#allocation5 + $0x470] sm:$0xff] }
 0x494   :  { %5157 = vmatpush2.bf16.msra.mxu1 %v6732_v17  ;;  %5117 = vmatprep.subr.bf16.mxu0 %v6597_v4  ;;  %v6550_v17 = vcombine.low %v3446_v14, %v3450_v56  ;;  %v6678_v4 = vcombine.low %v3574_v5, %v3578_v30  ;;  %v6671_v63 = vcombine.high %v3566_v58, %v3570_v9  ;;  %v3518_v56 = vld [vmem:[#allocation5 + $0x2d0] sm:$0xff] }
 0x495   :  { %5158 = vmatprep.subr.bf16.mxu1 %v6725_v21  ;;  %v6543_v21 = vcombine.high %v3438_v53, %v3442_v49  ;;  %v3522_v5 = vld [vmem:[#allocation5 + $0x2f0] sm:$0xff] }
 0x496   :  { %v3646_v30 = vld [vmem:[#allocation5 + $0x6d0] sm:$0xff] }
 0x497   :  { %5118 = vmatpush2.bf16.msra.mxu0 %v6596_v3  ;;  %v3562_v3 = vld [vmem:[#allocation5 + $0x430] sm:$0xff] }
 0x498   :  { %5159 = vmatpush2.bf16.msra.mxu1 %v6724_v60  ;;  %5169 = vmatprep.subr.bf16.mxu0 %v6591_v35  ;;  %v6542_v60 = vcombine.low %v3438_v53, %v3442_v49  ;;  %v6670_v35 = vcombine.low %v3566_v58, %v3570_v9  ;;  %v6663_v59 = vcombine.high %v3558_v2, %v3562_v3  ;;  %v3510_v49 = vld [vmem:[#allocation5 + $0x290] sm:$0xff] }
 0x499   :  { %5210 = vmatprep.subr.bf16.mxu1 %v6719_v32  ;;  %v6535_v32 = vcombine.high %v3430_v52, %v3434_v55  ;;  %v3514_v58 = vld [vmem:[#allocation5 + $0x2b0] sm:$0xff] }
 0x49a   :  { %5120 = vmatmul.mubr.bf16.vlgmr.msra.gmra.mxu0 %v8980_v0  ;;  %v3638_v9 = vld [vmem:[#allocation5 + $0x690] sm:$0xff] }
 0x49b   :  { %5161 = vmatmul.mubr.bf16.vlgmr.msra.gmra.mxu1 %v8982_v41  ;;  %5170 = vmatpush1.bf16.msra.mxu0 %v6590_v50  ;;  %v3682_v50 = vld [vmem:[#allocation5 + $0x7f0] sm:$0xff] }
 0x49c   :  { %5201 = vmatprep.mubr.bf16.mxu0 %v8976_v62  ;;  %5211 = vmatpush1.bf16.msra.mxu1 %v6718_v54  ;;  %v6534_v54 = vcombine.low %v3430_v52, %v3434_v55  ;;  %v6783_v48 = vcombine.high %v3678_v44, %v3682_v50  ;;  %v3502_v55 = vld [vmem:[#allocation5 + $0x250] sm:$0xff] }
 0x49d   :  { %5242 = vmatprep.mubr.bf16.mxu1 %v8978_v26  ;;  %5171 = vmatprep.subr.bf16.mxu0 %v6583_v51  ;;  %v6662_v51 = vcombine.low %v3558_v2, %v3562_v3  ;;  %v3506_v2 = vld [vmem:[#allocation5 + $0x270] sm:$0xff] }
 0x49e   :  { %5212 = vmatprep.subr.bf16.mxu1 %v6711_v45  ;;  %v6655_v45 = vcombine.high %v3550_v24, %v3554_v47  ;;  %v3630_v3 = vld [vmem:[#allocation5 + $0x650] sm:$0xff] }
 0x49f   :  { %5172 = vmatpush1.bf16.msra.mxu0 %v6582_v13  ;;  %v3674_v13 = vld [vmem:[#allocation5 + $0x7b0] sm:$0xff] }
 0x4a0   :  { %5213 = vmatpush1.bf16.msra.mxu1 %v6710_v27  ;;  %5173 = vmatprep.subr.bf16.mxu0 %v6575_v12  ;;  %v6654_v27 = vcombine.low %v3550_v24, %v3554_v47  ;;  %v6782_v12 = vcombine.low %v3678_v44, %v3682_v50  ;;  %v6775_v23 = vcombine.high %v3670_v16, %v3674_v13  ;;  %v3494_v47 = vld [vmem:[#allocation5 + $0x210] sm:$0xff] }
 0x4a1   :  { %5214 = vmatprep.subr.bf16.mxu1 %v6703_v18  ;;  %v6647_v18 = vcombine.high %v3542_v61, %v3546_v22  ;;  %v3498_v44 = vld [vmem:[#allocation5 + $0x230] sm:$0xff] }
 0x4a2   :  { %v3622_v50 = vld [vmem:[#allocation5 + $0x610] sm:$0xff] }
 0x4a3   :  { %5174 = vmatpush1.bf16.msra.mxu0 %v6574_v31  ;;  %v3666_v31 = vld [vmem:[#allocation5 + $0x770] sm:$0xff] }
 0x4a4   :  { %5215 = vmatpush1.bf16.msra.mxu1 %v6702_v1  ;;  %5175 = vmatprep.subr.bf16.mxu0 %v6567_v15  ;;  %v6646_v1 = vcombine.low %v3542_v61, %v3546_v22  ;;  %v6774_v15 = vcombine.low %v3670_v16, %v3674_v13  ;;  %v6767_v33 = vcombine.high %v3662_v34, %v3666_v31  ;;  %v3487_v22 = vld [vmem:[#allocation5 + $0x1d8] sm:$0xff] }
 0x4a5   :  { %5216 = vmatprep.subr.bf16.mxu1 %v6695_v8  ;;  %v6639_v8 = vcombine.high %v3534_v11, %v3538_v28  ;;  %v3491_v16 = vld [vmem:[#allocation5 + $0x1f8] sm:$0xff] }
 0x4a6   :  { %v3615_v13 = vld [vmem:[#allocation5 + $0x5d8] sm:$0xff] }
 0x4a7   :  { %5176 = vmatpush1.bf16.msra.mxu0 %v6566_v37  ;;  %v3658_v37 = vld [vmem:[#allocation5 + $0x730] sm:$0xff] }
 0x4a8   :  { %5217 = vmatpush1.bf16.msra.mxu1 %v6694_v46  ;;  %5177 = vmatprep.subr.bf16.mxu0 %v6559_v43  ;;  %v6638_v46 = vcombine.low %v3534_v11, %v3538_v28  ;;  %v6766_v43 = vcombine.low %v3662_v34, %v3666_v31  ;;  %v6759_v14 = vcombine.high %v3654_v36, %v3658_v37  ;;  %v3479_v28 = vld [vmem:[#allocation5 + $0x198] sm:$0xff] }
 0x4a9   :  { %5218 = vmatprep.subr.bf16.mxu1 %v6687_v20  ;;  %v6631_v20 = vcombine.high %v3526_v25, %v3530_v57  ;;  %v3483_v34 = vld [vmem:[#allocation5 + $0x1b8] sm:$0xff]  ;;  %v6592_v31 = vcombine.low %v3487_v22, %v3491_v16 }
 0x4ab   :  { %5178 = vmatpush1.bf16.msra.mxu0 %v6558_v42  ;;  %v3650_v42 = vld [vmem:[#allocation5 + $0x6f0] sm:$0xff] }
 0x4ac   :  { %5219 = vmatpush1.bf16.msra.mxu1 %v6686_v38  ;;  %5179 = vmatprep.subr.bf16.mxu0 %v6551_v39  ;;  %v6630_v38 = vcombine.low %v3526_v25, %v3530_v57  ;;  %v6758_v39 = vcombine.low %v3654_v36, %v3658_v37  ;;  %v6751_v53 = vcombine.high %v3646_v30, %v3650_v42  ;;  %v3471_v25 = vld [vmem:[#allocation5 + $0x158] sm:$0xff] }
 0x4ad   :  { %5220 = vmatprep.subr.bf16.mxu1 %v6679_v40  ;;  %v6623_v40 = vcombine.high %v3518_v56, %v3522_v5  ;;  %v3475_v57 = vld [vmem:[#allocation5 + $0x178] sm:$0xff] }
 0x4ae   :  { %v3599_v37 = vld [vmem:[#allocation5 + $0x558] sm:$0xff] }
 0x4af   :  { %5180 = vmatpush1.bf16.msra.mxu0 %v6550_v17  ;;  %v3642_v17 = vld [vmem:[#allocation5 + $0x6b0] sm:$0xff] }
 0x4b0   :  { %5221 = vmatpush1.bf16.msra.mxu1 %v6678_v4  ;;  %5181 = vmatprep.subr.bf16.mxu0 %v6543_v21  ;;  %v6622_v4 = vcombine.low %v3518_v56, %v3522_v5  ;;  %v6750_v21 = vcombine.low %v3646_v30, %v3650_v42  ;;  %v6743_v52 = vcombine.high %v3638_v9, %v3642_v17  ;;  %v3463_v5 = vld [vmem:[#allocation5 + $0x118] sm:$0xff] }
 0x4b1   :  { %5222 = vmatprep.subr.bf16.mxu1 %v6671_v63  ;;  %v6615_v63 = vcombine.high %v3510_v49, %v3514_v58  ;;  %v3467_v30 = vld [vmem:[#allocation5 + $0x138] sm:$0xff] }
 0x4b2   :  { %v3591_v42 = vld [vmem:[#allocation5 + $0x518] sm:$0xff] }
 0x4b3   :  { %5182 = vmatpush1.bf16.msra.mxu0 %v6542_v60  ;;  %v3634_v60 = vld [vmem:[#allocation5 + $0x670] sm:$0xff] }
 0x4b4   :  { %5223 = vmatpush1.bf16.msra.mxu1 %v6670_v35  ;;  %5183 = vmatprep.subr.bf16.mxu0 %v6535_v32  ;;  %v6614_v35 = vcombine.low %v3510_v49, %v3514_v58  ;;  %v6742_v32 = vcombine.low %v3638_v9, %v3642_v17  ;;  %v6735_v24 = vcombine.high %v3630_v3, %v3634_v60  ;;  %v3455_v49 = vld [vmem:[#allocation5 + $0xd8] sm:$0xff] }
 0x4b5   :  { %5224 = vmatprep.subr.bf16.mxu1 %v6663_v59  ;;  %v6607_v59 = vcombine.high %v3502_v55, %v3506_v2  ;;  %v3459_v58 = vld [vmem:[#allocation5 + $0xf8] sm:$0xff] }
 0x4b6   :  { %v3583_v9 = vld [vmem:[#allocation5 + $0x4d8] sm:$0xff] }
 0x4b7   :  { %5184 = vmatpush1.bf16.msra.mxu0 %v6534_v54  ;;  %v3626_v54 = vld [vmem:[#allocation5 + $0x630] sm:$0xff]  ;;  %v3587_v17 = vld [vmem:[#allocation5 + $0x4f8] sm:$0xff] }
 0x4b8   :  { %5225 = vmatpush1.bf16.msra.mxu1 %v6662_v51  ;;  %5185 = vmatprep.subr.bf16.mxu0 %v6655_v45  ;;  %v6606_v51 = vcombine.low %v3502_v55, %v3506_v2  ;;  %v6734_v45 = vcombine.low %v3630_v3, %v3634_v60  ;;  %v6727_v61 = vcombine.high %v3622_v50, %v3626_v54  ;;  %v3451_v55 = vld [vmem:[#allocation5 + $0xb8] sm:$0xff] }
 0x4b9   :  { %5226 = vmatprep.subr.bf16.mxu1 %v6783_v48  ;;  %v6599_v48 = vcombine.high %v3494_v47, %v3498_v44  ;;  %v3575_v2 = vld [vmem:[#allocation5 + $0x498] sm:$0xff]  ;;  %v6560_v60 = vcombine.low %v3455_v49, %v3459_v58 }
 0x4ba   :  { %v3579_v3 = vld [vmem:[#allocation5 + $0x4b8] sm:$0xff] }
 0x4bb   :  { %5186 = vmatpush2.bf16.msra.mxu0 %v6654_v27  ;;  %v3619_v27 = vld [vmem:[#allocation5 + $0x5f8] sm:$0xff] }
 0x4bc   :  { %5227 = vmatpush2.bf16.msra.mxu1 %v6782_v12  ;;  %5187 = vmatprep.subr.bf16.mxu0 %v6647_v18  ;;  %v6598_v12 = vcombine.low %v3494_v47, %v3498_v44  ;;  %v6726_v18 = vcombine.low %v3622_v50, %v3626_v54  ;;  %v6721_v11 = vcombine.high %v3615_v13, %v3619_v27  ;;  %v3443_v47 = vld [vmem:[#allocation5 + $0x78] sm:$0xff] }
 0x4bd   :  { %5228 = vmatprep.subr.bf16.mxu1 %v6775_v23  ;;  %v6593_v23 = vcombine.high %v3487_v22, %v3491_v16  ;;  %v3567_v44 = vld [vmem:[#allocation5 + $0x458] sm:$0xff] }
 0x4be   :  { %v3571_v50 = vld [vmem:[#allocation5 + $0x478] sm:$0xff] }
 0x4bf   :  { %5188 = vmatpush2.bf16.msra.mxu0 %v6646_v1  ;;  %v3607_v1 = vld [vmem:[#allocation5 + $0x598] sm:$0xff] }
 0x4c0   :  { %5229 = vmatpush2.bf16.msra.mxu1 %v6774_v15  ;;  %5189 = vmatprep.subr.bf16.mxu0 %v6639_v8  ;;  %v3611_v15 = vld [vmem:[#allocation5 + $0x5b8] sm:$0xff]  ;;  %v6720_v8 = vcombine.low %v3615_v13, %v3619_v27 }
 0x4c1   :  { %5230 = vmatprep.subr.bf16.mxu1 %v6767_v33  ;;  %v6585_v33 = vcombine.high %v3479_v28, %v3483_v34  ;;  %v6713_v36 = vcombine.high %v3607_v1, %v3611_v15  ;;  %v3435_v22 = vld [vmem:[#allocation5 + $0x38] sm:$0xff] }
 0x4c2   :  { %v3559_v16 = vld [vmem:[#allocation5 + $0x418] sm:$0xff] }
 0x4c3   :  { %5190 = vmatpush2.bf16.msra.mxu0 %v6638_v46  ;;  %v3603_v46 = vld [vmem:[#allocation5 + $0x578] sm:$0xff] }
 0x4c4   :  { %5231 = vmatpush2.bf16.msra.mxu1 %v6766_v43  ;;  %5191 = vmatprep.subr.bf16.mxu0 %v6631_v20  ;;  %v6584_v43 = vcombine.low %v3479_v28, %v3483_v34  ;;  %v6712_v20 = vcombine.low %v3607_v1, %v3611_v15  ;;  %v6705_v56 = vcombine.high %v3599_v37, %v3603_v46  ;;  %v3563_v13 = vld [vmem:[#allocation5 + $0x438] sm:$0xff] }
 0x4c5   :  { %5232 = vmatprep.subr.bf16.mxu1 %v6759_v14  ;;  %v6577_v14 = vcombine.high %v3471_v25, %v3475_v57  ;;  %v3555_v28 = vld [vmem:[#allocation5 + $0x3f8] sm:$0xff]  ;;  %v6664_v15 = vcombine.low %v3559_v16, %v3563_v13 }
 0x4c6   :  { %v3679_v34 = vld [vmem:[#allocation5 + $0x7d8] sm:$0xff] }
 0x4c7   :  { %5192 = vmatpush2.bf16.msra.mxu0 %v6630_v38  ;;  %v3595_v38 = vld [vmem:[#allocation5 + $0x538] sm:$0xff] }
 0x4c8   :  { %5233 = vmatpush2.bf16.msra.mxu1 %v6758_v39  ;;  %5193 = vmatprep.subr.bf16.mxu0 %v6623_v40  ;;  %v6576_v39 = vcombine.low %v3471_v25, %v3475_v57  ;;  %v6704_v40 = vcombine.low %v3599_v37, %v3603_v46  ;;  %v3543_v25 = vld [vmem:[#allocation5 + $0x398] sm:$0xff] }
 0x4c9   :  { %5234 = vmatprep.subr.bf16.mxu1 %v6751_v53  ;;  %v6569_v53 = vcombine.high %v3463_v5, %v3467_v30  ;;  %v3547_v57 = vld [vmem:[#allocation5 + $0x3b8] sm:$0xff] }
 0x4ca   :  { %v3675_v37 = vld [vmem:[#allocation5 + $0x7b8] sm:$0xff] }
 0x4cb   :  { %5194 = vmatpush2.bf16.msra.mxu0 %v6622_v4  ;;  %v6696_v4 = vcombine.low %v3591_v42, %v3595_v38 }
 0x4cc   :  { %5235 = vmatpush2.bf16.msra.mxu1 %v6750_v21  ;;  %5195 = vmatprep.subr.bf16.mxu0 %v6615_v63  ;;  %v6561_v21 = vcombine.high %v3455_v49, %v3459_v58  ;;  %v6689_v63 = vcombine.high %v3583_v9, %v3587_v17  ;;  %v3531_v49 = vld [vmem:[#allocation5 + $0x338] sm:$0xff] }
 0x4cd   :  { %5236 = vmatprep.subr.bf16.mxu1 %v6743_v52  ;;  %v3447_v52 = vld [vmem:[#allocation5 + $0x98] sm:$0xff] }
 0x4ce   :  { %v6552_v54 = vcombine.low %v3447_v52, %v3451_v55  ;;  %v3655_v58 = vld [vmem:[#allocation5 + $0x718] sm:$0xff] }
 0x4cf   :  { %5196 = vmatpush2.bf16.msra.mxu0 %v6614_v35  ;;  %v6688_v35 = vcombine.low %v3583_v9, %v3587_v17  ;;  %v3659_v9 = vld [vmem:[#allocation5 + $0x738] sm:$0xff] }
 0x4d0   :  { %5237 = vmatpush2.bf16.msra.mxu1 %v6742_v32  ;;  %5197 = vmatprep.subr.bf16.mxu0 %v6607_v59  ;;  %v6553_v32 = vcombine.high %v3447_v52, %v3451_v55  ;;  %v6681_v59 = vcombine.high %v3575_v2, %v3579_v3  ;;  %v3523_v52 = vld [vmem:[#allocation5 + $0x2f8] sm:$0xff] }
 0x4d1   :  { %5238 = vmatprep.subr.bf16.mxu1 %v6735_v24  ;;  %v3439_v24 = vld [vmem:[#allocation5 + $0x58] sm:$0xff] }
 0x4d2   :  { %v6544_v27 = vcombine.low %v3439_v24, %v3443_v47  ;;  %v3647_v55 = vld [vmem:[#allocation5 + $0x6d8] sm:$0xff] }
 0x4d3   :  { %5198 = vmatpush2.bf16.msra.mxu0 %v6606_v51  ;;  %v6680_v51 = vcombine.low %v3575_v2, %v3579_v3  ;;  %v3651_v2 = vld [vmem:[#allocation5 + $0x6f8] sm:$0xff] }
 0x4d4   :  { %5239 = vmatpush2.bf16.msra.mxu1 %v6734_v45  ;;  %5199 = vmatprep.subr.bf16.mxu0 %v6599_v48  ;;  %v6545_v45 = vcombine.high %v3439_v24, %v3443_v47  ;;  %v6673_v48 = vcombine.high %v3567_v44, %v3571_v50  ;;  %v3515_v24 = vld [vmem:[#allocation5 + $0x2b8] sm:$0xff] }
 0x4d5   :  { %5240 = vmatprep.subr.bf16.mxu1 %v6727_v61  ;;  %v3431_v61 = vld [vmem:[#allocation5 + $0x18] sm:$0xff] }
 0x4d6   :  { %v6536_v1 = vcombine.low %v3431_v61, %v3435_v22  ;;  %v3639_v47 = vld [vmem:[#allocation5 + $0x698] sm:$0xff] }
 0x4d7   :  { %5200 = vmatpush2.bf16.msra.mxu0 %v6598_v12  ;;  %v6672_v12 = vcombine.low %v3567_v44, %v3571_v50  ;;  %v3643_v44 = vld [vmem:[#allocation5 + $0x6b8] sm:$0xff] }
 0x4d8   :  { %5241 = vmatpush2.bf16.msra.mxu1 %v6726_v18  ;;  %5251 = vmatprep.subr.bf16.mxu0 %v6593_v23  ;;  %v6537_v18 = vcombine.high %v3431_v61, %v3435_v22  ;;  %v6665_v23 = vcombine.high %v3559_v16, %v3563_v13  ;;  %v3507_v61 = vld [vmem:[#allocation5 + $0x278] sm:$0xff] }
 0x4d9   :  { %5292 = vmatprep.subr.bf16.mxu1 %v6721_v11  ;;  %v3551_v11 = vld [vmem:[#allocation5 + $0x3d8] sm:$0xff] }
 0x4da   :  { %5202 = vmatmul.mubr.bf16.vlgmr.msra.gmra.mxu0 %v8980_v0  ;;  %v6656_v46 = vcombine.low %v3551_v11, %v3555_v28  ;;  %v3631_v22 = vld [vmem:[#allocation5 + $0x658] sm:$0xff] }
 0x4db   :  { %5243 = vmatmul.mubr.bf16.vlgmr.msra.gmra.mxu1 %v8982_v41  ;;  %5252 = vmatpush1.bf16.msra.mxu0 %v6592_v31  ;;  %v3683_v31 = vld [vmem:[#allocation5 + $0x7f8] sm:$0xff] }
 0x4dc   :  { %5283 = vmatprep.mubr.bf16.mxu0 %v8976_v62  ;;  %5293 = vmatpush1.bf16.msra.mxu1 %v6720_v8  ;;  %v6697_v62 = vcombine.high %v3591_v42, %v3595_v38  ;;  %v6657_v8 = vcombine.high %v3551_v11, %v3555_v28  ;;  %v3667_v42 = vld [vmem:[#allocation5 + $0x778] sm:$0xff]  ;;  %v6648_v38 = vcombine.low %v3543_v25, %v3547_v57 }
 0x4dd   :  { %5324 = vmatprep.mubr.bf16.mxu1 %v8978_v26  ;;  %5253 = vmatprep.subr.bf16.mxu0 %v6585_v33  ;;  %v6568_v26 = vcombine.low %v3463_v5, %v3467_v30  ;;  %v6785_v33 = vcombine.high %v3679_v34, %v3683_v31  ;;  %v3539_v5 = vld [vmem:[#allocation5 + $0x378] sm:$0xff] }
 0x4de   :  { %5294 = vmatprep.subr.bf16.mxu1 %v6713_v36  ;;  %v3671_v36 = vld [vmem:[#allocation5 + $0x798] sm:$0xff] }
 0x4df   :  { %5254 = vmatpush1.bf16.msra.mxu0 %v6584_v43  ;;  %v6784_v43 = vcombine.low %v3679_v34, %v3683_v31  ;;  %v3663_v30 = vld [vmem:[#allocation5 + $0x758] sm:$0xff] }
 0x4e0   :  { %5295 = vmatpush1.bf16.msra.mxu1 %v6712_v20  ;;  %5255 = vmatprep.subr.bf16.mxu0 %v6577_v14  ;;  %v6649_v20 = vcombine.high %v3543_v25, %v3547_v57  ;;  %v6777_v14 = vcombine.high %v3671_v36, %v3675_v37  ;;  %v3635_v16 = vld [vmem:[#allocation5 + $0x678] sm:$0xff] }
 0x4e1   :  { %5296 = vmatprep.subr.bf16.mxu1 %v6705_v56  ;;  %v3535_v56 = vld [vmem:[#allocation5 + $0x358] sm:$0xff] }
 0x4e2   :  { %v6640_v17 = vcombine.low %v3535_v56, %v3539_v5  ;;  %v3499_v11 = vld [vmem:[#allocation5 + $0x238] sm:$0xff] }
 0x4e3   :  { %5256 = vmatpush1.bf16.msra.mxu0 %v6576_v39  ;;  %v6776_v39 = vcombine.low %v3671_v36, %v3675_v37  ;;  %v3623_v28 = vld [vmem:[#allocation5 + $0x618] sm:$0xff] }
 0x4e4   :  { %5297 = vmatpush1.bf16.msra.mxu1 %v6704_v40  ;;  %5257 = vmatprep.subr.bf16.mxu0 %v6569_v53  ;;  %v6641_v40 = vcombine.high %v3535_v56, %v3539_v5  ;;  %v6769_v53 = vcombine.high %v3663_v30, %v3667_v42  ;;  %v3627_v34 = vld [vmem:[#allocation5 + $0x638] sm:$0xff] }
 0x4e5   :  { %5298 = vmatprep.subr.bf16.mxu1 %v6697_v62  ;;  %v3527_v62 = vld [vmem:[#allocation5 + $0x318] sm:$0xff]  ;;  %v6728_v25 = vcombine.low %v3623_v28, %v3627_v34 }
 0x4e6   :  { %v6632_v3 = vcombine.low %v3527_v62, %v3531_v49  ;;  %v7363_v57 = vld [vmem:[%s9250_s6 + $0x78] sm:$0xff]   ;;  %v9010_v36 = vld [vmem:[%s9255_s11] sm:$0xff] }
 0x4e7   :  { %5258 = vmatpush1.bf16.msra.mxu0 %v6568_v26  ;;  %v6768_v26 = vcombine.low %v3663_v30, %v3667_v42  ;;  %v7379_v37 = vld [vmem:[%s9250_s6 + $0xf8] sm:$0xff]   ;;  %v3692_v56 = vrot.slane %v9010_v36, %v3389_v29  ;;  %v7367_v29 = vld [vmem:[%s9250_s6 + $0x68] sm:$0xff]  }
 0x4e8   :  { %5299 = vmatpush1.bf16.msra.mxu1 %v6696_v4  ;;  %5259 = vmatprep.subr.bf16.mxu0 %v6561_v21  ;;  %v6633_v4 = vcombine.high %v3527_v62, %v3531_v49  ;;  %v6761_v21 = vcombine.high %v3655_v58, %v3659_v9  ;;  %v7383_v62 = vld [vmem:[%s9250_s6 + $0xe8] sm:$0xff]  }
 0x4e9   :  { %5300 = vmatprep.subr.bf16.mxu1 %v6689_v63  ;;  %v3519_v63 = vld [vmem:[#allocation5 + $0x2d8] sm:$0xff] }
 0x4ea   :  { %v6624_v50 = vcombine.low %v3519_v63, %v3523_v52 }
 0x4eb   :  { %5260 = vmatpush1.bf16.msra.mxu0 %v6560_v60  ;;  %v6760_v60 = vcombine.low %v3655_v58, %v3659_v9 }
 0x4ec   :  { %5301 = vmatpush1.bf16.msra.mxu1 %v6688_v35  ;;  %5261 = vmatprep.subr.bf16.mxu0 %v6553_v32  ;;  %v6625_v35 = vcombine.high %v3519_v63, %v3523_v52  ;;  %v6753_v32 = vcombine.high %v3647_v55, %v3651_v2  ;;  %v7384_v63 = vld [vmem:[%s9250_s6 + $0xa8] sm:$0xff]  }
 0x4ed   :  { %5302 = vmatprep.subr.bf16.mxu1 %v6681_v59  ;;  %v3511_v59 = vld [vmem:[#allocation5 + $0x298] sm:$0xff] }
 0x4ee   :  { %v6616_v13 = vcombine.low %v3511_v59, %v3515_v24 }
 0x4ef   :  { %5262 = vmatpush1.bf16.msra.mxu0 %v6552_v54  ;;  %v6752_v54 = vcombine.low %v3647_v55, %v3651_v2  ;;  %v7385_v55 = vld [vmem:[%s9250_s6 + $0xe0] sm:$0xff]  }
 0x4f0   :  { %5303 = vmatpush1.bf16.msra.mxu1 %v6680_v51  ;;  %5263 = vmatprep.subr.bf16.mxu0 %v6545_v45  ;;  %v6617_v51 = vcombine.high %v3511_v59, %v3515_v24  ;;  %v6745_v45 = vcombine.high %v3639_v47, %v3643_v44  ;;  %v7370_v2 = vld [vmem:[%s9250_s6 + $0x20] sm:$0xff]   ;;  %v7387_v59 = vld [vmem:[%s9250_s6 + $0xd8] sm:$0xff]  }
 0x4f1   :  { %5304 = vmatprep.subr.bf16.mxu1 %v6673_v48  ;;  %v3503_v48 = vld [vmem:[#allocation5 + $0x258] sm:$0xff] }
 0x4f2   :  { %v6608_v31 = vcombine.low %v3503_v48, %v3507_v61  ;;  %v7372_v24 = vld [vmem:[%s9250_s6 + $0x18] sm:$0xff]  }
 0x4f3   :  { %5264 = vmatpush1.bf16.msra.mxu0 %v6544_v27  ;;  %v6744_v27 = vcombine.low %v3639_v47, %v3643_v44  ;;  %v7373_v47 = vld [vmem:[%s9250_s6 + $0x50] sm:$0xff]   ;;  %v7388_v44 = vld [vmem:[%s9250_s6 + $0x98] sm:$0xff]  }
 0x4f4   :  { %5305 = vmatpush1.bf16.msra.mxu1 %v6672_v12  ;;  %5265 = vmatprep.subr.bf16.mxu0 %v6537_v18  ;;  %v6609_v12 = vcombine.high %v3503_v48, %v3507_v61  ;;  %v6737_v18 = vcombine.high %v3631_v22, %v3635_v16  ;;  %v7391_v48 = vld [vmem:[%s9250_s6 + $0xc8] sm:$0xff]  }
 0x4f5   :  { %5306 = vmatprep.subr.bf16.mxu1 %v6665_v23  ;;  %v3495_v23 = vld [vmem:[#allocation5 + $0x218] sm:$0xff]  ;;  %v7376_v61 = vld [vmem:[%s9250_s6 + $0x8] sm:$0xff]  }
 0x4f7   :  { %5266 = vmatpush1.bf16.msra.mxu0 %v6536_v1  ;;  %v6736_v1 = vcombine.low %v3631_v22, %v3635_v16  ;;  %v7377_v22 = vld [vmem:[%s9250_s6 + $0x40] sm:$0xff]   ;;  %v7392_v16 = vld [vmem:[%s9250_s6 + $0x88] sm:$0xff]  }
 0x4f8   :  { %5307 = vmatpush1.bf16.msra.mxu1 %v6664_v15  ;;  %5267 = vmatprep.subr.bf16.mxu0 %v6657_v8  ;;  %v6601_v15 = vcombine.high %v3495_v23, %v3499_v11  ;;  %v6729_v8 = vcombine.high %v3623_v28, %v3627_v34  ;;  %v7411_v28 = vld [vmem:[%s9250_s6 + $0x1f8] sm:$0xff]  }
 0x4f9   :  { %5308 = vmatprep.subr.bf16.mxu1 %v6785_v33  ;;  %v6600_v33 = vcombine.low %v3495_v23, %v3499_v11  ;;  %v7395_v23 = vld [vmem:[%s9250_s6 + $0x178] sm:$0xff]  }
 0x4fa   :  { %v7396_v34 = vld [vmem:[%s9250_s6 + $0x138] sm:$0xff]  }
 0x4fb   :  { %5268 = vmatpush2.bf16.msra.mxu0 %v6656_v46  ;;  %v3688_v46 = vrot.slane %v9010_v36, %v3385_v7  ;;  %v7381_v7 = vld [vmem:[%s9250_s6 + $0xf0] sm:$0xff]  }
 0x4fc   :  { %5309 = vmatpush2.bf16.msra.mxu1 %v6784_v43  ;;  %5269 = vmatprep.subr.bf16.mxu0 %v6649_v20  ;;  %v7364_v43 = vld [vmem:[%s9250_s6 + $0x38] sm:$0xff]   ;;  %v7365_v20 = vld [vmem:[%s9250_s6 + $0x70] sm:$0xff]  }
 0x4fd   :  { %5310 = vmatprep.subr.bf16.mxu1 %v6777_v14  ;;  %v7380_v14 = vld [vmem:[%s9250_s6 + $0xb8] sm:$0xff]  }
 0x4ff   :  { %5270 = vmatpush2.bf16.msra.mxu0 %v6648_v38  ;;  %v7366_v38 = vld [vmem:[%s9250_s6 + $0x30] sm:$0xff]  }
 0x500   :  { %5311 = vmatpush2.bf16.msra.mxu1 %v6776_v39  ;;  %5271 = vmatprep.subr.bf16.mxu0 %v6641_v40 }
 0x501   :  { %5312 = vmatprep.subr.bf16.mxu1 %v6769_v53 }
 0x503   :  { %5272 = vmatpush2.bf16.msra.mxu0 %v6640_v17  ;;  %v7368_v17 = vld [vmem:[%s9250_s6 + $0x28] sm:$0xff]  }
 0x504   :  { %5313 = vmatpush2.bf16.msra.mxu1 %v6768_v26  ;;  %5273 = vmatprep.subr.bf16.mxu0 %v6633_v4 }
 0x505   :  { %5314 = vmatprep.subr.bf16.mxu1 %v6761_v21  ;;  %v7369_v21 = vld [vmem:[%s9250_s6 + $0x60] sm:$0xff]  }
 0x507   :  { %5274 = vmatpush2.bf16.msra.mxu0 %v6632_v3 }
 0x508   :  { %5315 = vmatpush2.bf16.msra.mxu1 %v6760_v60  ;;  %5275 = vmatprep.subr.bf16.mxu0 %v6625_v35  ;;  %v7371_v35 = vld [vmem:[%s9250_s6 + $0x58] sm:$0xff]  }
 0x509   :  { %5316 = vmatprep.subr.bf16.mxu1 %v6753_v32  ;;  %v7386_v32 = vld [vmem:[%s9250_s6 + $0xa0] sm:$0xff]  }
 0x50b   :  { %5276 = vmatpush2.bf16.msra.mxu0 %v6624_v50  ;;  %v7389_v50 = vld [vmem:[%s9250_s6 + $0xd0] sm:$0xff]  }
 0x50c   :  { %5317 = vmatpush2.bf16.msra.mxu1 %v6752_v54  ;;  %5277 = vmatprep.subr.bf16.mxu0 %v6617_v51  ;;  %v7374_v54 = vld [vmem:[%s9250_s6 + $0x10] sm:$0xff]   ;;  %v7375_v51 = vld [vmem:[%s9250_s6 + $0x48] sm:$0xff]  }
 0x50d   :  { %5318 = vmatprep.subr.bf16.mxu1 %v6745_v45  ;;  %v7390_v45 = vld [vmem:[%s9250_s6 + $0x90] sm:$0xff]  }
 0x50f   :  { %5278 = vmatpush2.bf16.msra.mxu0 %v6616_v13 }
 0x510   :  { %5319 = vmatpush2.bf16.msra.mxu1 %v6744_v27  ;;  %5279 = vmatprep.subr.bf16.mxu0 %v6609_v12  ;;  %v7393_v27 = vld [vmem:[%s9250_s6 + $0xc0] sm:$0xff]  }
 0x511   :  { %5320 = vmatprep.subr.bf16.mxu1 %v6737_v18  ;;  %v7378_v12 = vld [vmem:[%s9250_s6] sm:$0xff]  }
 0x512   :  { %v7394_v18 = vld [vmem:[%s9250_s6 + $0x80] sm:$0xff]  }
 0x513   :  { %5280 = vmatpush2.bf16.msra.mxu0 %v6608_v31 }
 0x514   :  { %5321 = vmatpush2.bf16.msra.mxu1 %v6736_v1  ;;  %5281 = vmatprep.subr.bf16.mxu0 %v6601_v15  ;;  %v7397_v1 = vld [vmem:[%s9250_s6 + $0x170] sm:$0xff]  }
 0x515   :  { %5322 = vmatprep.subr.bf16.mxu1 %v6729_v8  ;;  %v7398_v15 = vld [vmem:[%s9250_s6 + $0x130] sm:$0xff]   ;;  %v7399_v8 = vld [vmem:[%s9250_s6 + $0x168] sm:$0xff]  }
 0x517   :  { %5282 = vmatpush2.bf16.msra.mxu0 %v6600_v33  ;;  %v7400_v33 = vld [vmem:[%s9250_s6 + $0x128] sm:$0xff]  }
 0x518   :  { %5323 = vmatpush2.bf16.msra.mxu1 %v6728_v25  ;;  %6939 = vmatprep.subr.bf16.mxu0 %v7363_v57  ;;  %v7401_v25 = vld [vmem:[%s9250_s6 + $0x160] sm:$0xff]  }
 0x519   :  { %6961 = vmatprep.subr.bf16.mxu1 %v7379_v37  ;;  %v7402_v57 = vld [vmem:[%s9250_s6 + $0x120] sm:$0xff]   ;;  %v7403_v37 = vld [vmem:[%s9250_s6 + $0x158] sm:$0xff]  }
 0x51a   :  { %5284 = vmatmul.mubr.bf16.vlgmr.msra.gmra.mxu0 %v8980_v0  ;;  %v5039_v5 = vpop.f32.mrf.mxu0  ;;  %v7382_v0 = vld [vmem:[%s9250_s6 + $0xb0] sm:$0xff]  }
 0x51b   :  { %v5080_v30 = vpop.f32.mrf.mxu1  ;;  %5325 = vmatmul.mubr.bf16.vlgmr.msra.gmra.mxu1 %v8982_v41  ;;  %v5040_v42 = vadd.f32 %v5039_v5, %v3688_v46  ;;  %6940 = vmatpush3.bf16.msra.mxu0 %v7364_v43  ;;  %v7404_v46 = vld [vmem:[%s9250_s6 + $0x118] sm:$0xff]   ;;  %v7405_v43 = vld [vmem:[%s9250_s6 + $0x150] sm:$0xff]   ;;  %v7410_v5 = vld [vmem:[%s9250_s6 + $0x100] sm:$0xff]  }
 0x51c   :  { %v5041_v39 = vpop.f32.mrf.mxu0  ;;  %6941 = vmatprep.subr.bf16.mxu0 %v7365_v20  ;;  %6962 = vmatpush3.bf16.msra.mxu1 %v7380_v14  ;;  %v7406_v20 = vld [vmem:[%s9250_s6 + $0x110] sm:$0xff]   ;;  %v7407_v14 = vld [vmem:[%s9250_s6 + $0x148] sm:$0xff]  }
 0x51d   :  { %v5082_v40 = vpop.f32.mrf.mxu1  ;;  %v9044_v53 = vadd.f32 %v5080_v30, %v5040_v42  ;;  %v5042_v41 = vadd.f32 %v5041_v39, %v3692_v56  ;;  %6963 = vmatprep.subr.bf16.mxu1 %v7381_v7  ;;  %v7408_v56 = vld [vmem:[%s9250_s6 + $0x108] sm:$0xff]   ;;  %v7409_v7 = vld [vmem:[%s9250_s6 + $0x140] sm:$0xff]   ;;  %v3696_v30 = vrot.slane %v9010_v36, %v3393_v10  ;;  %v3700_v42 = vrot.slane %v9010_v36, %v3397_v19 }
 0x51e   :  { %v5043_v49 = vpop.f32.mrf.mxu0 }
 0x51f   :  { %v5084_v58 = vpop.f32.mrf.mxu1  ;;  %5333 = vst [vmem:[#allocation12] sm:$0x3f] %v9044_v53  ;;  %v5083_v9 = vadd.f32 %v5082_v40, %v5042_v41  ;;  %6942 = vmatpush3.bf16.msra.mxu0 %v7366_v38  ;;  %v5349_v13 = vmul.f32 0.01, %v9044_v53  ;;  %vm5341_vm12 = vcmp.ge.f32.partialorder %v9044_v53, 0.0 }
 0x520   :  { %v5044_v26 = vpop.f32.mrf.mxu0  ;;  %6943 = vmatprep.subr.bf16.mxu0 %v7367_v29  ;;  %6964 = vmatpush3.bf16.msra.mxu1 %v7382_v0 }
 0x521   :  { %v5085_v4 = vpop.f32.mrf.mxu1  ;;  %5334 = vst [vmem:[#allocation12 + $0x8] sm:$0x3f] %v5083_v9  ;;  %v5350_v52 = vmul.f32 0.01, %v5083_v9  ;;  %vm5342_vm11 = vcmp.ge.f32.partialorder %v5083_v9, 0.0  ;;  %6965 = vmatprep.subr.bf16.mxu1 %v7383_v62  ;;  %v5357_v11 = vsel %vm5341_vm12, %v9044_v53, %v5349_v13 }
 0x522   :  { %v5365_v31 = vpack.c.bf16 %v5357_v11, %v5357_v11 }
 0x523   :  { %6944 = vmatpush3.bf16.msra.mxu0 %v7368_v17  ;;  %v5358_v3 = vsel %vm5342_vm11, %v5083_v9, %v5350_v52 }
 0x524   :  { %6945 = vmatprep.subr.bf16.mxu0 %v7369_v21  ;;  %v5366_v60 = vpack.c.bf16 %v5358_v3, %v5358_v3  ;;  %6966 = vmatpush3.bf16.msra.mxu1 %v7384_v63  ;;  %v7412_v63 = vld [vmem:[%s9250_s6 + $0x1b8] sm:$0xff]   ;;  %v7415_v3 = vld [vmem:[%s9250_s6 + $0x1e8] sm:$0xff]  }
 0x525   :  { %6967 = vmatprep.subr.bf16.mxu1 %v7385_v55  ;;  %v7413_v55 = vld [vmem:[%s9250_s6 + $0x1f0] sm:$0xff]  }
 0x526   :  { %5924 = vmatprep.mubr.bf16.mxu0 %v5366_v60  ;;  %v7416_v60 = vld [vmem:[%s9250_s6 + $0x1a8] sm:$0xff]  }
 0x527   :  { %6946 = vmatpush3.bf16.msra.mxu0 %v7370_v2  ;;  %v7414_v2 = vld [vmem:[%s9250_s6 + $0x1b0] sm:$0xff]  }
 0x528   :  { %6947 = vmatprep.subr.bf16.mxu0 %v7371_v35  ;;  %6968 = vmatpush3.bf16.msra.mxu1 %v7386_v32  ;;  %v7417_v35 = vld [vmem:[%s9250_s6 + $0x1e0] sm:$0xff]  }
 0x529   :  { %6969 = vmatprep.subr.bf16.mxu1 %v7387_v59  ;;  %v7418_v32 = vld [vmem:[%s9250_s6 + $0x1a0] sm:$0xff]   ;;  %v7419_v59 = vld [vmem:[%s9250_s6 + $0x1d8] sm:$0xff]  }
 0x52b   :  { %6948 = vmatpush3.bf16.msra.mxu0 %v7372_v24  ;;  %v7420_v24 = vld [vmem:[%s9250_s6 + $0x198] sm:$0xff]  }
 0x52c   :  { %6949 = vmatprep.subr.bf16.mxu0 %v7373_v47  ;;  %6970 = vmatpush3.bf16.msra.mxu1 %v7388_v44  ;;  %v7421_v47 = vld [vmem:[%s9250_s6 + $0x1d0] sm:$0xff]  }
 0x52d   :  { %6971 = vmatprep.subr.bf16.mxu1 %v7389_v50  ;;  %v7422_v44 = vld [vmem:[%s9250_s6 + $0x190] sm:$0xff]   ;;  %v7423_v50 = vld [vmem:[%s9250_s6 + $0x1c8] sm:$0xff]  }
 0x52f   :  { %6950 = vmatpush3.bf16.msra.mxu0 %v7374_v54  ;;  %v7424_v54 = vld [vmem:[%s9250_s6 + $0x188] sm:$0xff]  }
 0x530   :  { %6951 = vmatprep.subr.bf16.mxu0 %v7375_v51  ;;  %6972 = vmatpush3.bf16.msra.mxu1 %v7390_v45  ;;  %v7425_v51 = vld [vmem:[%s9250_s6 + $0x1c0] sm:$0xff]  }
 0x531   :  { %6973 = vmatprep.subr.bf16.mxu1 %v7391_v48  ;;  %v7426_v45 = vld [vmem:[%s9250_s6 + $0x180] sm:$0xff]   ;;  %v3703_v48 = vsub.s32 4, %v8959_v6  ;;  %s7545_s6 = smov [#allocation9]  }
 0x532   :  { %s6073_s1 = sshll.u32 %s7545_s6, 4  ;;  %s6074_s1 = int_to_ptr.vmem [resolvable:$true] %s6073_s1 }
 0x533   :  { %6952 = vmatpush3.bf16.msra.mxu0 %v7376_v61  ;;  %v3707_v61 = vsub.s32 5, %v8959_v6  ;;  %s7453_s9 = scalar_lea.vmem %s6074_s1, 384  ;;  %p7458_p6 = scmp.lt.s32.totalorder %s6074_s1, %s6074_s1 }
 0x534   :  { %6953 = vmatprep.subr.bf16.mxu0 %v7377_v22  ;;  %6974 = vmatpush3.bf16.msra.mxu1 %v7392_v16  ;;  %v3704_v22 = vrot.slane %v9010_v36, %v3703_v48  ;;  %p7454_p5 = scmp.ne.s32.totalorder %s6074_s1, %s7453_s9  ;;  %p7459_p7 = scmp.lt.s32.totalorder %s7453_s9, %s7453_s9 }
 0x535   :  { %6975 = vmatprep.subr.bf16.mxu1 %v7393_v27  ;;  %v3708_v16 = vrot.slane %v9010_v36, %v3707_v61 }
 0x536   :  { %p7460_p8 = por %p7459_p7, %p7458_p6 }
 0x537   :  { %6954 = vmatpush3.bf16.msra.mxu0 %v7378_v12 }
 0x538   :  { %6976 = vmatpush3.bf16.msra.mxu1 %v7394_v18  ;;  %6983 = vmatprep.subr.bf16.mxu0 %v7395_v23  ;;  %p7461_p9 = pnand %p7460_p8, %p7454_p5 }
 0x539   :  { %7005 = vmatprep.subr.bf16.mxu1 %v7411_v28 }
 0x53a   :  { %5925 = vmatmul.mubr.bf16.vlgmr.msra.gmra.mxu0 %v5365_v31 }
 0x53b   :  { %6984 = vmatpush3.bf16.msra.mxu0 %v7396_v34 }
 0x53c   :  { %6985 = vmatprep.subr.bf16.mxu0 %v7397_v1 }
 0x53f   :  { %6986 = vmatpush3.bf16.msra.mxu0 %v7398_v15 }
 0x540   :  { %6987 = vmatprep.subr.bf16.mxu0 %v7399_v8 }
 0x543   :  { %6988 = vmatpush3.bf16.msra.mxu0 %v7400_v33 }
 0x544   :  { %6989 = vmatprep.subr.bf16.mxu0 %v7401_v25 }
 0x547   :  { %6990 = vmatpush3.bf16.msra.mxu0 %v7402_v57 }
 0x548   :  { %6991 = vmatprep.subr.bf16.mxu0 %v7403_v37 }
 0x54b   :  { %6992 = vmatpush3.bf16.msra.mxu0 %v7404_v46 }
 0x54c   :  { %6993 = vmatprep.subr.bf16.mxu0 %v7405_v43 }
 0x54f   :  { %6994 = vmatpush3.bf16.msra.mxu0 %v7406_v20  ;;  %v3711_v20 = vsub.s32 6, %v8959_v6 }
 0x550   :  { %6995 = vmatprep.subr.bf16.mxu0 %v7407_v14  ;;  %v3715_v14 = vsub.s32 7, %v8959_v6 }
 0x553   :  { %6996 = vmatpush3.bf16.msra.mxu0 %v7408_v56  ;;  %v3712_v56 = vrot.slane %v9010_v36, %v3711_v20 }
 0x554   :  { %6997 = vmatprep.subr.bf16.mxu0 %v7409_v7  ;;  %v3716_v7 = vrot.slane %v9010_v36, %v3715_v14 }
 0x557   :  { %6998 = vmatpush3.bf16.msra.mxu0 %v7410_v5 }
 0x55a   :  { %v5121_v38 = vpop.f32.mrf.mxu0 }
 0x55b   :  { %v5162_v39 = vpop.f32.mrf.mxu1  ;;  %v5122_v40 = vadd.f32 %v5121_v38, %v3696_v30 }
 0x55c   :  { %v5123_v29 = vpop.f32.mrf.mxu0 }
 0x55d   :  { %v5164_v0 = vpop.f32.mrf.mxu1  ;;  %v5163_v53 = vadd.f32 %v5162_v39, %v5122_v40  ;;  %v5124_v41 = vadd.f32 %v5123_v29, %v3700_v42 }
 0x55e   :  { %v5125_v62 = vpop.f32.mrf.mxu0 }
 0x55f   :  { %v5166_v49 = vpop.f32.mrf.mxu1  ;;  %5335 = vst [vmem:[#allocation12 + $0x10] sm:$0x3f] %v5163_v53  ;;  %vm5343_vm13 = vcmp.ge.f32.partialorder %v5163_v53, 0.0  ;;  %v5351_v58 = vmul.f32 0.01, %v5163_v53  ;;  %v5165_v9 = vadd.f32 %v5164_v0, %v5124_v41 }
 0x560   :  { %v5126_v17 = vpop.f32.mrf.mxu0 }
 0x561   :  { %v5167_v10 = vpop.f32.mrf.mxu1  ;;  %5336 = vst [vmem:[#allocation12 + $0x18] sm:$0x3f] %v5165_v9  ;;  %v5352_v26 = vmul.f32 0.01, %v5165_v9  ;;  %vm5344_vm2 = vcmp.ge.f32.partialorder %v5165_v9, 0.0  ;;  %v5359_v4 = vsel %vm5343_vm13, %v5163_v53, %v5351_v58 }
 0x562   :  { %v5367_v52 = vpack.c.bf16 %v5359_v4, %v5359_v4 }
 0x563   :  { %v5360_v19 = vsel %vm5344_vm2, %v5165_v9, %v5352_v26 }
 0x564   :  { %v5368_v21 = vpack.c.bf16 %v5360_v19, %v5360_v19 }
 0x566   :  { %5964 = vmatprep.mubr.bf16.mxu1 %v5368_v21 }
 0x567   :  { %5965 = vmatmul.mubr.bf16.vlgmr.msra.gmra.mxu1 %v5367_v52  ;;  %v6786_v52 = vld [vmem:[#allocation4] ss:$0 sm:$0xff] }
 0x568   :  { %7006 = vmatpush3.bf16.msra.mxu1 %v7412_v63 }
 0x569   :  { %7007 = vmatprep.subr.bf16.mxu1 %v7413_v55 }
 0x56c   :  { %7008 = vmatpush3.bf16.msra.mxu1 %v7414_v2 }
 0x56d   :  { %7009 = vmatprep.subr.bf16.mxu1 %v7415_v3 }
 0x570   :  { %7010 = vmatpush3.bf16.msra.mxu1 %v7416_v60 }
 0x571   :  { %7011 = vmatprep.subr.bf16.mxu1 %v7417_v35 }
 0x574   :  { %7012 = vmatpush3.bf16.msra.mxu1 %v7418_v32 }
 0x575   :  { %7013 = vmatprep.subr.bf16.mxu1 %v7419_v59 }
 0x578   :  { %7014 = vmatpush3.bf16.msra.mxu1 %v7420_v24 }
 0x579   :  { %7015 = vmatprep.subr.bf16.mxu1 %v7421_v47 }
 0x57c   :  { %7016 = vmatpush3.bf16.msra.mxu1 %v7422_v44 }
 0x57d   :  { %7017 = vmatprep.subr.bf16.mxu1 %v7423_v50 }
 0x580   :  { %7018 = vmatpush3.bf16.msra.mxu1 %v7424_v54 }
 0x581   :  { %7019 = vmatprep.subr.bf16.mxu1 %v7425_v51 }
 0x584   :  { %7020 = vmatpush3.bf16.msra.mxu1 %v7426_v45 }
 0x59a   :  { %v5203_v13 = vpop.f32.mrf.mxu0 }
 0x59b   :  { %v5204_v27 = vadd.f32 %v5203_v13, %v3704_v22  ;;  %v5244_v12 = vpop.f32.mrf.mxu1 }
 0x59c   :  { %v5205_v18 = vpop.f32.mrf.mxu0 }
 0x59d   :  { %v5245_v23 = vadd.f32 %v5244_v12, %v5204_v27  ;;  %v5206_v11 = vadd.f32 %v5205_v18, %v3708_v16  ;;  %v5246_v28 = vpop.f32.mrf.mxu1 }
 0x59e   :  { %v5207_v34 = vpop.f32.mrf.mxu0 }
 0x59f   :  { %5337 = vst [vmem:[#allocation12 + $0x20] sm:$0x3f] %v5245_v23  ;;  %vm5345_vm8 = vcmp.ge.f32.partialorder %v5245_v23, 0.0  ;;  %v5353_v31 = vmul.f32 0.01, %v5245_v23  ;;  %v5247_v1 = vadd.f32 %v5246_v28, %v5206_v11  ;;  %v5248_v15 = vpop.f32.mrf.mxu1 }
 0x5a0   :  { %v5208_v8 = vpop.f32.mrf.mxu0 }
 0x5a1   :  { %5338 = vst [vmem:[#allocation12 + $0x28] sm:$0x3f] %v5247_v1  ;;  %v5354_v33 = vmul.f32 0.01, %v5247_v1  ;;  %v5249_v25 = vpop.f32.mrf.mxu1  ;;  %vm5346_vm7 = vcmp.ge.f32.partialorder %v5247_v1, 0.0  ;;  %v5361_v57 = vsel %vm5345_vm8, %v5245_v23, %v5353_v31 }
 0x5a2   :  { %v5369_v43 = vpack.c.bf16 %v5361_v57, %v5361_v57 }
 0x5a3   :  { %v5362_v37 = vsel %vm5346_vm7, %v5247_v1, %v5354_v33 }
 0x5a4   :  { %v5370_v46 = vpack.c.bf16 %v5362_v37, %v5362_v37 }
 0x5a6   :  { %6004 = vmatprep.mubr.bf16.mxu0 %v5370_v46 }
 0x5a7   :  { %6005 = vmatmul.mubr.bf16.vlgmr.msra.gmra.mxu0 %v5369_v43 }
 0x5da   :  { %v5285_v5 = vpop.f32.mrf.mxu0 }
 0x5db   :  { %v5286_v30 = vadd.f32 %v5285_v5, %v3712_v56  ;;  %v5326_v42 = vpop.f32.mrf.mxu1 }
 0x5dc   :  { %v5287_v38 = vpop.f32.mrf.mxu0 }
 0x5dd   :  { %v5327_v39 = vadd.f32 %v5326_v42, %v5286_v30  ;;  %v5288_v40 = vadd.f32 %v5287_v38, %v3716_v7  ;;  %v5328_v29 = vpop.f32.mrf.mxu1 }
 0x5de   :  { %v5289_v0 = vpop.f32.mrf.mxu0 }
 0x5df   :  { %5339 = vst [vmem:[#allocation12 + $0x30] sm:$0x3f] %v5327_v39  ;;  %vm5347_vm15 = vcmp.ge.f32.partialorder %v5327_v39, 0.0  ;;  %v5355_v53 = vmul.f32 0.01, %v5327_v39  ;;  %v5329_v41 = vadd.f32 %v5328_v29, %v5288_v40  ;;  %v5330_v62 = vpop.f32.mrf.mxu1 }
 0x5e0   :  { %v5290_v49 = vpop.f32.mrf.mxu0 }
 0x5e1   :  { %5340 = vst [vmem:[#allocation12 + $0x38] sm:$0x3f] %v5329_v41  ;;  %v5356_v6 = vmul.f32 0.01, %v5329_v41  ;;  %v5331_v58 = vpop.f32.mrf.mxu1  ;;  %vm5348_vm0 = vcmp.ge.f32.partialorder %v5329_v41, 0.0  ;;  %v5363_v9 = vsel %vm5347_vm15, %v5327_v39, %v5355_v53 }
 0x5e2   :  { %v5371_v10 = vpack.c.bf16 %v5363_v9, %v5363_v9 }
 0x5e3   :  { %v5364_v36 = vsel %vm5348_vm0, %v5329_v41, %v5356_v6 }
 0x5e4   :  { %v5372_v17 = vpack.c.bf16 %v5364_v36, %v5364_v36 }
 0x5e6   :  { %6044 = vmatprep.mubr.bf16.mxu1 %v5372_v17 }
 0x5e7   :  { %6045 = vmatmul.mubr.bf16.vlgmr.msra.gmra.mxu1 %v5371_v10 }
 0x5fa   :  { %v6955_v26 = vpop.f32.mrf.mxu0 }
 0x5fc   :  { %v6956_v4 = vpop.f32.mrf.mxu0 }
 0x5fd   :  { %v6957_v19 = vadd.f32 %v6956_v4, %v6955_v26 }
 0x5fe   :  { %v6958_v21 = vpop.f32.mrf.mxu0 }
 0x5ff   :  { %v5927_v3 = vadd.f32 %v6957_v19, %v6786_v52 }
 0x600   :  { %v6959_v63 = vpop.f32.mrf.mxu0 }
 0x627   :  { %v6977_v55 = vpop.f32.mrf.mxu1 }
 0x629   :  { %v6978_v2 = vpop.f32.mrf.mxu1 }
 0x62a   :  { %v6979_v60 = vadd.f32 %v6978_v2, %v6977_v55 }
 0x62b   :  { %v6980_v35 = vpop.f32.mrf.mxu1 }
 0x62c   :  { %v5967_v32 = vadd.f32 %v6979_v60, %v5927_v3 }
 0x62d   :  { %v6981_v59 = vpop.f32.mrf.mxu1 }
 0x62e   :  { %7464 = shalt.err (!%p7461_p9)
}
 0x62f   :  { %s7547_s20 = smov 128   ;;  %s7548_s11 = smov 8  }
 0x630   :  { %6079 = dma.vmem_to_hbm [thread:$0]  %s6074_s1, 384, %s9259_s15, [#allocation10], %s7547_s20, %s7547_s20, %s7548_s11  }
 0x631   :  { %s7473_s22 = scalar_lea.vmem %s6062_s3, 896  ;;  %p7478_p11 = scmp.lt.s32.totalorder %s6062_s3, %s6062_s3 }
 0x632   :  { %p7474_p10 = scmp.ne.s32.totalorder %s6062_s3, %s7473_s22  ;;  %p7479_p12 = scmp.lt.s32.totalorder %s7473_s22, %s7473_s22 }
 0x634   :  { %p7480_p13 = por %p7479_p12, %p7478_p11 }
 0x636   :  { %p7481_p0 = pnand %p7480_p13, %p7474_p10 }
 0x638   :  { %7484 = shalt.err (!%p7481_p0)
}
 0x639   :  { %6067 = dma.vmem_to_hbm [thread:$0]  %s6062_s3, 896, %s9258_s14, [#allocation7], %s7547_s20, %s7547_s20, %s7548_s11  }
 0x63a   :  { %s7549_s25 = smov [#allocation11]   ;;  %s7550_s26 = smov [#allocation12]  }
 0x63b   :  { %s6086_s2 = sshll.u32 %s7549_s25, 4  ;;  %s6096_s5 = sshll.u32 %s7550_s26, 4  ;;  %s6087_s2 = int_to_ptr.vmem [resolvable:$true] %s6086_s2  ;;  %s6097_s5 = int_to_ptr.vmem [resolvable:$true] %s6096_s5 }
 0x63c   :  { %s7493_s27 = scalar_lea.vmem %s6087_s2, 512  ;;  %p7498_p2 = scmp.lt.s32.totalorder %s6087_s2, %s6087_s2 }
 0x63d   :  { %p7494_p1 = scmp.ne.s32.totalorder %s6087_s2, %s7493_s27  ;;  %p7499_p3 = scmp.lt.s32.totalorder %s7493_s27, %s7493_s27 }
 0x63f   :  { %p7500_p4 = por %p7499_p3, %p7498_p2 }
 0x641   :  { %p7501_p5 = pnand %p7500_p4, %p7494_p1 }
 0x643   :  { %7504 = shalt.err (!%p7501_p5)
}
 0x644   :  { %6089 = dma.vmem_to_hbm [thread:$0]  %s6087_s2, 512, %s9260_s16, [#allocation10]  }
 0x645   :  { %s7513_s28 = scalar_lea.vmem %s6097_s5, 1024  ;;  %p7518_p7 = scmp.lt.s32.totalorder %s6097_s5, %s6097_s5 }
 0x646   :  { %p7514_p6 = scmp.ne.s32.totalorder %s6097_s5, %s7513_s28  ;;  %p7519_p8 = scmp.lt.s32.totalorder %s7513_s28, %s7513_s28 }
 0x648   :  { %p7520_p9 = por %p7519_p8, %p7518_p7 }
 0x64a   :  { %p7521_p10 = pnand %p7520_p9, %p7514_p6 }
 0x64c   :  { %7524 = shalt.err (!%p7521_p10)
}
 0x64d   :  { %6099 = dma.vmem_to_hbm [thread:$0]  %s6097_s5, 1024, %s9261_s17, [#allocation13]   ;;  %vm6052_vm3 = vcmask 5120  }
 0x667   :  { %v6999_v24 = vpop.f32.mrf.mxu0 }
 0x669   :  { %v7000_v47 = vpop.f32.mrf.mxu0 }
 0x66a   :  { %v7001_v44 = vadd.f32 %v7000_v47, %v6999_v24 }
 0x66b   :  { %v7002_v50 = vpop.f32.mrf.mxu0 }
 0x66c   :  { %v6007_v54 = vadd.f32 %v7001_v44, %v5967_v32 }
 0x66d   :  { %v7003_v51 = vpop.f32.mrf.mxu0 }
 0x6a7   :  { %v7021_v45 = vpop.f32.mrf.mxu1 }
 0x6a9   :  { %v7022_v48 = vpop.f32.mrf.mxu1 }
 0x6aa   :  { %v7023_v61 = vadd.f32 %v7022_v48, %v7021_v45 }
 0x6ab   :  { %v7024_v22 = vpop.f32.mrf.mxu1 }
 0x6ac   :  { %v6047_v16 = vadd.f32 %v7023_v61, %v6007_v54 }
 0x6ad   :  { %v7025_v13 = vpop.f32.mrf.mxu1 }
 0x6ae   :  { %6053 = vst.msk [vmem:[%s9262_s18] sm:$0x3f] %vm6052_vm3, %v6047_v16 }
 0x6af   :  { %7535 = dma.done.wait [#allocation7], 896  }
 0x6b0   :  { %7536 = vsyncadd [#allocation7], 4294966400 }
 0x6b1   :  { %7537 = dma.done.wait [#allocation10], 896  }
 0x6b2   :  { %7538 = vsyncadd [#allocation10], 4294966400 }
 0x6b3   :  { %7539 = dma.done.wait [#allocation13], 1024  }
 0x6b4   :  { %7540 = vsyncadd [#allocation13], 4294966272 }
 0x6b5   :  { %6118 = vsyncpa [#allocation6], 1 }
 0x6b6   :  { %6119 = vsyncpa [#allocation7], 1 }
 0x6b7   :  { %6120 = vsyncpa [#allocation10], 1 }
 0x6b8   :  { %6121 = vsyncpa [#allocation13], 1 }

</bundles_post_ra>
